<compile_context>
chip_gen: v5e
topology: v5e:2x2
jax: 0.10.0
libtpu: 0.0.40
codegen_flags: <defaults>
</compile_context>

<pallas_src>
import math

import jax
import jax.numpy as jnp
from jax.experimental import pallas as pl

# ---------------- model hyper-parameters (small, synthetic) -----------------
D_MODEL = 32
N_HEADS = 4
HEAD_DIM = D_MODEL // N_HEADS
D_FF = 64
N_LAYERS = 2
EPS = 1e-5
NEG_INF = -1e9


# ------------------------- fused decoder kernel ------------------------------
def _make_decoder_kernel(B, Sq, Sk, n_layers):
    """Build a single fused kernel: all decoder layers + final LayerNorm."""
    D, H, Dh, F = D_MODEL, N_HEADS, HEAD_DIM, D_FF

    def kernel(x_ref, enc_ref, smask_ref, cmask_ref,
               wqkv_s_ref, bqkv_s_ref, wo_s_ref, bo_s_ref,
               wq_c_ref, bq_c_ref, wkv_c_ref, bkv_c_ref,
               wo_c_ref, bo_c_ref,
               w1_ref, b1_ref, w2_ref, b2_ref,
               ln_g_ref, ln_b_ref, fin_g_ref, fin_b_ref,
               o_ref):
        x = x_ref[...].astype(jnp.float32)        # (B*Sq, D)
        enc = enc_ref[...].astype(jnp.float32)    # (B*Sk, D)
        smask = smask_ref[...]                    # (B*Sq, B*Sq) additive
        cmask = cmask_ref[...]                    # (B*Sq, B*Sk) additive

        # column ids, used to mask out "other head" columns (pure VPU work)
        col = jax.lax.broadcasted_iota(jnp.int32, (1, D), 1)

        def layer_norm(y, row):
            g = ln_g_ref[row:row + 1, :]
            b = ln_b_ref[row:row + 1, :]
            mu = jnp.mean(y, axis=-1, keepdims=True)
            var = jnp.mean((y - mu) ** 2, axis=-1, keepdims=True)
            return (y - mu) * jax.lax.rsqrt(var + EPS) * g + b

        def attention(q, k, v, mask):
            # q, k, v: (rows, D).  The 1/sqrt(d_k) scale is already folded into
            # the query projection.  Head h is selected by zeroing the other
            # head columns of q before the contraction (mathematically exact,
            # no lane slicing / transposes); batch separation comes from the
            # block-diagonal additive mask (cross-batch entries are -1e9 and
            # underflow to exactly 0 after the softmax).
            out = jnp.zeros_like(q)
            for h in range(H):
                hc = jnp.logical_and(col >= h * Dh, col < (h + 1) * Dh)
                qh = jnp.where(hc, q, 0.0)
                s = jax.lax.dot_general(                      # q @ k^T, no k.T
                    qh, k, (((1,), (1,)), ((), ())),
                    preferred_element_type=jnp.float32) + mask
                s = s - jnp.max(s, axis=-1, keepdims=True)
                p = jnp.exp(s)
                p = p / jnp.sum(p, axis=-1, keepdims=True)
                pv = jnp.dot(p, v, preferred_element_type=jnp.float32)
                out = jnp.where(hc, pv, out)
            return out

        for l in range(n_layers):
            # ---- masked self-attention (fused QKV matmul) ----
            qkv = (jnp.dot(x, wqkv_s_ref[l * D:(l + 1) * D, :],
                           preferred_element_type=jnp.float32)
                   + bqkv_s_ref[l:l + 1, :])                  # (B*Sq, 3D)
            sa = attention(qkv[:, 0:D], qkv[:, D:2 * D], qkv[:, 2 * D:3 * D],
                           smask)
            sa = (jnp.dot(sa, wo_s_ref[l * D:(l + 1) * D, :],
                          preferred_element_type=jnp.float32)
                  + bo_s_ref[l:l + 1, :])
            x = layer_norm(x + sa, 3 * l + 0)

            # ---- cross-attention (fused KV matmul on encoder output) ----
            qc = (jnp.dot(x, wq_c_ref[l * D:(l + 1) * D, :],
                          preferred_element_type=jnp.float32)
                  + bq_c_ref[l:l + 1, :])
            kv = (jnp.dot(enc, wkv_c_ref[l * D:(l + 1) * D, :],
                          preferred_element_type=jnp.float32)
                  + bkv_c_ref[l:l + 1, :])                    # (B*Sk, 2D)
            ca = attention(qc, kv[:, 0:D], kv[:, D:2 * D], cmask)
            ca = (jnp.dot(ca, wo_c_ref[l * D:(l + 1) * D, :],
                          preferred_element_type=jnp.float32)
                  + bo_c_ref[l:l + 1, :])
            x = layer_norm(x + ca, 3 * l + 1)

            # ---- position-wise feed-forward ----
            h1 = (jnp.dot(x, w1_ref[l * D:(l + 1) * D, :],
                          preferred_element_type=jnp.float32)
                  + b1_ref[l:l + 1, :])
            h1 = jnp.maximum(h1, 0.0)
            ff = (jnp.dot(h1, w2_ref[l * F:(l + 1) * F, :],
                          preferred_element_type=jnp.float32)
                  + b2_ref[l:l + 1, :])
            x = layer_norm(x + ff, 3 * l + 2)

        # ---- final LayerNormalisation ----
        mu = jnp.mean(x, axis=-1, keepdims=True)
        var = jnp.mean((x - mu) ** 2, axis=-1, keepdims=True)
        x = (x - mu) * jax.lax.rsqrt(var + EPS) * fin_g_ref[...] + fin_b_ref[...]
        o_ref[...] = x.astype(o_ref.dtype)

    return kernel


# ------------------- parameter packing (one-time transform) ------------------
def _pack_params(params):
    """Stack per-layer weights into 2-D arrays and fold the 1/sqrt(d_k)
    attention scale into the query projections (mathematically equivalent)."""
    scale = 1.0 / math.sqrt(HEAD_DIM)
    acc = {k: [] for k in ("wqkv_s", "bqkv_s", "wo_s", "bo_s",
                           "wq_c", "bq_c", "wkv_c", "bkv_c", "wo_c", "bo_c",
                           "w1", "b1", "w2", "b2", "ln_g", "ln_b")}
    for p in params["layers"]:
        sa, ca = p["self_attn"], p["cross_attn"]
        acc["wqkv_s"].append(
            jnp.concatenate([sa["wq"] * scale, sa["wk"], sa["wv"]], axis=1))
        acc["bqkv_s"].append(
            jnp.concatenate([sa["bq"] * scale, sa["bk"], sa["bv"]])[None, :])
        acc["wo_s"].append(sa["wo"])
        acc["bo_s"].append(sa["bo"][None, :])
        acc["wq_c"].append(ca["wq"] * scale)
        acc["bq_c"].append((ca["bq"] * scale)[None, :])
        acc["wkv_c"].append(jnp.concatenate([ca["wk"], ca["wv"]], axis=1))
        acc["bkv_c"].append(jnp.concatenate([ca["bk"], ca["bv"]])[None, :])
        acc["wo_c"].append(ca["wo"])
        acc["bo_c"].append(ca["bo"][None, :])
        acc["w1"].append(p["w1"])
        acc["b1"].append(p["b1"][None, :])
        acc["w2"].append(p["w2"])
        acc["b2"].append(p["b2"][None, :])
        acc["ln_g"].append(jnp.stack([p["ln1_g"], p["ln2_g"], p["ln3_g"]], 0))
        acc["ln_b"].append(jnp.stack([p["ln1_b"], p["ln2_b"], p["ln3_b"]], 0))
    return {k: jnp.concatenate(v, axis=0) for k, v in acc.items()}


def _expand_mask(mask, s_q, s_k):
    """(B, s_q, s_k) additive mask -> (B*s_q, B*s_k) block-diagonal additive
    mask, so all batches run through one attention matmul inside the kernel."""
    B = mask.shape[0]
    r_b = jnp.arange(B * s_q) // s_q
    r_i = jnp.arange(B * s_q) % s_q
    c_b = jnp.arange(B * s_k) // s_k
    c_j = jnp.arange(B * s_k) % s_k
    user = mask[r_b[:, None], r_i[:, None], c_j[None, :]].astype(jnp.float32)
    return jnp.where(r_b[:, None] == c_b[None, :], user, jnp.float32(NEG_INF))


# ------------------------------ forward pass ----------------------------------
@jax.jit
def decoder_forward(x, encoder_output, self_mask, cross_mask, params):
    B, Sq, D = x.shape
    Sk = encoder_output.shape[1]
    n_layers = len(params["layers"])
    packed = _pack_params(params)

    smask = _expand_mask(self_mask, Sq, Sq)      # (B*Sq, B*Sq)
    cmask = _expand_mask(cross_mask, Sq, Sk)     # (B*Sq, B*Sk)

    operands = [
        x.reshape(B * Sq, D),
        encoder_output.reshape(B * Sk, D),
        smask, cmask,
        packed["wqkv_s"], packed["bqkv_s"], packed["wo_s"], packed["bo_s"],
        packed["wq_c"], packed["bq_c"], packed["wkv_c"], packed["bkv_c"],
        packed["wo_c"], packed["bo_c"],
        packed["w1"], packed["b1"], packed["w2"], packed["b2"],
        packed["ln_g"], packed["ln_b"],
        params["final_g"][None, :], params["final_b"][None, :],
    ]

    kernel = _make_decoder_kernel(B, Sq, Sk, n_layers)
    out2d = pl.pallas_call(
        kernel,
        out_shape=jax.ShapeDtypeStruct((B * Sq, D), x.dtype),
        in_specs=[pl.BlockSpec(op.shape, lambda: (0, 0)) for op in operands],
        out_specs=pl.BlockSpec((B * Sq, D), lambda: (0, 0)),
    )(*operands)
    return out2d.reshape(B, Sq, D)


# ---------------------- deterministic parameter setup ------------------------
def _init_attn_params(key):
    ks = jax.random.split(key, 4)
    scale = 1.0 / math.sqrt(D_MODEL)
    return {
        "wq": jax.random.normal(ks[0], (D_MODEL, D_MODEL), jnp.float32) * scale,
        "bq": jnp.zeros((D_MODEL,), jnp.float32),
        "wk": jax.random.normal(ks[1], (D_MODEL, D_MODEL), jnp.float32) * scale,
        "bk": jnp.zeros((D_MODEL,), jnp.float32),
        "wv": jax.random.normal(ks[2], (D_MODEL, D_MODEL), jnp.float32) * scale,
        "bv": jnp.zeros((D_MODEL,), jnp.float32),
        "wo": jax.random.normal(ks[3], (D_MODEL, D_MODEL), jnp.float32) * scale,
        "bo": jnp.zeros((D_MODEL,), jnp.float32),
    }


def init_params(key):
    layers = []
    for i in range(N_LAYERS):
        lk = jax.random.fold_in(key, i)
        ks = jax.random.split(lk, 4)
        layers.append(
            {
                "self_attn": _init_attn_params(ks[0]),
                "cross_attn": _init_attn_params(ks[1]),
                "w1": jax.random.normal(ks[2], (D_MODEL, D_FF), jnp.float32)
                * (1.0 / math.sqrt(D_MODEL)),
                "b1": jnp.zeros((D_FF,), jnp.float32),
                "w2": jax.random.normal(ks[3], (D_FF, D_MODEL), jnp.float32)
                * (1.0 / math.sqrt(D_FF)),
                "b2": jnp.zeros((D_MODEL,), jnp.float32),
                "ln1_g": jnp.ones((D_MODEL,), jnp.float32),
                "ln1_b": jnp.zeros((D_MODEL,), jnp.float32),
                "ln2_g": jnp.ones((D_MODEL,), jnp.float32),
                "ln2_b": jnp.zeros((D_MODEL,), jnp.float32),
                "ln3_g": jnp.ones((D_MODEL,), jnp.float32),
                "ln3_b": jnp.zeros((D_MODEL,), jnp.float32),
            }
        )
    return {
        "layers": layers,
        "final_g": jnp.ones((D_MODEL,), jnp.float32),
        "final_b": jnp.zeros((D_MODEL,), jnp.float32),
    }


# ----------------------------------- main ------------------------------------
if __name__ == "__main__":
    B, S_DEC, S_ENC = 2, 8, 8

    key = jax.random.PRNGKey(0)
    k_x, k_enc, k_p = jax.random.split(key, 3)

    x = jax.random.normal(k_x, (B, S_DEC, D_MODEL), jnp.float32)
    encoder_output = jax.random.normal(k_enc, (B, S_ENC, D_MODEL), jnp.float32)

    # additive masks: causal self-mask, no cross-mask
    causal = jnp.triu(jnp.ones((S_DEC, S_DEC), jnp.float32), k=1) * NEG_INF
    self_mask = jnp.broadcast_to(causal, (B, S_DEC, S_DEC))
    cross_mask = jnp.zeros((B, S_DEC, S_ENC), jnp.float32)

    params = init_params(k_p)

    out = decoder_forward(x, encoder_output, self_mask, cross_mask, params)
    out = jax.block_until_ready(out)
    assert out.shape == (B, S_DEC, D_MODEL)
    assert bool(jnp.all(jnp.isfinite(out)))
    print("KERNEL_OK")
</pallas_src>

<mosaic_0001>
module attributes {stable_mosaic.version = 11 : i64} {
  func.func @kernel(%arg0: memref<16x32xf32, #tpu.memory_space<vmem>>, %arg1: memref<16x32xf32, #tpu.memory_space<vmem>>, %arg2: memref<16x16xf32, #tpu.memory_space<vmem>>, %arg3: memref<16x16xf32, #tpu.memory_space<vmem>>, %arg4: memref<64x96xf32, #tpu.memory_space<vmem>>, %arg5: memref<2x96xf32, #tpu.memory_space<vmem>>, %arg6: memref<64x32xf32, #tpu.memory_space<vmem>>, %arg7: memref<2x32xf32, #tpu.memory_space<vmem>>, %arg8: memref<64x32xf32, #tpu.memory_space<vmem>>, %arg9: memref<2x32xf32, #tpu.memory_space<vmem>>, %arg10: memref<64x64xf32, #tpu.memory_space<vmem>>, %arg11: memref<2x64xf32, #tpu.memory_space<vmem>>, %arg12: memref<64x32xf32, #tpu.memory_space<vmem>>, %arg13: memref<2x32xf32, #tpu.memory_space<vmem>>, %arg14: memref<64x64xf32, #tpu.memory_space<vmem>>, %arg15: memref<2x64xf32, #tpu.memory_space<vmem>>, %arg16: memref<128x32xf32, #tpu.memory_space<vmem>>, %arg17: memref<2x32xf32, #tpu.memory_space<vmem>>, %arg18: memref<6x32xf32, #tpu.memory_space<vmem>>, %arg19: memref<6x32xf32, #tpu.memory_space<vmem>>, %arg20: memref<1x32xf32, #tpu.memory_space<vmem>>, %arg21: memref<1x32xf32, #tpu.memory_space<vmem>>, %arg22: memref<16x32xf32, #tpu.memory_space<vmem>>) attributes {dimension_semantics = [], scalar_prefetch = 0 : i64, scratch_operands = 0 : i64, tpu.core_type = #tpu.core_type<tc>} {
    %c0 = arith.constant 0 : index
    %c0_0 = arith.constant 0 : index
    %0 = vector.load %arg0[%c0, %c0_0] : memref<16x32xf32, #tpu.memory_space<vmem>>, vector<16x32xf32>
    %c0_1 = arith.constant 0 : index
    %c0_2 = arith.constant 0 : index
    %1 = vector.load %arg1[%c0_1, %c0_2] : memref<16x32xf32, #tpu.memory_space<vmem>>, vector<16x32xf32>
    %c0_3 = arith.constant 0 : index
    %c0_4 = arith.constant 0 : index
    %2 = vector.load %arg2[%c0_3, %c0_4] : memref<16x16xf32, #tpu.memory_space<vmem>>, vector<16x16xf32>
    %c0_5 = arith.constant 0 : index
    %c0_6 = arith.constant 0 : index
    %3 = vector.load %arg3[%c0_5, %c0_6] : memref<16x16xf32, #tpu.memory_space<vmem>>, vector<16x16xf32>
    %4 = tpu.iota {dimensions = array<i32: 1>} : vector<1x32xi32>
    %c0_7 = arith.constant 0 : index
    %c0_8 = arith.constant 0 : index
    %5 = vector.load %arg4[%c0_7, %c0_8] : memref<64x96xf32, #tpu.memory_space<vmem>>, vector<32x96xf32>
    %cst = arith.constant dense<0.000000e+00> : vector<16x96xf32>
    %6 = tpu.matmul %0, %5, %cst {dimension_numbers = #tpu.dot_dimension_numbers<[1], [0], [0], [1], [0, 0, 1, 1], [], []>} : vector<16x32xf32>, vector<32x96xf32>, vector<16x96xf32> -> vector<16x96xf32>
    %c0_9 = arith.constant 0 : index
    %c0_10 = arith.constant 0 : index
    %7 = vector.load %arg5[%c0_9, %c0_10] : memref<2x96xf32, #tpu.memory_space<vmem>>, vector<1x96xf32>
    %8 = vector.broadcast %7 : vector<1x96xf32> to vector<16x96xf32>
    %9 = arith.addf %6, %8 : vector<16x96xf32>
    %10 = vector.extract_strided_slice %9 {offsets = [0, 0], sizes = [16, 32], strides = [1, 1]} : vector<16x96xf32> to vector<16x32xf32>
    %11 = vector.extract_strided_slice %9 {offsets = [0, 32], sizes = [16, 32], strides = [1, 1]} : vector<16x96xf32> to vector<16x32xf32>
    %12 = vector.extract_strided_slice %9 {offsets = [0, 64], sizes = [16, 32], strides = [1, 1]} : vector<16x96xf32> to vector<16x32xf32>
    %cst_11 = arith.constant 0.000000e+00 : f32
    %13 = vector.broadcast %cst_11 : f32 to vector<16x32xf32>
    %c0_i32 = arith.constant 0 : i32
    %14 = vector.broadcast %c0_i32 : i32 to vector<1x32xi32>
    %15 = arith.cmpi sge, %4, %14 : vector<1x32xi32>
    %c8_i32 = arith.constant 8 : i32
    %16 = vector.broadcast %c8_i32 : i32 to vector<1x32xi32>
    %17 = arith.cmpi slt, %4, %16 : vector<1x32xi32>
    %18 = arith.andi %15, %17 : vector<1x32xi1>
    %cst_12 = arith.constant 0.000000e+00 : f32
    %19 = vector.shape_cast %18 : vector<1x32xi1> to vector<1x32xi1>
    %20 = vector.broadcast %19 : vector<1x32xi1> to vector<16x32xi1>
    %21 = vector.broadcast %cst_12 : f32 to vector<16x32xf32>
    %22 = arith.select %20, %10, %21 : vector<16x32xi1>, vector<16x32xf32>
    %cst_13 = arith.constant dense<0.000000e+00> : vector<16x16xf32>
    %23 = tpu.matmul %22, %11, %cst_13 {dimension_numbers = #tpu.dot_dimension_numbers<[1], [1], [0], [0], [0, 0, 1, 0], [], []>} : vector<16x32xf32>, vector<16x32xf32>, vector<16x16xf32> -> vector<16x16xf32>
    %24 = arith.addf %23, %2 : vector<16x16xf32>
    %cst_14 = arith.constant dense<0xFF800000> : vector<16xf32>
    %25 = vector.multi_reduction <maximumf>, %24, %cst_14 [1] : vector<16x16xf32> to vector<16xf32>
    %26 = vector.shape_cast %25 : vector<16xf32> to vector<16x1xf32>
    %27 = vector.broadcast %26 : vector<16x1xf32> to vector<16x16xf32>
    %28 = arith.subf %24, %27 : vector<16x16xf32>
    %29 = math.exp %28 : vector<16x16xf32>
    %cst_15 = arith.constant dense<0.000000e+00> : vector<16xf32>
    %30 = vector.multi_reduction <add>, %29, %cst_15 [1] : vector<16x16xf32> to vector<16xf32>
    %31 = vector.shape_cast %30 : vector<16xf32> to vector<16x1xf32>
    %32 = vector.broadcast %31 : vector<16x1xf32> to vector<16x16xf32>
    %33 = arith.divf %29, %32 : vector<16x16xf32>
    %cst_16 = arith.constant dense<0.000000e+00> : vector<16x32xf32>
    %34 = tpu.matmul %33, %12, %cst_16 {dimension_numbers = #tpu.dot_dimension_numbers<[1], [0], [0], [1], [0, 0, 1, 1], [], []>} : vector<16x16xf32>, vector<16x32xf32>, vector<16x32xf32> -> vector<16x32xf32>
    %35 = vector.shape_cast %18 : vector<1x32xi1> to vector<1x32xi1>
    %36 = vector.broadcast %35 : vector<1x32xi1> to vector<16x32xi1>
    %37 = arith.select %36, %34, %13 : vector<16x32xi1>, vector<16x32xf32>
    %c8_i32_17 = arith.constant 8 : i32
    %38 = vector.broadcast %c8_i32_17 : i32 to vector<1x32xi32>
    %39 = arith.cmpi sge, %4, %38 : vector<1x32xi32>
    %c16_i32 = arith.constant 16 : i32
    %40 = vector.broadcast %c16_i32 : i32 to vector<1x32xi32>
    %41 = arith.cmpi slt, %4, %40 : vector<1x32xi32>
    %42 = arith.andi %39, %41 : vector<1x32xi1>
    %cst_18 = arith.constant 0.000000e+00 : f32
    %43 = vector.shape_cast %42 : vector<1x32xi1> to vector<1x32xi1>
    %44 = vector.broadcast %43 : vector<1x32xi1> to vector<16x32xi1>
    %45 = vector.broadcast %cst_18 : f32 to vector<16x32xf32>
    %46 = arith.select %44, %10, %45 : vector<16x32xi1>, vector<16x32xf32>
    %cst_19 = arith.constant dense<0.000000e+00> : vector<16x16xf32>
    %47 = tpu.matmul %46, %11, %cst_19 {dimension_numbers = #tpu.dot_dimension_numbers<[1], [1], [0], [0], [0, 0, 1, 0], [], []>} : vector<16x32xf32>, vector<16x32xf32>, vector<16x16xf32> -> vector<16x16xf32>
    %48 = arith.addf %47, %2 : vector<16x16xf32>
    %cst_20 = arith.constant dense<0xFF800000> : vector<16xf32>
    %49 = vector.multi_reduction <maximumf>, %48, %cst_20 [1] : vector<16x16xf32> to vector<16xf32>
    %50 = vector.shape_cast %49 : vector<16xf32> to vector<16x1xf32>
    %51 = vector.broadcast %50 : vector<16x1xf32> to vector<16x16xf32>
    %52 = arith.subf %48, %51 : vector<16x16xf32>
    %53 = math.exp %52 : vector<16x16xf32>
    %cst_21 = arith.constant dense<0.000000e+00> : vector<16xf32>
    %54 = vector.multi_reduction <add>, %53, %cst_21 [1] : vector<16x16xf32> to vector<16xf32>
    %55 = vector.shape_cast %54 : vector<16xf32> to vector<16x1xf32>
    %56 = vector.broadcast %55 : vector<16x1xf32> to vector<16x16xf32>
    %57 = arith.divf %53, %56 : vector<16x16xf32>
    %cst_22 = arith.constant dense<0.000000e+00> : vector<16x32xf32>
    %58 = tpu.matmul %57, %12, %cst_22 {dimension_numbers = #tpu.dot_dimension_numbers<[1], [0], [0], [1], [0, 0, 1, 1], [], []>} : vector<16x16xf32>, vector<16x32xf32>, vector<16x32xf32> -> vector<16x32xf32>
    %59 = vector.shape_cast %42 : vector<1x32xi1> to vector<1x32xi1>
    %60 = vector.broadcast %59 : vector<1x32xi1> to vector<16x32xi1>
    %61 = arith.select %60, %58, %37 : vector<16x32xi1>, vector<16x32xf32>
    %c16_i32_23 = arith.constant 16 : i32
    %62 = vector.broadcast %c16_i32_23 : i32 to vector<1x32xi32>
    %63 = arith.cmpi sge, %4, %62 : vector<1x32xi32>
    %c24_i32 = arith.constant 24 : i32
    %64 = vector.broadcast %c24_i32 : i32 to vector<1x32xi32>
    %65 = arith.cmpi slt, %4, %64 : vector<1x32xi32>
    %66 = arith.andi %63, %65 : vector<1x32xi1>
    %cst_24 = arith.constant 0.000000e+00 : f32
    %67 = vector.shape_cast %66 : vector<1x32xi1> to vector<1x32xi1>
    %68 = vector.broadcast %67 : vector<1x32xi1> to vector<16x32xi1>
    %69 = vector.broadcast %cst_24 : f32 to vector<16x32xf32>
    %70 = arith.select %68, %10, %69 : vector<16x32xi1>, vector<16x32xf32>
    %cst_25 = arith.constant dense<0.000000e+00> : vector<16x16xf32>
    %71 = tpu.matmul %70, %11, %cst_25 {dimension_numbers = #tpu.dot_dimension_numbers<[1], [1], [0], [0], [0, 0, 1, 0], [], []>} : vector<16x32xf32>, vector<16x32xf32>, vector<16x16xf32> -> vector<16x16xf32>
    %72 = arith.addf %71, %2 : vector<16x16xf32>
    %cst_26 = arith.constant dense<0xFF800000> : vector<16xf32>
    %73 = vector.multi_reduction <maximumf>, %72, %cst_26 [1] : vector<16x16xf32> to vector<16xf32>
    %74 = vector.shape_cast %73 : vector<16xf32> to vector<16x1xf32>
    %75 = vector.broadcast %74 : vector<16x1xf32> to vector<16x16xf32>
    %76 = arith.subf %72, %75 : vector<16x16xf32>
    %77 = math.exp %76 : vector<16x16xf32>
    %cst_27 = arith.constant dense<0.000000e+00> : vector<16xf32>
    %78 = vector.multi_reduction <add>, %77, %cst_27 [1] : vector<16x16xf32> to vector<16xf32>
    %79 = vector.shape_cast %78 : vector<16xf32> to vector<16x1xf32>
    %80 = vector.broadcast %79 : vector<16x1xf32> to vector<16x16xf32>
    %81 = arith.divf %77, %80 : vector<16x16xf32>
    %cst_28 = arith.constant dense<0.000000e+00> : vector<16x32xf32>
    %82 = tpu.matmul %81, %12, %cst_28 {dimension_numbers = #tpu.dot_dimension_numbers<[1], [0], [0], [1], [0, 0, 1, 1], [], []>} : vector<16x16xf32>, vector<16x32xf32>, vector<16x32xf32> -> vector<16x32xf32>
    %83 = vector.shape_cast %66 : vector<1x32xi1> to vector<1x32xi1>
    %84 = vector.broadcast %83 : vector<1x32xi1> to vector<16x32xi1>
    %85 = arith.select %84, %82, %61 : vector<16x32xi1>, vector<16x32xf32>
    %c24_i32_29 = arith.constant 24 : i32
    %86 = vector.broadcast %c24_i32_29 : i32 to vector<1x32xi32>
    %87 = arith.cmpi sge, %4, %86 : vector<1x32xi32>
    %c32_i32 = arith.constant 32 : i32
    %88 = vector.broadcast %c32_i32 : i32 to vector<1x32xi32>
    %89 = arith.cmpi slt, %4, %88 : vector<1x32xi32>
    %90 = arith.andi %87, %89 : vector<1x32xi1>
    %cst_30 = arith.constant 0.000000e+00 : f32
    %91 = vector.shape_cast %90 : vector<1x32xi1> to vector<1x32xi1>
    %92 = vector.broadcast %91 : vector<1x32xi1> to vector<16x32xi1>
    %93 = vector.broadcast %cst_30 : f32 to vector<16x32xf32>
    %94 = arith.select %92, %10, %93 : vector<16x32xi1>, vector<16x32xf32>
    %cst_31 = arith.constant dense<0.000000e+00> : vector<16x16xf32>
    %95 = tpu.matmul %94, %11, %cst_31 {dimension_numbers = #tpu.dot_dimension_numbers<[1], [1], [0], [0], [0, 0, 1, 0], [], []>} : vector<16x32xf32>, vector<16x32xf32>, vector<16x16xf32> -> vector<16x16xf32>
    %96 = arith.addf %95, %2 : vector<16x16xf32>
    %cst_32 = arith.constant dense<0xFF800000> : vector<16xf32>
    %97 = vector.multi_reduction <maximumf>, %96, %cst_32 [1] : vector<16x16xf32> to vector<16xf32>
    %98 = vector.shape_cast %97 : vector<16xf32> to vector<16x1xf32>
    %99 = vector.broadcast %98 : vector<16x1xf32> to vector<16x16xf32>
    %100 = arith.subf %96, %99 : vector<16x16xf32>
    %101 = math.exp %100 : vector<16x16xf32>
    %cst_33 = arith.constant dense<0.000000e+00> : vector<16xf32>
    %102 = vector.multi_reduction <add>, %101, %cst_33 [1] : vector<16x16xf32> to vector<16xf32>
    %103 = vector.shape_cast %102 : vector<16xf32> to vector<16x1xf32>
    %104 = vector.broadcast %103 : vector<16x1xf32> to vector<16x16xf32>
    %105 = arith.divf %101, %104 : vector<16x16xf32>
    %cst_34 = arith.constant dense<0.000000e+00> : vector<16x32xf32>
    %106 = tpu.matmul %105, %12, %cst_34 {dimension_numbers = #tpu.dot_dimension_numbers<[1], [0], [0], [1], [0, 0, 1, 1], [], []>} : vector<16x16xf32>, vector<16x32xf32>, vector<16x32xf32> -> vector<16x32xf32>
    %107 = vector.shape_cast %90 : vector<1x32xi1> to vector<1x32xi1>
    %108 = vector.broadcast %107 : vector<1x32xi1> to vector<16x32xi1>
    %109 = arith.select %108, %106, %85 : vector<16x32xi1>, vector<16x32xf32>
    %c0_35 = arith.constant 0 : index
    %c0_36 = arith.constant 0 : index
    %110 = vector.load %arg6[%c0_35, %c0_36] : memref<64x32xf32, #tpu.memory_space<vmem>>, vector<32x32xf32>
    %cst_37 = arith.constant dense<0.000000e+00> : vector<16x32xf32>
    %111 = tpu.matmul %109, %110, %cst_37 {dimension_numbers = #tpu.dot_dimension_numbers<[1], [0], [0], [1], [0, 0, 1, 1], [], []>} : vector<16x32xf32>, vector<32x32xf32>, vector<16x32xf32> -> vector<16x32xf32>
    %c0_38 = arith.constant 0 : index
    %c0_39 = arith.constant 0 : index
    %112 = vector.load %arg7[%c0_38, %c0_39] : memref<2x32xf32, #tpu.memory_space<vmem>>, vector<1x32xf32>
    %113 = vector.broadcast %112 : vector<1x32xf32> to vector<16x32xf32>
    %114 = arith.addf %111, %113 : vector<16x32xf32>
    %115 = arith.addf %0, %114 : vector<16x32xf32>
    %c0_40 = arith.constant 0 : index
    %c0_41 = arith.constant 0 : index
    %116 = vector.load %arg18[%c0_40, %c0_41] : memref<6x32xf32, #tpu.memory_space<vmem>>, vector<1x32xf32>
    %c0_42 = arith.constant 0 : index
    %c0_43 = arith.constant 0 : index
    %117 = vector.load %arg19[%c0_42, %c0_43] : memref<6x32xf32, #tpu.memory_space<vmem>>, vector<1x32xf32>
    %cst_44 = arith.constant dense<0.000000e+00> : vector<16xf32>
    %118 = vector.multi_reduction <add>, %115, %cst_44 [1] : vector<16x32xf32> to vector<16xf32>
    %119 = vector.shape_cast %118 : vector<16xf32> to vector<16x1xf32>
    %cst_45 = arith.constant 3.200000e+01 : f32
    %120 = vector.broadcast %cst_45 : f32 to vector<16x1xf32>
    %121 = arith.divf %119, %120 : vector<16x1xf32>
    %122 = vector.broadcast %121 : vector<16x1xf32> to vector<16x32xf32>
    %123 = arith.subf %115, %122 : vector<16x32xf32>
    %124 = arith.mulf %123, %123 : vector<16x32xf32>
    %cst_46 = arith.constant dense<0.000000e+00> : vector<16xf32>
    %125 = vector.multi_reduction <add>, %124, %cst_46 [1] : vector<16x32xf32> to vector<16xf32>
    %126 = vector.shape_cast %125 : vector<16xf32> to vector<16x1xf32>
    %cst_47 = arith.constant 3.200000e+01 : f32
    %127 = vector.broadcast %cst_47 : f32 to vector<16x1xf32>
    %128 = arith.divf %126, %127 : vector<16x1xf32>
    %129 = vector.broadcast %121 : vector<16x1xf32> to vector<16x32xf32>
    %130 = arith.subf %115, %129 : vector<16x32xf32>
    %cst_48 = arith.constant 9.99999974E-6 : f32
    %131 = vector.broadcast %cst_48 : f32 to vector<16x1xf32>
    %132 = arith.addf %128, %131 : vector<16x1xf32>
    %133 = math.rsqrt %132 : vector<16x1xf32>
    %134 = vector.broadcast %133 : vector<16x1xf32> to vector<16x32xf32>
    %135 = arith.mulf %130, %134 : vector<16x32xf32>
    %136 = vector.broadcast %116 : vector<1x32xf32> to vector<16x32xf32>
    %137 = arith.mulf %135, %136 : vector<16x32xf32>
    %138 = vector.broadcast %117 : vector<1x32xf32> to vector<16x32xf32>
    %139 = arith.addf %137, %138 : vector<16x32xf32>
    %c0_49 = arith.constant 0 : index
    %c0_50 = arith.constant 0 : index
    %140 = vector.load %arg8[%c0_49, %c0_50] : memref<64x32xf32, #tpu.memory_space<vmem>>, vector<32x32xf32>
    %cst_51 = arith.constant dense<0.000000e+00> : vector<16x32xf32>
    %141 = tpu.matmul %139, %140, %cst_51 {dimension_numbers = #tpu.dot_dimension_numbers<[1], [0], [0], [1], [0, 0, 1, 1], [], []>} : vector<16x32xf32>, vector<32x32xf32>, vector<16x32xf32> -> vector<16x32xf32>
    %c0_52 = arith.constant 0 : index
    %c0_53 = arith.constant 0 : index
    %142 = vector.load %arg9[%c0_52, %c0_53] : memref<2x32xf32, #tpu.memory_space<vmem>>, vector<1x32xf32>
    %143 = vector.broadcast %142 : vector<1x32xf32> to vector<16x32xf32>
    %144 = arith.addf %141, %143 : vector<16x32xf32>
    %c0_54 = arith.constant 0 : index
    %c0_55 = arith.constant 0 : index
    %145 = vector.load %arg10[%c0_54, %c0_55] : memref<64x64xf32, #tpu.memory_space<vmem>>, vector<32x64xf32>
    %cst_56 = arith.constant dense<0.000000e+00> : vector<16x64xf32>
    %146 = tpu.matmul %1, %145, %cst_56 {dimension_numbers = #tpu.dot_dimension_numbers<[1], [0], [0], [1], [0, 0, 1, 1], [], []>} : vector<16x32xf32>, vector<32x64xf32>, vector<16x64xf32> -> vector<16x64xf32>
    %c0_57 = arith.constant 0 : index
    %c0_58 = arith.constant 0 : index
    %147 = vector.load %arg11[%c0_57, %c0_58] : memref<2x64xf32, #tpu.memory_space<vmem>>, vector<1x64xf32>
    %148 = vector.broadcast %147 : vector<1x64xf32> to vector<16x64xf32>
    %149 = arith.addf %146, %148 : vector<16x64xf32>
    %150 = vector.extract_strided_slice %149 {offsets = [0, 0], sizes = [16, 32], strides = [1, 1]} : vector<16x64xf32> to vector<16x32xf32>
    %151 = vector.extract_strided_slice %149 {offsets = [0, 32], sizes = [16, 32], strides = [1, 1]} : vector<16x64xf32> to vector<16x32xf32>
    %cst_59 = arith.constant 0.000000e+00 : f32
    %152 = vector.broadcast %cst_59 : f32 to vector<16x32xf32>
    %c0_i32_60 = arith.constant 0 : i32
    %153 = vector.broadcast %c0_i32_60 : i32 to vector<1x32xi32>
    %154 = arith.cmpi sge, %4, %153 : vector<1x32xi32>
    %c8_i32_61 = arith.constant 8 : i32
    %155 = vector.broadcast %c8_i32_61 : i32 to vector<1x32xi32>
    %156 = arith.cmpi slt, %4, %155 : vector<1x32xi32>
    %157 = arith.andi %154, %156 : vector<1x32xi1>
    %cst_62 = arith.constant 0.000000e+00 : f32
    %158 = vector.shape_cast %157 : vector<1x32xi1> to vector<1x32xi1>
    %159 = vector.broadcast %158 : vector<1x32xi1> to vector<16x32xi1>
    %160 = vector.broadcast %cst_62 : f32 to vector<16x32xf32>
    %161 = arith.select %159, %144, %160 : vector<16x32xi1>, vector<16x32xf32>
    %cst_63 = arith.constant dense<0.000000e+00> : vector<16x16xf32>
    %162 = tpu.matmul %161, %150, %cst_63 {dimension_numbers = #tpu.dot_dimension_numbers<[1], [1], [0], [0], [0, 0, 1, 0], [], []>} : vector<16x32xf32>, vector<16x32xf32>, vector<16x16xf32> -> vector<16x16xf32>
    %163 = arith.addf %162, %3 : vector<16x16xf32>
    %cst_64 = arith.constant dense<0xFF800000> : vector<16xf32>
    %164 = vector.multi_reduction <maximumf>, %163, %cst_64 [1] : vector<16x16xf32> to vector<16xf32>
    %165 = vector.shape_cast %164 : vector<16xf32> to vector<16x1xf32>
    %166 = vector.broadcast %165 : vector<16x1xf32> to vector<16x16xf32>
    %167 = arith.subf %163, %166 : vector<16x16xf32>
    %168 = math.exp %167 : vector<16x16xf32>
    %cst_65 = arith.constant dense<0.000000e+00> : vector<16xf32>
    %169 = vector.multi_reduction <add>, %168, %cst_65 [1] : vector<16x16xf32> to vector<16xf32>
    %170 = vector.shape_cast %169 : vector<16xf32> to vector<16x1xf32>
    %171 = vector.broadcast %170 : vector<16x1xf32> to vector<16x16xf32>
    %172 = arith.divf %168, %171 : vector<16x16xf32>
    %cst_66 = arith.constant dense<0.000000e+00> : vector<16x32xf32>
    %173 = tpu.matmul %172, %151, %cst_66 {dimension_numbers = #tpu.dot_dimension_numbers<[1], [0], [0], [1], [0, 0, 1, 1], [], []>} : vector<16x16xf32>, vector<16x32xf32>, vector<16x32xf32> -> vector<16x32xf32>
    %174 = vector.shape_cast %157 : vector<1x32xi1> to vector<1x32xi1>
    %175 = vector.broadcast %174 : vector<1x32xi1> to vector<16x32xi1>
    %176 = arith.select %175, %173, %152 : vector<16x32xi1>, vector<16x32xf32>
    %c8_i32_67 = arith.constant 8 : i32
    %177 = vector.broadcast %c8_i32_67 : i32 to vector<1x32xi32>
    %178 = arith.cmpi sge, %4, %177 : vector<1x32xi32>
    %c16_i32_68 = arith.constant 16 : i32
    %179 = vector.broadcast %c16_i32_68 : i32 to vector<1x32xi32>
    %180 = arith.cmpi slt, %4, %179 : vector<1x32xi32>
    %181 = arith.andi %178, %180 : vector<1x32xi1>
    %cst_69 = arith.constant 0.000000e+00 : f32
    %182 = vector.shape_cast %181 : vector<1x32xi1> to vector<1x32xi1>
    %183 = vector.broadcast %182 : vector<1x32xi1> to vector<16x32xi1>
    %184 = vector.broadcast %cst_69 : f32 to vector<16x32xf32>
    %185 = arith.select %183, %144, %184 : vector<16x32xi1>, vector<16x32xf32>
    %cst_70 = arith.constant dense<0.000000e+00> : vector<16x16xf32>
    %186 = tpu.matmul %185, %150, %cst_70 {dimension_numbers = #tpu.dot_dimension_numbers<[1], [1], [0], [0], [0, 0, 1, 0], [], []>} : vector<16x32xf32>, vector<16x32xf32>, vector<16x16xf32> -> vector<16x16xf32>
    %187 = arith.addf %186, %3 : vector<16x16xf32>
    %cst_71 = arith.constant dense<0xFF800000> : vector<16xf32>
    %188 = vector.multi_reduction <maximumf>, %187, %cst_71 [1] : vector<16x16xf32> to vector<16xf32>
    %189 = vector.shape_cast %188 : vector<16xf32> to vector<16x1xf32>
    %190 = vector.broadcast %189 : vector<16x1xf32> to vector<16x16xf32>
    %191 = arith.subf %187, %190 : vector<16x16xf32>
    %192 = math.exp %191 : vector<16x16xf32>
    %cst_72 = arith.constant dense<0.000000e+00> : vector<16xf32>
    %193 = vector.multi_reduction <add>, %192, %cst_72 [1] : vector<16x16xf32> to vector<16xf32>
    %194 = vector.shape_cast %193 : vector<16xf32> to vector<16x1xf32>
    %195 = vector.broadcast %194 : vector<16x1xf32> to vector<16x16xf32>
    %196 = arith.divf %192, %195 : vector<16x16xf32>
    %cst_73 = arith.constant dense<0.000000e+00> : vector<16x32xf32>
    %197 = tpu.matmul %196, %151, %cst_73 {dimension_numbers = #tpu.dot_dimension_numbers<[1], [0], [0], [1], [0, 0, 1, 1], [], []>} : vector<16x16xf32>, vector<16x32xf32>, vector<16x32xf32> -> vector<16x32xf32>
    %198 = vector.shape_cast %181 : vector<1x32xi1> to vector<1x32xi1>
    %199 = vector.broadcast %198 : vector<1x32xi1> to vector<16x32xi1>
    %200 = arith.select %199, %197, %176 : vector<16x32xi1>, vector<16x32xf32>
    %c16_i32_74 = arith.constant 16 : i32
    %201 = vector.broadcast %c16_i32_74 : i32 to vector<1x32xi32>
    %202 = arith.cmpi sge, %4, %201 : vector<1x32xi32>
    %c24_i32_75 = arith.constant 24 : i32
    %203 = vector.broadcast %c24_i32_75 : i32 to vector<1x32xi32>
    %204 = arith.cmpi slt, %4, %203 : vector<1x32xi32>
    %205 = arith.andi %202, %204 : vector<1x32xi1>
    %cst_76 = arith.constant 0.000000e+00 : f32
    %206 = vector.shape_cast %205 : vector<1x32xi1> to vector<1x32xi1>
    %207 = vector.broadcast %206 : vector<1x32xi1> to vector<16x32xi1>
    %208 = vector.broadcast %cst_76 : f32 to vector<16x32xf32>
    %209 = arith.select %207, %144, %208 : vector<16x32xi1>, vector<16x32xf32>
    %cst_77 = arith.constant dense<0.000000e+00> : vector<16x16xf32>
    %210 = tpu.matmul %209, %150, %cst_77 {dimension_numbers = #tpu.dot_dimension_numbers<[1], [1], [0], [0], [0, 0, 1, 0], [], []>} : vector<16x32xf32>, vector<16x32xf32>, vector<16x16xf32> -> vector<16x16xf32>
    %211 = arith.addf %210, %3 : vector<16x16xf32>
    %cst_78 = arith.constant dense<0xFF800000> : vector<16xf32>
    %212 = vector.multi_reduction <maximumf>, %211, %cst_78 [1] : vector<16x16xf32> to vector<16xf32>
    %213 = vector.shape_cast %212 : vector<16xf32> to vector<16x1xf32>
    %214 = vector.broadcast %213 : vector<16x1xf32> to vector<16x16xf32>
    %215 = arith.subf %211, %214 : vector<16x16xf32>
    %216 = math.exp %215 : vector<16x16xf32>
    %cst_79 = arith.constant dense<0.000000e+00> : vector<16xf32>
    %217 = vector.multi_reduction <add>, %216, %cst_79 [1] : vector<16x16xf32> to vector<16xf32>
    %218 = vector.shape_cast %217 : vector<16xf32> to vector<16x1xf32>
    %219 = vector.broadcast %218 : vector<16x1xf32> to vector<16x16xf32>
    %220 = arith.divf %216, %219 : vector<16x16xf32>
    %cst_80 = arith.constant dense<0.000000e+00> : vector<16x32xf32>
    %221 = tpu.matmul %220, %151, %cst_80 {dimension_numbers = #tpu.dot_dimension_numbers<[1], [0], [0], [1], [0, 0, 1, 1], [], []>} : vector<16x16xf32>, vector<16x32xf32>, vector<16x32xf32> -> vector<16x32xf32>
    %222 = vector.shape_cast %205 : vector<1x32xi1> to vector<1x32xi1>
    %223 = vector.broadcast %222 : vector<1x32xi1> to vector<16x32xi1>
    %224 = arith.select %223, %221, %200 : vector<16x32xi1>, vector<16x32xf32>
    %c24_i32_81 = arith.constant 24 : i32
    %225 = vector.broadcast %c24_i32_81 : i32 to vector<1x32xi32>
    %226 = arith.cmpi sge, %4, %225 : vector<1x32xi32>
    %c32_i32_82 = arith.constant 32 : i32
    %227 = vector.broadcast %c32_i32_82 : i32 to vector<1x32xi32>
    %228 = arith.cmpi slt, %4, %227 : vector<1x32xi32>
    %229 = arith.andi %226, %228 : vector<1x32xi1>
    %cst_83 = arith.constant 0.000000e+00 : f32
    %230 = vector.shape_cast %229 : vector<1x32xi1> to vector<1x32xi1>
    %231 = vector.broadcast %230 : vector<1x32xi1> to vector<16x32xi1>
    %232 = vector.broadcast %cst_83 : f32 to vector<16x32xf32>
    %233 = arith.select %231, %144, %232 : vector<16x32xi1>, vector<16x32xf32>
    %cst_84 = arith.constant dense<0.000000e+00> : vector<16x16xf32>
    %234 = tpu.matmul %233, %150, %cst_84 {dimension_numbers = #tpu.dot_dimension_numbers<[1], [1], [0], [0], [0, 0, 1, 0], [], []>} : vector<16x32xf32>, vector<16x32xf32>, vector<16x16xf32> -> vector<16x16xf32>
    %235 = arith.addf %234, %3 : vector<16x16xf32>
    %cst_85 = arith.constant dense<0xFF800000> : vector<16xf32>
    %236 = vector.multi_reduction <maximumf>, %235, %cst_85 [1] : vector<16x16xf32> to vector<16xf32>
    %237 = vector.shape_cast %236 : vector<16xf32> to vector<16x1xf32>
    %238 = vector.broadcast %237 : vector<16x1xf32> to vector<16x16xf32>
    %239 = arith.subf %235, %238 : vector<16x16xf32>
    %240 = math.exp %239 : vector<16x16xf32>
    %cst_86 = arith.constant dense<0.000000e+00> : vector<16xf32>
    %241 = vector.multi_reduction <add>, %240, %cst_86 [1] : vector<16x16xf32> to vector<16xf32>
    %242 = vector.shape_cast %241 : vector<16xf32> to vector<16x1xf32>
    %243 = vector.broadcast %242 : vector<16x1xf32> to vector<16x16xf32>
    %244 = arith.divf %240, %243 : vector<16x16xf32>
    %cst_87 = arith.constant dense<0.000000e+00> : vector<16x32xf32>
    %245 = tpu.matmul %244, %151, %cst_87 {dimension_numbers = #tpu.dot_dimension_numbers<[1], [0], [0], [1], [0, 0, 1, 1], [], []>} : vector<16x16xf32>, vector<16x32xf32>, vector<16x32xf32> -> vector<16x32xf32>
    %246 = vector.shape_cast %229 : vector<1x32xi1> to vector<1x32xi1>
    %247 = vector.broadcast %246 : vector<1x32xi1> to vector<16x32xi1>
    %248 = arith.select %247, %245, %224 : vector<16x32xi1>, vector<16x32xf32>
    %c0_88 = arith.constant 0 : index
    %c0_89 = arith.constant 0 : index
    %249 = vector.load %arg12[%c0_88, %c0_89] : memref<64x32xf32, #tpu.memory_space<vmem>>, vector<32x32xf32>
    %cst_90 = arith.constant dense<0.000000e+00> : vector<16x32xf32>
    %250 = tpu.matmul %248, %249, %cst_90 {dimension_numbers = #tpu.dot_dimension_numbers<[1], [0], [0], [1], [0, 0, 1, 1], [], []>} : vector<16x32xf32>, vector<32x32xf32>, vector<16x32xf32> -> vector<16x32xf32>
    %c0_91 = arith.constant 0 : index
    %c0_92 = arith.constant 0 : index
    %251 = vector.load %arg13[%c0_91, %c0_92] : memref<2x32xf32, #tpu.memory_space<vmem>>, vector<1x32xf32>
    %252 = vector.broadcast %251 : vector<1x32xf32> to vector<16x32xf32>
    %253 = arith.addf %250, %252 : vector<16x32xf32>
    %254 = arith.addf %139, %253 : vector<16x32xf32>
    %c1 = arith.constant 1 : index
    %c0_93 = arith.constant 0 : index
    %255 = vector.load %arg18[%c1, %c0_93] : memref<6x32xf32, #tpu.memory_space<vmem>>, vector<1x32xf32>
    %c1_94 = arith.constant 1 : index
    %c0_95 = arith.constant 0 : index
    %256 = vector.load %arg19[%c1_94, %c0_95] : memref<6x32xf32, #tpu.memory_space<vmem>>, vector<1x32xf32>
    %cst_96 = arith.constant dense<0.000000e+00> : vector<16xf32>
    %257 = vector.multi_reduction <add>, %254, %cst_96 [1] : vector<16x32xf32> to vector<16xf32>
    %258 = vector.shape_cast %257 : vector<16xf32> to vector<16x1xf32>
    %cst_97 = arith.constant 3.200000e+01 : f32
    %259 = vector.broadcast %cst_97 : f32 to vector<16x1xf32>
    %260 = arith.divf %258, %259 : vector<16x1xf32>
    %261 = vector.broadcast %260 : vector<16x1xf32> to vector<16x32xf32>
    %262 = arith.subf %254, %261 : vector<16x32xf32>
    %263 = arith.mulf %262, %262 : vector<16x32xf32>
    %cst_98 = arith.constant dense<0.000000e+00> : vector<16xf32>
    %264 = vector.multi_reduction <add>, %263, %cst_98 [1] : vector<16x32xf32> to vector<16xf32>
    %265 = vector.shape_cast %264 : vector<16xf32> to vector<16x1xf32>
    %cst_99 = arith.constant 3.200000e+01 : f32
    %266 = vector.broadcast %cst_99 : f32 to vector<16x1xf32>
    %267 = arith.divf %265, %266 : vector<16x1xf32>
    %268 = vector.broadcast %260 : vector<16x1xf32> to vector<16x32xf32>
    %269 = arith.subf %254, %268 : vector<16x32xf32>
    %cst_100 = arith.constant 9.99999974E-6 : f32
    %270 = vector.broadcast %cst_100 : f32 to vector<16x1xf32>
    %271 = arith.addf %267, %270 : vector<16x1xf32>
    %272 = math.rsqrt %271 : vector<16x1xf32>
    %273 = vector.broadcast %272 : vector<16x1xf32> to vector<16x32xf32>
    %274 = arith.mulf %269, %273 : vector<16x32xf32>
    %275 = vector.broadcast %255 : vector<1x32xf32> to vector<16x32xf32>
    %276 = arith.mulf %274, %275 : vector<16x32xf32>
    %277 = vector.broadcast %256 : vector<1x32xf32> to vector<16x32xf32>
    %278 = arith.addf %276, %277 : vector<16x32xf32>
    %c0_101 = arith.constant 0 : index
    %c0_102 = arith.constant 0 : index
    %279 = vector.load %arg14[%c0_101, %c0_102] : memref<64x64xf32, #tpu.memory_space<vmem>>, vector<32x64xf32>
    %cst_103 = arith.constant dense<0.000000e+00> : vector<16x64xf32>
    %280 = tpu.matmul %278, %279, %cst_103 {dimension_numbers = #tpu.dot_dimension_numbers<[1], [0], [0], [1], [0, 0, 1, 1], [], []>} : vector<16x32xf32>, vector<32x64xf32>, vector<16x64xf32> -> vector<16x64xf32>
    %c0_104 = arith.constant 0 : index
    %c0_105 = arith.constant 0 : index
    %281 = vector.load %arg15[%c0_104, %c0_105] : memref<2x64xf32, #tpu.memory_space<vmem>>, vector<1x64xf32>
    %282 = vector.broadcast %281 : vector<1x64xf32> to vector<16x64xf32>
    %283 = arith.addf %280, %282 : vector<16x64xf32>
    %cst_106 = arith.constant 0.000000e+00 : f32
    %284 = vector.broadcast %cst_106 : f32 to vector<16x64xf32>
    %285 = arith.maximumf %283, %284 : vector<16x64xf32>
    %c0_107 = arith.constant 0 : index
    %c0_108 = arith.constant 0 : index
    %286 = vector.load %arg16[%c0_107, %c0_108] : memref<128x32xf32, #tpu.memory_space<vmem>>, vector<64x32xf32>
    %cst_109 = arith.constant dense<0.000000e+00> : vector<16x32xf32>
    %287 = tpu.matmul %285, %286, %cst_109 {dimension_numbers = #tpu.dot_dimension_numbers<[1], [0], [0], [1], [0, 0, 1, 1], [], []>} : vector<16x64xf32>, vector<64x32xf32>, vector<16x32xf32> -> vector<16x32xf32>
    %c0_110 = arith.constant 0 : index
    %c0_111 = arith.constant 0 : index
    %288 = vector.load %arg17[%c0_110, %c0_111] : memref<2x32xf32, #tpu.memory_space<vmem>>, vector<1x32xf32>
    %289 = vector.broadcast %288 : vector<1x32xf32> to vector<16x32xf32>
    %290 = arith.addf %287, %289 : vector<16x32xf32>
    %291 = arith.addf %278, %290 : vector<16x32xf32>
    %c2 = arith.constant 2 : index
    %c0_112 = arith.constant 0 : index
    %292 = vector.load %arg18[%c2, %c0_112] : memref<6x32xf32, #tpu.memory_space<vmem>>, vector<1x32xf32>
    %c2_113 = arith.constant 2 : index
    %c0_114 = arith.constant 0 : index
    %293 = vector.load %arg19[%c2_113, %c0_114] : memref<6x32xf32, #tpu.memory_space<vmem>>, vector<1x32xf32>
    %cst_115 = arith.constant dense<0.000000e+00> : vector<16xf32>
    %294 = vector.multi_reduction <add>, %291, %cst_115 [1] : vector<16x32xf32> to vector<16xf32>
    %295 = vector.shape_cast %294 : vector<16xf32> to vector<16x1xf32>
    %cst_116 = arith.constant 3.200000e+01 : f32
    %296 = vector.broadcast %cst_116 : f32 to vector<16x1xf32>
    %297 = arith.divf %295, %296 : vector<16x1xf32>
    %298 = vector.broadcast %297 : vector<16x1xf32> to vector<16x32xf32>
    %299 = arith.subf %291, %298 : vector<16x32xf32>
    %300 = arith.mulf %299, %299 : vector<16x32xf32>
    %cst_117 = arith.constant dense<0.000000e+00> : vector<16xf32>
    %301 = vector.multi_reduction <add>, %300, %cst_117 [1] : vector<16x32xf32> to vector<16xf32>
    %302 = vector.shape_cast %301 : vector<16xf32> to vector<16x1xf32>
    %cst_118 = arith.constant 3.200000e+01 : f32
    %303 = vector.broadcast %cst_118 : f32 to vector<16x1xf32>
    %304 = arith.divf %302, %303 : vector<16x1xf32>
    %305 = vector.broadcast %297 : vector<16x1xf32> to vector<16x32xf32>
    %306 = arith.subf %291, %305 : vector<16x32xf32>
    %cst_119 = arith.constant 9.99999974E-6 : f32
    %307 = vector.broadcast %cst_119 : f32 to vector<16x1xf32>
    %308 = arith.addf %304, %307 : vector<16x1xf32>
    %309 = math.rsqrt %308 : vector<16x1xf32>
    %310 = vector.broadcast %309 : vector<16x1xf32> to vector<16x32xf32>
    %311 = arith.mulf %306, %310 : vector<16x32xf32>
    %312 = vector.broadcast %292 : vector<1x32xf32> to vector<16x32xf32>
    %313 = arith.mulf %311, %312 : vector<16x32xf32>
    %314 = vector.broadcast %293 : vector<1x32xf32> to vector<16x32xf32>
    %315 = arith.addf %313, %314 : vector<16x32xf32>
    %c32 = arith.constant 32 : index
    %c0_120 = arith.constant 0 : index
    %316 = vector.load %arg4[%c32, %c0_120] : memref<64x96xf32, #tpu.memory_space<vmem>>, vector<32x96xf32>
    %cst_121 = arith.constant dense<0.000000e+00> : vector<16x96xf32>
    %317 = tpu.matmul %315, %316, %cst_121 {dimension_numbers = #tpu.dot_dimension_numbers<[1], [0], [0], [1], [0, 0, 1, 1], [], []>} : vector<16x32xf32>, vector<32x96xf32>, vector<16x96xf32> -> vector<16x96xf32>
    %c1_122 = arith.constant 1 : index
    %c0_123 = arith.constant 0 : index
    %318 = vector.load %arg5[%c1_122, %c0_123] : memref<2x96xf32, #tpu.memory_space<vmem>>, vector<1x96xf32>
    %319 = vector.broadcast %318 : vector<1x96xf32> to vector<16x96xf32>
    %320 = arith.addf %317, %319 : vector<16x96xf32>
    %321 = vector.extract_strided_slice %320 {offsets = [0, 0], sizes = [16, 32], strides = [1, 1]} : vector<16x96xf32> to vector<16x32xf32>
    %322 = vector.extract_strided_slice %320 {offsets = [0, 32], sizes = [16, 32], strides = [1, 1]} : vector<16x96xf32> to vector<16x32xf32>
    %323 = vector.extract_strided_slice %320 {offsets = [0, 64], sizes = [16, 32], strides = [1, 1]} : vector<16x96xf32> to vector<16x32xf32>
    %cst_124 = arith.constant 0.000000e+00 : f32
    %324 = vector.broadcast %cst_124 : f32 to vector<16x32xf32>
    %c0_i32_125 = arith.constant 0 : i32
    %325 = vector.broadcast %c0_i32_125 : i32 to vector<1x32xi32>
    %326 = arith.cmpi sge, %4, %325 : vector<1x32xi32>
    %c8_i32_126 = arith.constant 8 : i32
    %327 = vector.broadcast %c8_i32_126 : i32 to vector<1x32xi32>
    %328 = arith.cmpi slt, %4, %327 : vector<1x32xi32>
    %329 = arith.andi %326, %328 : vector<1x32xi1>
    %cst_127 = arith.constant 0.000000e+00 : f32
    %330 = vector.shape_cast %329 : vector<1x32xi1> to vector<1x32xi1>
    %331 = vector.broadcast %330 : vector<1x32xi1> to vector<16x32xi1>
    %332 = vector.broadcast %cst_127 : f32 to vector<16x32xf32>
    %333 = arith.select %331, %321, %332 : vector<16x32xi1>, vector<16x32xf32>
    %cst_128 = arith.constant dense<0.000000e+00> : vector<16x16xf32>
    %334 = tpu.matmul %333, %322, %cst_128 {dimension_numbers = #tpu.dot_dimension_numbers<[1], [1], [0], [0], [0, 0, 1, 0], [], []>} : vector<16x32xf32>, vector<16x32xf32>, vector<16x16xf32> -> vector<16x16xf32>
    %335 = arith.addf %334, %2 : vector<16x16xf32>
    %cst_129 = arith.constant dense<0xFF800000> : vector<16xf32>
    %336 = vector.multi_reduction <maximumf>, %335, %cst_129 [1] : vector<16x16xf32> to vector<16xf32>
    %337 = vector.shape_cast %336 : vector<16xf32> to vector<16x1xf32>
    %338 = vector.broadcast %337 : vector<16x1xf32> to vector<16x16xf32>
    %339 = arith.subf %335, %338 : vector<16x16xf32>
    %340 = math.exp %339 : vector<16x16xf32>
    %cst_130 = arith.constant dense<0.000000e+00> : vector<16xf32>
    %341 = vector.multi_reduction <add>, %340, %cst_130 [1] : vector<16x16xf32> to vector<16xf32>
    %342 = vector.shape_cast %341 : vector<16xf32> to vector<16x1xf32>
    %343 = vector.broadcast %342 : vector<16x1xf32> to vector<16x16xf32>
    %344 = arith.divf %340, %343 : vector<16x16xf32>
    %cst_131 = arith.constant dense<0.000000e+00> : vector<16x32xf32>
    %345 = tpu.matmul %344, %323, %cst_131 {dimension_numbers = #tpu.dot_dimension_numbers<[1], [0], [0], [1], [0, 0, 1, 1], [], []>} : vector<16x16xf32>, vector<16x32xf32>, vector<16x32xf32> -> vector<16x32xf32>
    %346 = vector.shape_cast %329 : vector<1x32xi1> to vector<1x32xi1>
    %347 = vector.broadcast %346 : vector<1x32xi1> to vector<16x32xi1>
    %348 = arith.select %347, %345, %324 : vector<16x32xi1>, vector<16x32xf32>
    %c8_i32_132 = arith.constant 8 : i32
    %349 = vector.broadcast %c8_i32_132 : i32 to vector<1x32xi32>
    %350 = arith.cmpi sge, %4, %349 : vector<1x32xi32>
    %c16_i32_133 = arith.constant 16 : i32
    %351 = vector.broadcast %c16_i32_133 : i32 to vector<1x32xi32>
    %352 = arith.cmpi slt, %4, %351 : vector<1x32xi32>
    %353 = arith.andi %350, %352 : vector<1x32xi1>
    %cst_134 = arith.constant 0.000000e+00 : f32
    %354 = vector.shape_cast %353 : vector<1x32xi1> to vector<1x32xi1>
    %355 = vector.broadcast %354 : vector<1x32xi1> to vector<16x32xi1>
    %356 = vector.broadcast %cst_134 : f32 to vector<16x32xf32>
    %357 = arith.select %355, %321, %356 : vector<16x32xi1>, vector<16x32xf32>
    %cst_135 = arith.constant dense<0.000000e+00> : vector<16x16xf32>
    %358 = tpu.matmul %357, %322, %cst_135 {dimension_numbers = #tpu.dot_dimension_numbers<[1], [1], [0], [0], [0, 0, 1, 0], [], []>} : vector<16x32xf32>, vector<16x32xf32>, vector<16x16xf32> -> vector<16x16xf32>
    %359 = arith.addf %358, %2 : vector<16x16xf32>
    %cst_136 = arith.constant dense<0xFF800000> : vector<16xf32>
    %360 = vector.multi_reduction <maximumf>, %359, %cst_136 [1] : vector<16x16xf32> to vector<16xf32>
    %361 = vector.shape_cast %360 : vector<16xf32> to vector<16x1xf32>
    %362 = vector.broadcast %361 : vector<16x1xf32> to vector<16x16xf32>
    %363 = arith.subf %359, %362 : vector<16x16xf32>
    %364 = math.exp %363 : vector<16x16xf32>
    %cst_137 = arith.constant dense<0.000000e+00> : vector<16xf32>
    %365 = vector.multi_reduction <add>, %364, %cst_137 [1] : vector<16x16xf32> to vector<16xf32>
    %366 = vector.shape_cast %365 : vector<16xf32> to vector<16x1xf32>
    %367 = vector.broadcast %366 : vector<16x1xf32> to vector<16x16xf32>
    %368 = arith.divf %364, %367 : vector<16x16xf32>
    %cst_138 = arith.constant dense<0.000000e+00> : vector<16x32xf32>
    %369 = tpu.matmul %368, %323, %cst_138 {dimension_numbers = #tpu.dot_dimension_numbers<[1], [0], [0], [1], [0, 0, 1, 1], [], []>} : vector<16x16xf32>, vector<16x32xf32>, vector<16x32xf32> -> vector<16x32xf32>
    %370 = vector.shape_cast %353 : vector<1x32xi1> to vector<1x32xi1>
    %371 = vector.broadcast %370 : vector<1x32xi1> to vector<16x32xi1>
    %372 = arith.select %371, %369, %348 : vector<16x32xi1>, vector<16x32xf32>
    %c16_i32_139 = arith.constant 16 : i32
    %373 = vector.broadcast %c16_i32_139 : i32 to vector<1x32xi32>
    %374 = arith.cmpi sge, %4, %373 : vector<1x32xi32>
    %c24_i32_140 = arith.constant 24 : i32
    %375 = vector.broadcast %c24_i32_140 : i32 to vector<1x32xi32>
    %376 = arith.cmpi slt, %4, %375 : vector<1x32xi32>
    %377 = arith.andi %374, %376 : vector<1x32xi1>
    %cst_141 = arith.constant 0.000000e+00 : f32
    %378 = vector.shape_cast %377 : vector<1x32xi1> to vector<1x32xi1>
    %379 = vector.broadcast %378 : vector<1x32xi1> to vector<16x32xi1>
    %380 = vector.broadcast %cst_141 : f32 to vector<16x32xf32>
    %381 = arith.select %379, %321, %380 : vector<16x32xi1>, vector<16x32xf32>
    %cst_142 = arith.constant dense<0.000000e+00> : vector<16x16xf32>
    %382 = tpu.matmul %381, %322, %cst_142 {dimension_numbers = #tpu.dot_dimension_numbers<[1], [1], [0], [0], [0, 0, 1, 0], [], []>} : vector<16x32xf32>, vector<16x32xf32>, vector<16x16xf32> -> vector<16x16xf32>
    %383 = arith.addf %382, %2 : vector<16x16xf32>
    %cst_143 = arith.constant dense<0xFF800000> : vector<16xf32>
    %384 = vector.multi_reduction <maximumf>, %383, %cst_143 [1] : vector<16x16xf32> to vector<16xf32>
    %385 = vector.shape_cast %384 : vector<16xf32> to vector<16x1xf32>
    %386 = vector.broadcast %385 : vector<16x1xf32> to vector<16x16xf32>
    %387 = arith.subf %383, %386 : vector<16x16xf32>
    %388 = math.exp %387 : vector<16x16xf32>
    %cst_144 = arith.constant dense<0.000000e+00> : vector<16xf32>
    %389 = vector.multi_reduction <add>, %388, %cst_144 [1] : vector<16x16xf32> to vector<16xf32>
    %390 = vector.shape_cast %389 : vector<16xf32> to vector<16x1xf32>
    %391 = vector.broadcast %390 : vector<16x1xf32> to vector<16x16xf32>
    %392 = arith.divf %388, %391 : vector<16x16xf32>
    %cst_145 = arith.constant dense<0.000000e+00> : vector<16x32xf32>
    %393 = tpu.matmul %392, %323, %cst_145 {dimension_numbers = #tpu.dot_dimension_numbers<[1], [0], [0], [1], [0, 0, 1, 1], [], []>} : vector<16x16xf32>, vector<16x32xf32>, vector<16x32xf32> -> vector<16x32xf32>
    %394 = vector.shape_cast %377 : vector<1x32xi1> to vector<1x32xi1>
    %395 = vector.broadcast %394 : vector<1x32xi1> to vector<16x32xi1>
    %396 = arith.select %395, %393, %372 : vector<16x32xi1>, vector<16x32xf32>
    %c24_i32_146 = arith.constant 24 : i32
    %397 = vector.broadcast %c24_i32_146 : i32 to vector<1x32xi32>
    %398 = arith.cmpi sge, %4, %397 : vector<1x32xi32>
    %c32_i32_147 = arith.constant 32 : i32
    %399 = vector.broadcast %c32_i32_147 : i32 to vector<1x32xi32>
    %400 = arith.cmpi slt, %4, %399 : vector<1x32xi32>
    %401 = arith.andi %398, %400 : vector<1x32xi1>
    %cst_148 = arith.constant 0.000000e+00 : f32
    %402 = vector.shape_cast %401 : vector<1x32xi1> to vector<1x32xi1>
    %403 = vector.broadcast %402 : vector<1x32xi1> to vector<16x32xi1>
    %404 = vector.broadcast %cst_148 : f32 to vector<16x32xf32>
    %405 = arith.select %403, %321, %404 : vector<16x32xi1>, vector<16x32xf32>
    %cst_149 = arith.constant dense<0.000000e+00> : vector<16x16xf32>
    %406 = tpu.matmul %405, %322, %cst_149 {dimension_numbers = #tpu.dot_dimension_numbers<[1], [1], [0], [0], [0, 0, 1, 0], [], []>} : vector<16x32xf32>, vector<16x32xf32>, vector<16x16xf32> -> vector<16x16xf32>
    %407 = arith.addf %406, %2 : vector<16x16xf32>
    %cst_150 = arith.constant dense<0xFF800000> : vector<16xf32>
    %408 = vector.multi_reduction <maximumf>, %407, %cst_150 [1] : vector<16x16xf32> to vector<16xf32>
    %409 = vector.shape_cast %408 : vector<16xf32> to vector<16x1xf32>
    %410 = vector.broadcast %409 : vector<16x1xf32> to vector<16x16xf32>
    %411 = arith.subf %407, %410 : vector<16x16xf32>
    %412 = math.exp %411 : vector<16x16xf32>
    %cst_151 = arith.constant dense<0.000000e+00> : vector<16xf32>
    %413 = vector.multi_reduction <add>, %412, %cst_151 [1] : vector<16x16xf32> to vector<16xf32>
    %414 = vector.shape_cast %413 : vector<16xf32> to vector<16x1xf32>
    %415 = vector.broadcast %414 : vector<16x1xf32> to vector<16x16xf32>
    %416 = arith.divf %412, %415 : vector<16x16xf32>
    %cst_152 = arith.constant dense<0.000000e+00> : vector<16x32xf32>
    %417 = tpu.matmul %416, %323, %cst_152 {dimension_numbers = #tpu.dot_dimension_numbers<[1], [0], [0], [1], [0, 0, 1, 1], [], []>} : vector<16x16xf32>, vector<16x32xf32>, vector<16x32xf32> -> vector<16x32xf32>
    %418 = vector.shape_cast %401 : vector<1x32xi1> to vector<1x32xi1>
    %419 = vector.broadcast %418 : vector<1x32xi1> to vector<16x32xi1>
    %420 = arith.select %419, %417, %396 : vector<16x32xi1>, vector<16x32xf32>
    %c32_153 = arith.constant 32 : index
    %c0_154 = arith.constant 0 : index
    %421 = vector.load %arg6[%c32_153, %c0_154] : memref<64x32xf32, #tpu.memory_space<vmem>>, vector<32x32xf32>
    %cst_155 = arith.constant dense<0.000000e+00> : vector<16x32xf32>
    %422 = tpu.matmul %420, %421, %cst_155 {dimension_numbers = #tpu.dot_dimension_numbers<[1], [0], [0], [1], [0, 0, 1, 1], [], []>} : vector<16x32xf32>, vector<32x32xf32>, vector<16x32xf32> -> vector<16x32xf32>
    %c1_156 = arith.constant 1 : index
    %c0_157 = arith.constant 0 : index
    %423 = vector.load %arg7[%c1_156, %c0_157] : memref<2x32xf32, #tpu.memory_space<vmem>>, vector<1x32xf32>
    %424 = vector.broadcast %423 : vector<1x32xf32> to vector<16x32xf32>
    %425 = arith.addf %422, %424 : vector<16x32xf32>
    %426 = arith.addf %315, %425 : vector<16x32xf32>
    %c3 = arith.constant 3 : index
    %c0_158 = arith.constant 0 : index
    %427 = vector.load %arg18[%c3, %c0_158] : memref<6x32xf32, #tpu.memory_space<vmem>>, vector<1x32xf32>
    %c3_159 = arith.constant 3 : index
    %c0_160 = arith.constant 0 : index
    %428 = vector.load %arg19[%c3_159, %c0_160] : memref<6x32xf32, #tpu.memory_space<vmem>>, vector<1x32xf32>
    %cst_161 = arith.constant dense<0.000000e+00> : vector<16xf32>
    %429 = vector.multi_reduction <add>, %426, %cst_161 [1] : vector<16x32xf32> to vector<16xf32>
    %430 = vector.shape_cast %429 : vector<16xf32> to vector<16x1xf32>
    %cst_162 = arith.constant 3.200000e+01 : f32
    %431 = vector.broadcast %cst_162 : f32 to vector<16x1xf32>
    %432 = arith.divf %430, %431 : vector<16x1xf32>
    %433 = vector.broadcast %432 : vector<16x1xf32> to vector<16x32xf32>
    %434 = arith.subf %426, %433 : vector<16x32xf32>
    %435 = arith.mulf %434, %434 : vector<16x32xf32>
    %cst_163 = arith.constant dense<0.000000e+00> : vector<16xf32>
    %436 = vector.multi_reduction <add>, %435, %cst_163 [1] : vector<16x32xf32> to vector<16xf32>
    %437 = vector.shape_cast %436 : vector<16xf32> to vector<16x1xf32>
    %cst_164 = arith.constant 3.200000e+01 : f32
    %438 = vector.broadcast %cst_164 : f32 to vector<16x1xf32>
    %439 = arith.divf %437, %438 : vector<16x1xf32>
    %440 = vector.broadcast %432 : vector<16x1xf32> to vector<16x32xf32>
    %441 = arith.subf %426, %440 : vector<16x32xf32>
    %cst_165 = arith.constant 9.99999974E-6 : f32
    %442 = vector.broadcast %cst_165 : f32 to vector<16x1xf32>
    %443 = arith.addf %439, %442 : vector<16x1xf32>
    %444 = math.rsqrt %443 : vector<16x1xf32>
    %445 = vector.broadcast %444 : vector<16x1xf32> to vector<16x32xf32>
    %446 = arith.mulf %441, %445 : vector<16x32xf32>
    %447 = vector.broadcast %427 : vector<1x32xf32> to vector<16x32xf32>
    %448 = arith.mulf %446, %447 : vector<16x32xf32>
    %449 = vector.broadcast %428 : vector<1x32xf32> to vector<16x32xf32>
    %450 = arith.addf %448, %449 : vector<16x32xf32>
    %c32_166 = arith.constant 32 : index
    %c0_167 = arith.constant 0 : index
    %451 = vector.load %arg8[%c32_166, %c0_167] : memref<64x32xf32, #tpu.memory_space<vmem>>, vector<32x32xf32>
    %cst_168 = arith.constant dense<0.000000e+00> : vector<16x32xf32>
    %452 = tpu.matmul %450, %451, %cst_168 {dimension_numbers = #tpu.dot_dimension_numbers<[1], [0], [0], [1], [0, 0, 1, 1], [], []>} : vector<16x32xf32>, vector<32x32xf32>, vector<16x32xf32> -> vector<16x32xf32>
    %c1_169 = arith.constant 1 : index
    %c0_170 = arith.constant 0 : index
    %453 = vector.load %arg9[%c1_169, %c0_170] : memref<2x32xf32, #tpu.memory_space<vmem>>, vector<1x32xf32>
    %454 = vector.broadcast %453 : vector<1x32xf32> to vector<16x32xf32>
    %455 = arith.addf %452, %454 : vector<16x32xf32>
    %c32_171 = arith.constant 32 : index
    %c0_172 = arith.constant 0 : index
    %456 = vector.load %arg10[%c32_171, %c0_172] : memref<64x64xf32, #tpu.memory_space<vmem>>, vector<32x64xf32>
    %cst_173 = arith.constant dense<0.000000e+00> : vector<16x64xf32>
    %457 = tpu.matmul %1, %456, %cst_173 {dimension_numbers = #tpu.dot_dimension_numbers<[1], [0], [0], [1], [0, 0, 1, 1], [], []>} : vector<16x32xf32>, vector<32x64xf32>, vector<16x64xf32> -> vector<16x64xf32>
    %c1_174 = arith.constant 1 : index
    %c0_175 = arith.constant 0 : index
    %458 = vector.load %arg11[%c1_174, %c0_175] : memref<2x64xf32, #tpu.memory_space<vmem>>, vector<1x64xf32>
    %459 = vector.broadcast %458 : vector<1x64xf32> to vector<16x64xf32>
    %460 = arith.addf %457, %459 : vector<16x64xf32>
    %461 = vector.extract_strided_slice %460 {offsets = [0, 0], sizes = [16, 32], strides = [1, 1]} : vector<16x64xf32> to vector<16x32xf32>
    %462 = vector.extract_strided_slice %460 {offsets = [0, 32], sizes = [16, 32], strides = [1, 1]} : vector<16x64xf32> to vector<16x32xf32>
    %cst_176 = arith.constant 0.000000e+00 : f32
    %463 = vector.broadcast %cst_176 : f32 to vector<16x32xf32>
    %c0_i32_177 = arith.constant 0 : i32
    %464 = vector.broadcast %c0_i32_177 : i32 to vector<1x32xi32>
    %465 = arith.cmpi sge, %4, %464 : vector<1x32xi32>
    %c8_i32_178 = arith.constant 8 : i32
    %466 = vector.broadcast %c8_i32_178 : i32 to vector<1x32xi32>
    %467 = arith.cmpi slt, %4, %466 : vector<1x32xi32>
    %468 = arith.andi %465, %467 : vector<1x32xi1>
    %cst_179 = arith.constant 0.000000e+00 : f32
    %469 = vector.shape_cast %468 : vector<1x32xi1> to vector<1x32xi1>
    %470 = vector.broadcast %469 : vector<1x32xi1> to vector<16x32xi1>
    %471 = vector.broadcast %cst_179 : f32 to vector<16x32xf32>
    %472 = arith.select %470, %455, %471 : vector<16x32xi1>, vector<16x32xf32>
    %cst_180 = arith.constant dense<0.000000e+00> : vector<16x16xf32>
    %473 = tpu.matmul %472, %461, %cst_180 {dimension_numbers = #tpu.dot_dimension_numbers<[1], [1], [0], [0], [0, 0, 1, 0], [], []>} : vector<16x32xf32>, vector<16x32xf32>, vector<16x16xf32> -> vector<16x16xf32>
    %474 = arith.addf %473, %3 : vector<16x16xf32>
    %cst_181 = arith.constant dense<0xFF800000> : vector<16xf32>
    %475 = vector.multi_reduction <maximumf>, %474, %cst_181 [1] : vector<16x16xf32> to vector<16xf32>
    %476 = vector.shape_cast %475 : vector<16xf32> to vector<16x1xf32>
    %477 = vector.broadcast %476 : vector<16x1xf32> to vector<16x16xf32>
    %478 = arith.subf %474, %477 : vector<16x16xf32>
    %479 = math.exp %478 : vector<16x16xf32>
    %cst_182 = arith.constant dense<0.000000e+00> : vector<16xf32>
    %480 = vector.multi_reduction <add>, %479, %cst_182 [1] : vector<16x16xf32> to vector<16xf32>
    %481 = vector.shape_cast %480 : vector<16xf32> to vector<16x1xf32>
    %482 = vector.broadcast %481 : vector<16x1xf32> to vector<16x16xf32>
    %483 = arith.divf %479, %482 : vector<16x16xf32>
    %cst_183 = arith.constant dense<0.000000e+00> : vector<16x32xf32>
    %484 = tpu.matmul %483, %462, %cst_183 {dimension_numbers = #tpu.dot_dimension_numbers<[1], [0], [0], [1], [0, 0, 1, 1], [], []>} : vector<16x16xf32>, vector<16x32xf32>, vector<16x32xf32> -> vector<16x32xf32>
    %485 = vector.shape_cast %468 : vector<1x32xi1> to vector<1x32xi1>
    %486 = vector.broadcast %485 : vector<1x32xi1> to vector<16x32xi1>
    %487 = arith.select %486, %484, %463 : vector<16x32xi1>, vector<16x32xf32>
    %c8_i32_184 = arith.constant 8 : i32
    %488 = vector.broadcast %c8_i32_184 : i32 to vector<1x32xi32>
    %489 = arith.cmpi sge, %4, %488 : vector<1x32xi32>
    %c16_i32_185 = arith.constant 16 : i32
    %490 = vector.broadcast %c16_i32_185 : i32 to vector<1x32xi32>
    %491 = arith.cmpi slt, %4, %490 : vector<1x32xi32>
    %492 = arith.andi %489, %491 : vector<1x32xi1>
    %cst_186 = arith.constant 0.000000e+00 : f32
    %493 = vector.shape_cast %492 : vector<1x32xi1> to vector<1x32xi1>
    %494 = vector.broadcast %493 : vector<1x32xi1> to vector<16x32xi1>
    %495 = vector.broadcast %cst_186 : f32 to vector<16x32xf32>
    %496 = arith.select %494, %455, %495 : vector<16x32xi1>, vector<16x32xf32>
    %cst_187 = arith.constant dense<0.000000e+00> : vector<16x16xf32>
    %497 = tpu.matmul %496, %461, %cst_187 {dimension_numbers = #tpu.dot_dimension_numbers<[1], [1], [0], [0], [0, 0, 1, 0], [], []>} : vector<16x32xf32>, vector<16x32xf32>, vector<16x16xf32> -> vector<16x16xf32>
    %498 = arith.addf %497, %3 : vector<16x16xf32>
    %cst_188 = arith.constant dense<0xFF800000> : vector<16xf32>
    %499 = vector.multi_reduction <maximumf>, %498, %cst_188 [1] : vector<16x16xf32> to vector<16xf32>
    %500 = vector.shape_cast %499 : vector<16xf32> to vector<16x1xf32>
    %501 = vector.broadcast %500 : vector<16x1xf32> to vector<16x16xf32>
    %502 = arith.subf %498, %501 : vector<16x16xf32>
    %503 = math.exp %502 : vector<16x16xf32>
    %cst_189 = arith.constant dense<0.000000e+00> : vector<16xf32>
    %504 = vector.multi_reduction <add>, %503, %cst_189 [1] : vector<16x16xf32> to vector<16xf32>
    %505 = vector.shape_cast %504 : vector<16xf32> to vector<16x1xf32>
    %506 = vector.broadcast %505 : vector<16x1xf32> to vector<16x16xf32>
    %507 = arith.divf %503, %506 : vector<16x16xf32>
    %cst_190 = arith.constant dense<0.000000e+00> : vector<16x32xf32>
    %508 = tpu.matmul %507, %462, %cst_190 {dimension_numbers = #tpu.dot_dimension_numbers<[1], [0], [0], [1], [0, 0, 1, 1], [], []>} : vector<16x16xf32>, vector<16x32xf32>, vector<16x32xf32> -> vector<16x32xf32>
    %509 = vector.shape_cast %492 : vector<1x32xi1> to vector<1x32xi1>
    %510 = vector.broadcast %509 : vector<1x32xi1> to vector<16x32xi1>
    %511 = arith.select %510, %508, %487 : vector<16x32xi1>, vector<16x32xf32>
    %c16_i32_191 = arith.constant 16 : i32
    %512 = vector.broadcast %c16_i32_191 : i32 to vector<1x32xi32>
    %513 = arith.cmpi sge, %4, %512 : vector<1x32xi32>
    %c24_i32_192 = arith.constant 24 : i32
    %514 = vector.broadcast %c24_i32_192 : i32 to vector<1x32xi32>
    %515 = arith.cmpi slt, %4, %514 : vector<1x32xi32>
    %516 = arith.andi %513, %515 : vector<1x32xi1>
    %cst_193 = arith.constant 0.000000e+00 : f32
    %517 = vector.shape_cast %516 : vector<1x32xi1> to vector<1x32xi1>
    %518 = vector.broadcast %517 : vector<1x32xi1> to vector<16x32xi1>
    %519 = vector.broadcast %cst_193 : f32 to vector<16x32xf32>
    %520 = arith.select %518, %455, %519 : vector<16x32xi1>, vector<16x32xf32>
    %cst_194 = arith.constant dense<0.000000e+00> : vector<16x16xf32>
    %521 = tpu.matmul %520, %461, %cst_194 {dimension_numbers = #tpu.dot_dimension_numbers<[1], [1], [0], [0], [0, 0, 1, 0], [], []>} : vector<16x32xf32>, vector<16x32xf32>, vector<16x16xf32> -> vector<16x16xf32>
    %522 = arith.addf %521, %3 : vector<16x16xf32>
    %cst_195 = arith.constant dense<0xFF800000> : vector<16xf32>
    %523 = vector.multi_reduction <maximumf>, %522, %cst_195 [1] : vector<16x16xf32> to vector<16xf32>
    %524 = vector.shape_cast %523 : vector<16xf32> to vector<16x1xf32>
    %525 = vector.broadcast %524 : vector<16x1xf32> to vector<16x16xf32>
    %526 = arith.subf %522, %525 : vector<16x16xf32>
    %527 = math.exp %526 : vector<16x16xf32>
    %cst_196 = arith.constant dense<0.000000e+00> : vector<16xf32>
    %528 = vector.multi_reduction <add>, %527, %cst_196 [1] : vector<16x16xf32> to vector<16xf32>
    %529 = vector.shape_cast %528 : vector<16xf32> to vector<16x1xf32>
    %530 = vector.broadcast %529 : vector<16x1xf32> to vector<16x16xf32>
    %531 = arith.divf %527, %530 : vector<16x16xf32>
    %cst_197 = arith.constant dense<0.000000e+00> : vector<16x32xf32>
    %532 = tpu.matmul %531, %462, %cst_197 {dimension_numbers = #tpu.dot_dimension_numbers<[1], [0], [0], [1], [0, 0, 1, 1], [], []>} : vector<16x16xf32>, vector<16x32xf32>, vector<16x32xf32> -> vector<16x32xf32>
    %533 = vector.shape_cast %516 : vector<1x32xi1> to vector<1x32xi1>
    %534 = vector.broadcast %533 : vector<1x32xi1> to vector<16x32xi1>
    %535 = arith.select %534, %532, %511 : vector<16x32xi1>, vector<16x32xf32>
    %c24_i32_198 = arith.constant 24 : i32
    %536 = vector.broadcast %c24_i32_198 : i32 to vector<1x32xi32>
    %537 = arith.cmpi sge, %4, %536 : vector<1x32xi32>
    %c32_i32_199 = arith.constant 32 : i32
    %538 = vector.broadcast %c32_i32_199 : i32 to vector<1x32xi32>
    %539 = arith.cmpi slt, %4, %538 : vector<1x32xi32>
    %540 = arith.andi %537, %539 : vector<1x32xi1>
    %cst_200 = arith.constant 0.000000e+00 : f32
    %541 = vector.shape_cast %540 : vector<1x32xi1> to vector<1x32xi1>
    %542 = vector.broadcast %541 : vector<1x32xi1> to vector<16x32xi1>
    %543 = vector.broadcast %cst_200 : f32 to vector<16x32xf32>
    %544 = arith.select %542, %455, %543 : vector<16x32xi1>, vector<16x32xf32>
    %cst_201 = arith.constant dense<0.000000e+00> : vector<16x16xf32>
    %545 = tpu.matmul %544, %461, %cst_201 {dimension_numbers = #tpu.dot_dimension_numbers<[1], [1], [0], [0], [0, 0, 1, 0], [], []>} : vector<16x32xf32>, vector<16x32xf32>, vector<16x16xf32> -> vector<16x16xf32>
    %546 = arith.addf %545, %3 : vector<16x16xf32>
    %cst_202 = arith.constant dense<0xFF800000> : vector<16xf32>
    %547 = vector.multi_reduction <maximumf>, %546, %cst_202 [1] : vector<16x16xf32> to vector<16xf32>
    %548 = vector.shape_cast %547 : vector<16xf32> to vector<16x1xf32>
    %549 = vector.broadcast %548 : vector<16x1xf32> to vector<16x16xf32>
    %550 = arith.subf %546, %549 : vector<16x16xf32>
    %551 = math.exp %550 : vector<16x16xf32>
    %cst_203 = arith.constant dense<0.000000e+00> : vector<16xf32>
    %552 = vector.multi_reduction <add>, %551, %cst_203 [1] : vector<16x16xf32> to vector<16xf32>
    %553 = vector.shape_cast %552 : vector<16xf32> to vector<16x1xf32>
    %554 = vector.broadcast %553 : vector<16x1xf32> to vector<16x16xf32>
    %555 = arith.divf %551, %554 : vector<16x16xf32>
    %cst_204 = arith.constant dense<0.000000e+00> : vector<16x32xf32>
    %556 = tpu.matmul %555, %462, %cst_204 {dimension_numbers = #tpu.dot_dimension_numbers<[1], [0], [0], [1], [0, 0, 1, 1], [], []>} : vector<16x16xf32>, vector<16x32xf32>, vector<16x32xf32> -> vector<16x32xf32>
    %557 = vector.shape_cast %540 : vector<1x32xi1> to vector<1x32xi1>
    %558 = vector.broadcast %557 : vector<1x32xi1> to vector<16x32xi1>
    %559 = arith.select %558, %556, %535 : vector<16x32xi1>, vector<16x32xf32>
    %c32_205 = arith.constant 32 : index
    %c0_206 = arith.constant 0 : index
    %560 = vector.load %arg12[%c32_205, %c0_206] : memref<64x32xf32, #tpu.memory_space<vmem>>, vector<32x32xf32>
    %cst_207 = arith.constant dense<0.000000e+00> : vector<16x32xf32>
    %561 = tpu.matmul %559, %560, %cst_207 {dimension_numbers = #tpu.dot_dimension_numbers<[1], [0], [0], [1], [0, 0, 1, 1], [], []>} : vector<16x32xf32>, vector<32x32xf32>, vector<16x32xf32> -> vector<16x32xf32>
    %c1_208 = arith.constant 1 : index
    %c0_209 = arith.constant 0 : index
    %562 = vector.load %arg13[%c1_208, %c0_209] : memref<2x32xf32, #tpu.memory_space<vmem>>, vector<1x32xf32>
    %563 = vector.broadcast %562 : vector<1x32xf32> to vector<16x32xf32>
    %564 = arith.addf %561, %563 : vector<16x32xf32>
    %565 = arith.addf %450, %564 : vector<16x32xf32>
    %c4 = arith.constant 4 : index
    %c0_210 = arith.constant 0 : index
    %566 = vector.load %arg18[%c4, %c0_210] : memref<6x32xf32, #tpu.memory_space<vmem>>, vector<1x32xf32>
    %c4_211 = arith.constant 4 : index
    %c0_212 = arith.constant 0 : index
    %567 = vector.load %arg19[%c4_211, %c0_212] : memref<6x32xf32, #tpu.memory_space<vmem>>, vector<1x32xf32>
    %cst_213 = arith.constant dense<0.000000e+00> : vector<16xf32>
    %568 = vector.multi_reduction <add>, %565, %cst_213 [1] : vector<16x32xf32> to vector<16xf32>
    %569 = vector.shape_cast %568 : vector<16xf32> to vector<16x1xf32>
    %cst_214 = arith.constant 3.200000e+01 : f32
    %570 = vector.broadcast %cst_214 : f32 to vector<16x1xf32>
    %571 = arith.divf %569, %570 : vector<16x1xf32>
    %572 = vector.broadcast %571 : vector<16x1xf32> to vector<16x32xf32>
    %573 = arith.subf %565, %572 : vector<16x32xf32>
    %574 = arith.mulf %573, %573 : vector<16x32xf32>
    %cst_215 = arith.constant dense<0.000000e+00> : vector<16xf32>
    %575 = vector.multi_reduction <add>, %574, %cst_215 [1] : vector<16x32xf32> to vector<16xf32>
    %576 = vector.shape_cast %575 : vector<16xf32> to vector<16x1xf32>
    %cst_216 = arith.constant 3.200000e+01 : f32
    %577 = vector.broadcast %cst_216 : f32 to vector<16x1xf32>
    %578 = arith.divf %576, %577 : vector<16x1xf32>
    %579 = vector.broadcast %571 : vector<16x1xf32> to vector<16x32xf32>
    %580 = arith.subf %565, %579 : vector<16x32xf32>
    %cst_217 = arith.constant 9.99999974E-6 : f32
    %581 = vector.broadcast %cst_217 : f32 to vector<16x1xf32>
    %582 = arith.addf %578, %581 : vector<16x1xf32>
    %583 = math.rsqrt %582 : vector<16x1xf32>
    %584 = vector.broadcast %583 : vector<16x1xf32> to vector<16x32xf32>
    %585 = arith.mulf %580, %584 : vector<16x32xf32>
    %586 = vector.broadcast %566 : vector<1x32xf32> to vector<16x32xf32>
    %587 = arith.mulf %585, %586 : vector<16x32xf32>
    %588 = vector.broadcast %567 : vector<1x32xf32> to vector<16x32xf32>
    %589 = arith.addf %587, %588 : vector<16x32xf32>
    %c32_218 = arith.constant 32 : index
    %c0_219 = arith.constant 0 : index
    %590 = vector.load %arg14[%c32_218, %c0_219] : memref<64x64xf32, #tpu.memory_space<vmem>>, vector<32x64xf32>
    %cst_220 = arith.constant dense<0.000000e+00> : vector<16x64xf32>
    %591 = tpu.matmul %589, %590, %cst_220 {dimension_numbers = #tpu.dot_dimension_numbers<[1], [0], [0], [1], [0, 0, 1, 1], [], []>} : vector<16x32xf32>, vector<32x64xf32>, vector<16x64xf32> -> vector<16x64xf32>
    %c1_221 = arith.constant 1 : index
    %c0_222 = arith.constant 0 : index
    %592 = vector.load %arg15[%c1_221, %c0_222] : memref<2x64xf32, #tpu.memory_space<vmem>>, vector<1x64xf32>
    %593 = vector.broadcast %592 : vector<1x64xf32> to vector<16x64xf32>
    %594 = arith.addf %591, %593 : vector<16x64xf32>
    %cst_223 = arith.constant 0.000000e+00 : f32
    %595 = vector.broadcast %cst_223 : f32 to vector<16x64xf32>
    %596 = arith.maximumf %594, %595 : vector<16x64xf32>
    %c64 = arith.constant 64 : index
    %c0_224 = arith.constant 0 : index
    %597 = vector.load %arg16[%c64, %c0_224] : memref<128x32xf32, #tpu.memory_space<vmem>>, vector<64x32xf32>
    %cst_225 = arith.constant dense<0.000000e+00> : vector<16x32xf32>
    %598 = tpu.matmul %596, %597, %cst_225 {dimension_numbers = #tpu.dot_dimension_numbers<[1], [0], [0], [1], [0, 0, 1, 1], [], []>} : vector<16x64xf32>, vector<64x32xf32>, vector<16x32xf32> -> vector<16x32xf32>
    %c1_226 = arith.constant 1 : index
    %c0_227 = arith.constant 0 : index
    %599 = vector.load %arg17[%c1_226, %c0_227] : memref<2x32xf32, #tpu.memory_space<vmem>>, vector<1x32xf32>
    %600 = vector.broadcast %599 : vector<1x32xf32> to vector<16x32xf32>
    %601 = arith.addf %598, %600 : vector<16x32xf32>
    %602 = arith.addf %589, %601 : vector<16x32xf32>
    %c5 = arith.constant 5 : index
    %c0_228 = arith.constant 0 : index
    %603 = vector.load %arg18[%c5, %c0_228] : memref<6x32xf32, #tpu.memory_space<vmem>>, vector<1x32xf32>
    %c5_229 = arith.constant 5 : index
    %c0_230 = arith.constant 0 : index
    %604 = vector.load %arg19[%c5_229, %c0_230] : memref<6x32xf32, #tpu.memory_space<vmem>>, vector<1x32xf32>
    %cst_231 = arith.constant dense<0.000000e+00> : vector<16xf32>
    %605 = vector.multi_reduction <add>, %602, %cst_231 [1] : vector<16x32xf32> to vector<16xf32>
    %606 = vector.shape_cast %605 : vector<16xf32> to vector<16x1xf32>
    %cst_232 = arith.constant 3.200000e+01 : f32
    %607 = vector.broadcast %cst_232 : f32 to vector<16x1xf32>
    %608 = arith.divf %606, %607 : vector<16x1xf32>
    %609 = vector.broadcast %608 : vector<16x1xf32> to vector<16x32xf32>
    %610 = arith.subf %602, %609 : vector<16x32xf32>
    %611 = arith.mulf %610, %610 : vector<16x32xf32>
    %cst_233 = arith.constant dense<0.000000e+00> : vector<16xf32>
    %612 = vector.multi_reduction <add>, %611, %cst_233 [1] : vector<16x32xf32> to vector<16xf32>
    %613 = vector.shape_cast %612 : vector<16xf32> to vector<16x1xf32>
    %cst_234 = arith.constant 3.200000e+01 : f32
    %614 = vector.broadcast %cst_234 : f32 to vector<16x1xf32>
    %615 = arith.divf %613, %614 : vector<16x1xf32>
    %616 = vector.broadcast %608 : vector<16x1xf32> to vector<16x32xf32>
    %617 = arith.subf %602, %616 : vector<16x32xf32>
    %cst_235 = arith.constant 9.99999974E-6 : f32
    %618 = vector.broadcast %cst_235 : f32 to vector<16x1xf32>
    %619 = arith.addf %615, %618 : vector<16x1xf32>
    %620 = math.rsqrt %619 : vector<16x1xf32>
    %621 = vector.broadcast %620 : vector<16x1xf32> to vector<16x32xf32>
    %622 = arith.mulf %617, %621 : vector<16x32xf32>
    %623 = vector.broadcast %603 : vector<1x32xf32> to vector<16x32xf32>
    %624 = arith.mulf %622, %623 : vector<16x32xf32>
    %625 = vector.broadcast %604 : vector<1x32xf32> to vector<16x32xf32>
    %626 = arith.addf %624, %625 : vector<16x32xf32>
    %cst_236 = arith.constant dense<0.000000e+00> : vector<16xf32>
    %627 = vector.multi_reduction <add>, %626, %cst_236 [1] : vector<16x32xf32> to vector<16xf32>
    %628 = vector.shape_cast %627 : vector<16xf32> to vector<16x1xf32>
    %cst_237 = arith.constant 3.200000e+01 : f32
    %629 = vector.broadcast %cst_237 : f32 to vector<16x1xf32>
    %630 = arith.divf %628, %629 : vector<16x1xf32>
    %631 = vector.broadcast %630 : vector<16x1xf32> to vector<16x32xf32>
    %632 = arith.subf %626, %631 : vector<16x32xf32>
    %633 = arith.mulf %632, %632 : vector<16x32xf32>
    %cst_238 = arith.constant dense<0.000000e+00> : vector<16xf32>
    %634 = vector.multi_reduction <add>, %633, %cst_238 [1] : vector<16x32xf32> to vector<16xf32>
    %635 = vector.shape_cast %634 : vector<16xf32> to vector<16x1xf32>
    %cst_239 = arith.constant 3.200000e+01 : f32
    %636 = vector.broadcast %cst_239 : f32 to vector<16x1xf32>
    %637 = arith.divf %635, %636 : vector<16x1xf32>
    %638 = vector.broadcast %630 : vector<16x1xf32> to vector<16x32xf32>
    %639 = arith.subf %626, %638 : vector<16x32xf32>
    %cst_240 = arith.constant 9.99999974E-6 : f32
    %640 = vector.broadcast %cst_240 : f32 to vector<16x1xf32>
    %641 = arith.addf %637, %640 : vector<16x1xf32>
    %642 = math.rsqrt %641 : vector<16x1xf32>
    %643 = vector.broadcast %642 : vector<16x1xf32> to vector<16x32xf32>
    %644 = arith.mulf %639, %643 : vector<16x32xf32>
    %c0_241 = arith.constant 0 : index
    %c0_242 = arith.constant 0 : index
    %645 = vector.load %arg20[%c0_241, %c0_242] : memref<1x32xf32, #tpu.memory_space<vmem>>, vector<1x32xf32>
    %646 = vector.broadcast %645 : vector<1x32xf32> to vector<16x32xf32>
    %647 = arith.mulf %644, %646 : vector<16x32xf32>
    %c0_243 = arith.constant 0 : index
    %c0_244 = arith.constant 0 : index
    %648 = vector.load %arg21[%c0_243, %c0_244] : memref<1x32xf32, #tpu.memory_space<vmem>>, vector<1x32xf32>
    %649 = vector.broadcast %648 : vector<1x32xf32> to vector<16x32xf32>
    %650 = arith.addf %647, %649 : vector<16x32xf32>
    %c0_245 = arith.constant 0 : index
    %c0_246 = arith.constant 0 : index
    %651 = vector.load %arg22[%c0_245, %c0_246] : memref<16x32xf32, #tpu.memory_space<vmem>>, vector<16x32xf32>
    tpu.vector_store %arg22[%c0_245, %c0_246], %650 {strides = array<i32>} : memref<16x32xf32, #tpu.memory_space<vmem>>, vector<16x32xf32>,
    return
  }
}

</mosaic_0001>

<bundles_post_ra>
// kernel: decoder_forward.1
= control target key start
LH: loop header
LB: loop body
LE: loop exit
PB: predicated region body
PF: predicated region fallthrough
CT: control target
= control target key end

     0   :  { %s4728_s0 = inlined_call_operand.hbm [shape: f32[16,32], index: 0, kind: input, shape index: {}]   ;;  %s4729_s1 = inlined_call_operand.hbm [shape: f32[16,32], index: 1, kind: input, shape index: {}]   ;;  %s4730_s2 = inlined_call_operand.vmem [shape: f32[16,16], index: 2, kind: input, shape index: {}]   ;;  %s4731_s3 = inlined_call_operand.vmem [shape: f32[16,16], index: 3, kind: input, shape index: {}]   ;;  %s4732_s4 = inlined_call_operand.vmem [shape: f32[64,96], index: 4, kind: input, shape index: {}]   ;;  %s4733_s5 = inlined_call_operand.vmem [shape: f32[2,96], index: 5, kind: input, shape index: {}]   ;;  %s4734_s6 = inlined_call_operand.vmem [shape: f32[64,32], index: 6, kind: input, shape index: {}]   ;;  %s4735_s7 = inlined_call_operand.vmem [shape: f32[2,32], index: 7, kind: input, shape index: {}]   ;;  %s4736_s8 = inlined_call_operand.vmem [shape: f32[64,32], index: 8, kind: input, shape index: {}]   ;;  %s4737_s9 = inlined_call_operand.vmem [shape: f32[2,32], index: 9, kind: input, shape index: {}]   ;;  %s4738_s10 = inlined_call_operand.vmem [shape: f32[64,64], index: 10, kind: input, shape index: {}]   ;;  %s4739_s11 = inlined_call_operand.vmem [shape: f32[2,64], index: 11, kind: input, shape index: {}]   ;;  %s4740_s12 = inlined_call_operand.vmem [shape: f32[64,32], index: 12, kind: input, shape index: {}]   ;;  %s4741_s13 = inlined_call_operand.vmem [shape: f32[2,32], index: 13, kind: input, shape index: {}]   ;;  %s4742_s14 = inlined_call_operand.vmem [shape: f32[64,64], index: 14, kind: input, shape index: {}]   ;;  %s4743_s15 = inlined_call_operand.vmem [shape: f32[2,64], index: 15, kind: input, shape index: {}]   ;;  %s4744_s16 = inlined_call_operand.vmem [shape: f32[128,32], index: 16, kind: input, shape index: {}]   ;;  %s4745_s17 = inlined_call_operand.vmem [shape: f32[2,32], index: 17, kind: input, shape index: {}]   ;;  %s4746_s18 = inlined_call_operand.vmem [shape: f32[6,32], index: 18, kind: input, shape index: {}]   ;;  %s4747_s19 = inlined_call_operand.vmem [shape: f32[6,32], index: 19, kind: input, shape index: {}]   ;;  %s4748_s20 = inlined_call_operand.vmem [shape: f32[1,32], index: 20, kind: input, shape index: {}]   ;;  %s4749_s21 = inlined_call_operand.vmem [shape: f32[1,32], index: 21, kind: input, shape index: {}]   ;;  %s4750_s22 = inlined_call_operand.hbm [shape: f32[16,32], index: 22, kind: output, shape index: {}]  }
   0x1   :  { %4758 = sst [smem:[#allocation11_spill]] %s4728_s0 }
   0x2   :  { %4759 = sst [smem:[#allocation12_spill]] %s4729_s1 }
   0x3   :  { %4760 = sst [smem:[#allocation13_spill]] %s4730_s2 }
   0x4   :  { %4761 = sst [smem:[#allocation14_spill]] %s4731_s3 }
   0x5   :  { %4762 = sst [smem:[#allocation15_spill]] %s4732_s4 }
   0x6   :  { %4763 = sst [smem:[#allocation16_spill]] %s4733_s5 }
   0x7   :  { %4764 = sst [smem:[#allocation17_spill]] %s4734_s6 }
   0x8   :  { %27 = vsyncpa [#allocation3], 0 }
   0x9   :  { %28 = vsyncpa [#allocation6], 0 }
   0xa   :  { %29 = vsyncpa [#allocation4], 0  ;;  %s4765_s29 = sld [smem:[#allocation11_spill]]  ;;  %s3286_s4 = smov [#allocation2]  }
   0xb   :  { %s36_s0 = sshll.u32 %s3286_s4, 4  ;;  %s4766_s5 = sld [smem:[#allocation12_spill]]  ;;  %s37_s0 = int_to_ptr.vmem [resolvable:$true] %s36_s0 }
   0xc   :  { %s4756_s6 = smov 128   ;;  %s4757_s25 = smov 8  }
   0xd   :  { %s3289_s26 = smov [#allocation5]  }
   0xe   :  { %s49_s2 = sshll.u32 %s3289_s26, 4  ;;  %s50_s2 = int_to_ptr.vmem [resolvable:$true] %s49_s2 }
  0x10   :  { %s34_s30 = sshll.u32 %s4765_s29, 4  ;;  %s35_s30 = int_to_ptr.hbm [resolvable:$true] %s34_s30 }
  0x11   :  { %s47_s24 = sshll.u32 %s4766_s5, 4  ;;  %s48_s24 = int_to_ptr.hbm [resolvable:$true] %s47_s24 }
  0x12   :  { %42 = dma.hbm_to_vmem [thread:$0]  %s35_s30, 256, %s37_s0, [#allocation3], %s4756_s6, %s4756_s6, %s4757_s25  }
  0x13   :  { %55 = dma.hbm_to_vmem [thread:$0]  %s48_s24, 256, %s50_s2, [#allocation6], %s4756_s6, %s4756_s6, %s4757_s25  }
  0x14   :  { %3280 = dma.done.wait [#allocation3], 256  }
  0x15   :  { %3281 = vsyncadd [#allocation3], 4294967040 }
  0x16   :  { %3282 = dma.done.wait [#allocation6], 256  }
  0x17   :  { %3283 = vsyncadd [#allocation6], 4294967040  ;;  %s4767_s28 = sld [smem:[#allocation15_spill]]  ;;  %vm120_vm0 = vcmask 261120   ;;  %v3433_v4 = vld [vmem:[#allocation2] sm:$0xff]  ;;  %v3435_v5 = vld [vmem:[#allocation2 + $0x8] sm:$0xff]  ;;  %v112_v16 = vlaneseq }
  0x18   :  { %s4768_s26 = sld [smem:[#allocation16_spill]]  ;;  %s3290_s2 = smov 96   ;;  %vm196_vm5 = vcmask 130048  }
  0x19   :  { %s3291_s27 = smov 64   ;;  %v3473_v17 = vand.u32 127, %v112_v16  ;;  %s4771_s4 = sld [smem:[#allocation13_spill]] }
  0x1a   :  { %s4776_s5 = sld [smem:[#allocation17_spill]]  ;;  %s2844_s1 = sshll.u32 %s4750_s22, 4  ;;  %s2845_s1 = int_to_ptr.hbm [resolvable:$true] %s2844_s1 }
  0x1b   :  { %vm397_vm1 = vcmp.ge.s32.totalorder %v3473_v17, 16  ;;  %vm398_vm2 = vcmp.lt.s32.totalorder %v3473_v17, 24  ;;  %vm151_vm3 = vcmp.lt.s32.totalorder %v3473_v17, 8  ;;  %vm282_vm14 = vcmp.ge.s32.totalorder %v3473_v17, 8  ;;  %s4777_s3 = sld [smem:[#allocation14_spill]]  ;;  %s4807_s24 = smov 128  }
  0x1c   :  { %vm3490_vm4 = vmand %vm397_vm1, %vm398_vm2  ;;  %vm283_vm15 = vcmp.lt.s32.totalorder %v3473_v17, 16  ;;  %vm512_vm2 = vcmp.ge.s32.totalorder %v3473_v17, 24 }
  0x1d   :  { %v117_v0 = vld [vmem:[%s4767_s28 + $0x18] sm:$0xff]  ;;  %v116_v1 = vld [vmem:[%s4767_s28 + $0x10] sm:$0xff]  ;;  %v115_v2 = vld [vmem:[%s4767_s28 + $0x8] sm:$0xff] }
  0x1e   :  { %139 = vmatpush.msra.mxu0 %v117_v0  ;;  %2982 = vmatpush.msra.mxu1 %v117_v0  ;;  %v114_v3 = vld [vmem:[%s4767_s28] sm:$0xff]  ;;  %vm3539_vm1 = vmand %vm282_vm14, %vm283_vm15 }
  0x1f   :  { %v3016_v6 = vld [vmem:[%s4768_s26] ss:$0 sm:$0xff]  ;;  %v3518_v28 = vld [vmem:[%s4771_s4 + $0x8] sm:$0xff] }
  0x20   :  { %140 = vmatpush.msra.mxu0 %v116_v1  ;;  %2983 = vmatpush.msra.mxu1 %v116_v1  ;;  %v3511_v24 = vld [vmem:[%s4771_s4] sm:$0xff] }
  0x22   :  { %141 = vmatpush.msra.mxu0 %v115_v2  ;;  %2984 = vmatpush.msra.mxu1 %v115_v2 }
  0x24   :  { %142 = vmatpush.msra.mxu0 %v114_v3  ;;  %2985 = vmatpush.msra.mxu1 %v114_v3 }
  0x25   :  { %2858 = vmatmul.msk.f32.vlgmr.msra.gmra.mxu0 %vm120_vm0, %v3433_v4  ;;  %2859 = vmatmul.msk.f32.vlgmr.msra.gmra.mxu1 %vm120_vm0, %v3435_v5 }
  0xa2   :  { %v144_v7 = vpop.f32.mrf.mxu0  ;;  %v147_v8 = vpop.f32.mrf.mxu1 }
  0xa3   :  { %v3444_v9 = vadd.f32 %v3016_v6, %v144_v7  ;;  %v3446_v10 = vadd.f32 %v3016_v6, %v147_v8 }
  0xa5   :  { %161 = vrot.lane.b32.xlu0 %v3446_v10, %s3290_s2  ;;  %v2996_v11 = vpack.i.bf16 %v3444_v9, %v3446_v10  ;;  %v155_v19 = vsel %vm151_vm3, %v3444_v9, 0.0  ;;  %v402_v21 = vsel %vm3490_vm4, %v3444_v9, 0.0  ;;  %v156_v22 = vsel %vm151_vm3, %v3446_v10, 0.0 }
  0xa6   :  { %v403_v23 = vsel %vm3490_vm4, %v3446_v10, 0.0  ;;  %v287_v8 = vsel %vm3539_vm1, %v3444_v9, 0.0 }
  0xa7   :  { %2997 = vrot.lane.b32.xlu2 %v2996_v11, %s3291_s27  ;;  %v288_v11 = vsel %vm3539_vm1, %v3446_v10, 0.0 }
  0xad   :  { %159 = vrot.lane.b32.xlu0 %v3444_v9, %s3290_s2 }
 0x101   :  { %v2998_v12 = vpop.permute.xlu2 %2997 }
 0x102   :  { %v3455_v13 = vunpack.i.l.bf16 %v2998_v12  ;;  %v3457_v14 = vunpack.i.h.bf16 %v2998_v12 }
 0x104   :  { %271 = vmatpush.msra.mxu2 %v3455_v13  ;;  %2986 = vmatpush.msra.mxu3 %v3455_v13 }
 0x106   :  { %272 = vmatpush.msra.mxu2 %v3457_v14  ;;  %2987 = vmatpush.msra.mxu3 %v3457_v14 }
 0x108   :  { %386 = vmatpush.msrb.mxu2 %v3455_v13 }
 0x10a   :  { %387 = vmatpush.msrb.mxu2 %v3457_v14 }
 0x117   :  { %v3465_v15 = vpop.permute.xlu0 %161 }
 0x118   :  { %2860 = vmatpush.xpose.msk.msrb.mxu1 %vm120_vm0, %v3465_v15  ;;  %2866 = vmatpush.xpose.msk.msrb.mxu3 %vm120_vm0, %v3465_v15 }
 0x119   :  { %2872 = vmatpush.xpose.msk.msrb.mxu0 %vm120_vm0, %v3465_v15 }
 0x11f   :  { %v3475_v18 = vpop.permute.xlu0 %159 }
 0x120   :  { %2861 = vmatpush.xpose.msk.msrb.mxu1 %vm120_vm0, %v3475_v18  ;;  %2867 = vmatpush.xpose.msk.msrb.mxu3 %vm120_vm0, %v3475_v18 }
 0x121   :  { %2873 = vmatpush.xpose.msk.msrb.mxu0 %vm120_vm0, %v3475_v18 }
 0x123   :  { %2862 = vmatmul.msk.f32.vlgmr.msrb.gmra.mxu1 %vm120_vm0, %v155_v19 }
 0x124   :  { %501 = vmatpush.msra.mxu1 %v3455_v13  ;;  %2874 = vmatmul.msk.f32.vlgmr.msrb.gmra.mxu0 %vm120_vm0, %v402_v21 }
 0x126   :  { %502 = vmatpush.msra.mxu1 %v3457_v14 }
 0x12b   :  { %2863 = vmatmul.msk.f32.gmra.mxu1 %vm120_vm0, %v156_v22 }
 0x12c   :  { %2875 = vmatmul.msk.f32.gmra.mxu0 %vm120_vm0, %v403_v23 }
 0x1a0   :  { %v190_v25 = vpop.f32.mrf.mxu1 }
 0x1a1   :  { %v191_v26 = vadd.f32 %v190_v25, %v3511_v24  ;;  %v427_v42 = vpop.f32.mrf.mxu0 }
 0x1a2   :  { %v3525_v43 = vadd.f32 %v427_v42, %v3511_v24 }
 0x1a3   :  { %v197_v27 = vsel %vm196_vm5, %v191_v26, -inf }
 0x1a4   :  { %198 = vmax.xlane.f32.xlu2 %v197_v27  ;;  %v433_v44 = vsel %vm196_vm5, %v3525_v43, -inf }
 0x1a8   :  { %v193_v29 = vpop.f32.mrf.mxu1 }
 0x1a9   :  { %v194_v30 = vadd.f32 %v193_v29, %v3518_v28 }
 0x1ab   :  { %v200_v31 = vsel %vm196_vm5, %v194_v30, -inf }
 0x1ac   :  { %201 = vmax.xlane.f32.xlu1 %v200_v31 }
 0x217   :  { %v199_v32 = vpop.xlane.xlu2 %198 }
 0x218   :  { %v203_v33 = vsub.f32 %v191_v26, %v199_v32 }
 0x21a   :  { %v205_v34 = vmul.f32 1.442695, %v203_v33 }
 0x21c   :  { %3044 = vpow2.f32 %v205_v34 }
 0x21f   :  { %v202_v35 = vpop.xlane.xlu1 %201 }
 0x220   :  { %v204_v36 = vsub.f32 %v194_v30, %v202_v35  ;;  %v430_v30 = vpop.f32.mrf.mxu0 }
 0x221   :  { %v431_v31 = vadd.f32 %v430_v30, %v3518_v28 }
 0x222   :  { %v3045_v37 = vpop.eup %3044  ;;  %v207_v38 = vmul.f32 1.442695, %v204_v36 }
 0x223   :  { %v209_v39 = vsel %vm196_vm5, %v3045_v37, 0.0  ;;  %v436_v32 = vsel %vm196_vm5, %v431_v31, -inf }
 0x224   :  { %3046 = vpow2.f32 %v207_v38  ;;  %210 = vadd.xlane.f32.xlu2 %v209_v39 }
 0x22a   :  { %v3047_v40 = vpop.eup %3046 }
 0x22b   :  { %v212_v41 = vsel %vm196_vm5, %v3047_v40, 0.0 }
 0x22c   :  { %213 = vadd.xlane.f32.xlu1 %v212_v41 }
 0x234   :  { %434 = vmax.xlane.f32.xlu1 %v433_v44 }
 0x297   :  { %v211_v45 = vpop.xlane.xlu2 %210 }
 0x298   :  { %3048 = vrcp.f32 %v211_v45  ;;  %v226_v50 = vand.u32 2147483648, %v211_v45  ;;  %v224_v52 = vand.u32 2147483647, %v211_v45  ;;  %vm220_vm7 = vweird.f32 %v211_v45 }
 0x29a   :  { %v227_v55 = vor.u32 1.1754944e-38, %v226_v50  ;;  %vm225_vm9 = vcmp.eq.f32.partialorder %v224_v52, 8.507059e+37 }
 0x29e   :  { %v3049_v46 = vpop.eup %3048 }
 0x29f   :  { %v216_v47 = vmul.f32 %v3049_v46, %v211_v45  ;;  %v214_v48 = vpop.xlane.xlu1 %213  ;;  %vm221_vm6 = vweird.f32 %v3049_v46 }
 0x2a0   :  { %3050 = vrcp.f32 %v214_v48  ;;  %vm222_vm8 = vmor %vm220_vm7, %vm221_vm6  ;;  %v241_v61 = vand.u32 2147483648, %v214_v48  ;;  %v239_v63 = vand.u32 2147483647, %v214_v48  ;;  %vm235_vm11 = vweird.f32 %v214_v48 }
 0x2a1   :  { %v217_v49 = vsub.f32 1.0, %v216_v47  ;;  %vm513_vm6 = vcmp.lt.s32.totalorder %v3473_v17, 32 }
 0x2a2   :  { %v242_v1 = vor.u32 1.1754944e-38, %v241_v61  ;;  %vm240_vm13 = vcmp.eq.f32.partialorder %v239_v63, 8.507059e+37  ;;  %vm3553_vm7 = vmand %vm512_vm2, %vm513_vm6 }
 0x2a3   :  { %v218_v51 = vmul.f32 %v3049_v46, %v217_v49 }
 0x2a5   :  { %v219_v53 = vadd.f32 %v3049_v46, %v218_v51 }
 0x2a6   :  { %v3051_v54 = vpop.eup %3050 }
 0x2a7   :  { %v231_v56 = vmul.f32 %v3051_v54, %v214_v48  ;;  %v223_v57 = vsel %vm222_vm8, %v3049_v46, %v219_v53  ;;  %vm236_vm10 = vweird.f32 %v3051_v54  ;;  %v435_v33 = vpop.xlane.xlu1 %434 }
 0x2a8   :  { %v228_v58 = vsel %vm225_vm9, %v227_v55, %v223_v57  ;;  %vm237_vm12 = vmor %vm235_vm11, %vm236_vm10 }
 0x2a9   :  { %v232_v59 = vsub.f32 1.0, %v231_v56  ;;  %v229_v60 = vmul.f32 %v3045_v37, %v228_v58 }
 0x2ab   :  { %v233_v62 = vmul.f32 %v3051_v54, %v232_v59  ;;  %2864 = vmatmul.msk.f32.vlgmr.msra.gmra.mxu2 %vm196_vm5, %v229_v60 }
 0x2ac   :  { %616 = vmatpush.msra.mxu2 %v3455_v13  ;;  %v517_v13 = vsel %vm3553_vm7, %v3444_v9, 0.0 }
 0x2ad   :  { %v234_v0 = vadd.f32 %v3051_v54, %v233_v62 }
 0x2ae   :  { %617 = vmatpush.msra.mxu2 %v3457_v14  ;;  %v518_v14 = vsel %vm3553_vm7, %v3446_v10, 0.0 }
 0x2af   :  { %v238_v2 = vsel %vm237_vm12, %v3051_v54, %v234_v0 }
 0x2b0   :  { %v243_v3 = vsel %vm240_vm13, %v242_v1, %v238_v2 }
 0x2b1   :  { %v244_v6 = vmul.f32 %v3047_v40, %v243_v3 }
 0x2b3   :  { %2865 = vmatmul.msk.f32.vlgmr.msra.gmra.mxu3 %vm196_vm5, %v244_v6 }
 0x2b4   :  { %2878 = vmatpush.xpose.msk.msra.mxu3 %vm120_vm0, %v3465_v15 }
 0x2b8   :  { %2879 = vmatpush.xpose.msk.msra.mxu3 %vm120_vm0, %v3475_v18 }
 0x2bb   :  { %2868 = vmatmul.msk.f32.vlgmr.msrb.gmra.mxu3 %vm120_vm0, %v287_v8 }
 0x2c3   :  { %2869 = vmatmul.msk.f32.gmra.mxu3 %vm120_vm0, %v288_v11 }
 0x2cb   :  { %2880 = vmatmul.msk.f32.vlgmr.msra.gmra.mxu3 %vm120_vm0, %v517_v13 }
 0x2d3   :  { %2881 = vmatmul.msk.f32.gmra.mxu3 %vm120_vm0, %v518_v14 }
 0x336   :  { %v3565_v15 = vpop.f32.mrf.mxu3 }
 0x33e   :  { %v312_v16 = vpop.f32.mrf.mxu3 }
 0x33f   :  { %v313_v18 = vadd.f32 %v312_v16, %v3511_v24 }
 0x341   :  { %v318_v19 = vsel %vm196_vm5, %v313_v18, -inf }
 0x342   :  { %319 = vmax.xlane.f32.xlu0 %v318_v19 }
 0x346   :  { %v315_v21 = vpop.f32.mrf.mxu3 }
 0x347   :  { %v316_v22 = vadd.f32 %v315_v21, %v3518_v28 }
 0x349   :  { %v321_v9 = vsel %vm196_vm5, %v316_v22, -inf }
 0x34a   :  { %322 = vmax.xlane.f32.xlu1 %v321_v9 }
 0x34e   :  { %v542_v23 = vpop.f32.mrf.mxu3 }
 0x34f   :  { %v543_v25 = vadd.f32 %v542_v23, %v3511_v24  ;;  %v439_v24 = vsub.f32 %v3525_v43, %v435_v33 }
 0x351   :  { %v548_v10 = vsel %vm196_vm5, %v543_v25, -inf  ;;  %v441_v37 = vmul.f32 1.442695, %v439_v24 }
 0x352   :  { %549 = vmax.xlane.f32.xlu1 %v548_v10 }
 0x356   :  { %v545_v26 = vpop.f32.mrf.mxu3 }
 0x357   :  { %v546_v27 = vadd.f32 %v545_v26, %v3518_v28 }
 0x359   :  { %v551_v29 = vsel %vm196_vm5, %v546_v27, -inf }
 0x35a   :  { %552 = vmax.xlane.f32.xlu1 %v551_v29 }
 0x362   :  { %437 = vmax.xlane.f32.xlu1 %v436_v32 }
 0x3b5   :  { %v320_v34 = vpop.xlane.xlu0 %319 }
 0x3b6   :  { %v324_v35 = vsub.f32 %v313_v18, %v320_v34 }
 0x3b8   :  { %v326_v36 = vmul.f32 1.442695, %v324_v35 }
 0x3ba   :  { %3052 = vpow2.f32 %v326_v36 }
 0x3bb   :  { %3054 = vpow2.f32 %v441_v37 }
 0x3bd   :  { %v323_v38 = vpop.xlane.xlu1 %322 }
 0x3be   :  { %v325_v39 = vsub.f32 %v316_v22, %v323_v38 }
 0x3c0   :  { %v3053_v40 = vpop.eup %3052  ;;  %v328_v41 = vmul.f32 1.442695, %v325_v39 }
 0x3c1   :  { %v330_v42 = vsel %vm196_vm5, %v3053_v40, 0.0  ;;  %v3579_v44 = vpop.eup %3054 }
 0x3c2   :  { %3056 = vpow2.f32 %v328_v41  ;;  %331 = vadd.xlane.f32.xlu1 %v330_v42  ;;  %v445_v43 = vsel %vm196_vm5, %v3579_v44, 0.0 }
 0x3c5   :  { %v550_v28 = vpop.xlane.xlu1 %549 }
 0x3c6   :  { %v554_v45 = vsub.f32 %v543_v25, %v550_v28 }
 0x3c8   :  { %v3581_v46 = vpop.eup %3056  ;;  %v556_v47 = vmul.f32 1.442695, %v554_v45 }
 0x3c9   :  { %v333_v48 = vsel %vm196_vm5, %v3581_v46, 0.0 }
 0x3ca   :  { %3058 = vpow2.f32 %v556_v47  ;;  %446 = vadd.xlane.f32.xlu1 %v445_v43  ;;  %334 = vadd.xlane.f32.xlu2 %v333_v48 }
 0x3cd   :  { %v553_v49 = vpop.xlane.xlu1 %552 }
 0x3ce   :  { %v555_v50 = vsub.f32 %v546_v27, %v553_v49 }
 0x3d0   :  { %v3587_v51 = vpop.eup %3058  ;;  %v558_v52 = vmul.f32 1.442695, %v555_v50 }
 0x3d1   :  { %v560_v53 = vsel %vm196_vm5, %v3587_v51, 0.0 }
 0x3d2   :  { %3060 = vpow2.f32 %v558_v52  ;;  %561 = vadd.xlane.f32.xlu0 %v560_v53 }
 0x3d5   :  { %v438_v54 = vpop.xlane.xlu1 %437 }
 0x3d6   :  { %v440_v55 = vsub.f32 %v431_v31, %v438_v54 }
 0x3d8   :  { %v3591_v56 = vpop.eup %3060  ;;  %v443_v57 = vmul.f32 1.442695, %v440_v55 }
 0x3d9   :  { %v563_v58 = vsel %vm196_vm5, %v3591_v56, 0.0 }
 0x3da   :  { %3062 = vpow2.f32 %v443_v57  ;;  %564 = vadd.xlane.f32.xlu2 %v563_v58 }
 0x3e0   :  { %v3595_v59 = vpop.eup %3062 }
 0x3e1   :  { %v448_v60 = vsel %vm196_vm5, %v3595_v59, 0.0 }
 0x3e2   :  { %449 = vadd.xlane.f32.xlu0 %v448_v60 }
 0x435   :  { %v332_v61 = vpop.xlane.xlu1 %331 }
 0x436   :  { %3064 = vrcp.f32 %v332_v61  ;;  %v347_v6 = vand.u32 2147483648, %v332_v61  ;;  %v345_v8 = vand.u32 2147483647, %v332_v61  ;;  %vm341_vm9 = vweird.f32 %v332_v61 }
 0x438   :  { %v348_v16 = vor.u32 1.1754944e-38, %v347_v6  ;;  %vm346_vm11 = vcmp.eq.f32.partialorder %v345_v8, 8.507059e+37 }
 0x43c   :  { %v3065_v62 = vpop.eup %3064 }
 0x43d   :  { %v337_v63 = vmul.f32 %v3065_v62, %v332_v61  ;;  %v447_v0 = vpop.xlane.xlu1 %446  ;;  %v335_v1 = vpop.xlane.xlu2 %334  ;;  %vm342_vm8 = vweird.f32 %v3065_v62 }
 0x43e   :  { %3066 = vrcp.f32 %v447_v0  ;;  %vm343_vm10 = vmor %vm341_vm9, %vm342_vm8  ;;  %v462_v25 = vand.u32 2147483648, %v447_v0  ;;  %v460_v29 = vand.u32 2147483647, %v447_v0  ;;  %v362_v31 = vand.u32 2147483648, %v335_v1 }
 0x43f   :  { %v338_v2 = vsub.f32 1.0, %v337_v63  ;;  %3068 = vrcp.f32 %v335_v1  ;;  %vm456_vm13 = vweird.f32 %v447_v0  ;;  %v360_v33 = vand.u32 2147483647, %v335_v1 }
 0x440   :  { %v463_v35 = vor.u32 1.1754944e-38, %v462_v25  ;;  %vm461_vm2 = vcmp.eq.f32.partialorder %v460_v29, 8.507059e+37  ;;  %vm356_vm6 = vweird.f32 %v335_v1  ;;  %v274_v25 = vpop.f32.mrf.mxu2 }
 0x441   :  { %v339_v3 = vmul.f32 %v3065_v62, %v338_v2  ;;  %vm361_vm9 = vcmp.eq.f32.partialorder %v360_v33, 8.507059e+37 }
 0x443   :  { %v340_v11 = vadd.f32 %v3065_v62, %v339_v3 }
 0x444   :  { %v3067_v13 = vpop.eup %3066 }
 0x445   :  { %v3069_v14 = vpop.eup %3068  ;;  %v452_v18 = vmul.f32 %v3067_v13, %v447_v0  ;;  %v562_v19 = vpop.xlane.xlu0 %561  ;;  %v344_v21 = vsel %vm343_vm10, %v3065_v62, %v340_v11  ;;  %vm457_vm12 = vweird.f32 %v3067_v13 }
 0x446   :  { %v352_v22 = vmul.f32 %v3069_v14, %v335_v1  ;;  %3070 = vrcp.f32 %v562_v19  ;;  %v349_v23 = vsel %vm346_vm11, %v348_v16, %v344_v21  ;;  %vm357_vm14 = vweird.f32 %v3069_v14  ;;  %vm458_vm15 = vmor %vm456_vm13, %vm457_vm12 }
 0x447   :  { %v453_v9 = vsub.f32 1.0, %v452_v18  ;;  %v350_v26 = vmul.f32 %v3053_v40, %v349_v23  ;;  %v363_v40 = vor.u32 1.1754944e-38, %v362_v31  ;;  %vm358_vm8 = vmor %vm356_vm6, %vm357_vm14  ;;  %v577_v45 = vand.u32 2147483648, %v562_v19  ;;  %v628_v23 = vld [vmem:[%s4776_s5 + $0x8] sm:$0xff] }
 0x448   :  { %v353_v10 = vsub.f32 1.0, %v352_v22  ;;  %v575_v48 = vand.u32 2147483647, %v562_v19  ;;  %vm571_vm11 = vweird.f32 %v562_v19 }
 0x449   :  { %v454_v27 = vmul.f32 %v3067_v13, %v453_v9  ;;  %2870 = vmatmul.msk.f32.vlgmr.msrb.gmra.mxu2 %vm196_vm5, %v350_v26  ;;  %v578_v53 = vor.u32 1.1754944e-38, %v577_v45  ;;  %v629_v9 = vld [vmem:[%s4776_s5 + $0x10] sm:$0xff] }
 0x44a   :  { %v354_v30 = vmul.f32 %v3069_v14, %v353_v10  ;;  %vm576_vm13 = vcmp.eq.f32.partialorder %v575_v48, 8.507059e+37  ;;  %v3292_v48 = vmov 32.0  }
 0x44b   :  { %v455_v32 = vadd.f32 %v3067_v13, %v454_v27  ;;  %v280_v27 = vsel %vm151_vm3, %v274_v25, 0.0 }
 0x44c   :  { %v3071_v34 = vpop.eup %3070  ;;  %v355_v24 = vadd.f32 %v3069_v14, %v354_v30 }
 0x44d   :  { %v459_v36 = vsel %vm458_vm15, %v3067_v13, %v455_v32  ;;  %v567_v37 = vmul.f32 %v3071_v34, %v562_v19  ;;  %v565_v38 = vpop.xlane.xlu2 %564  ;;  %vm572_vm10 = vweird.f32 %v3071_v34 }
 0x44e   :  { %v464_v39 = vsel %vm461_vm2, %v463_v35, %v459_v36  ;;  %3072 = vrcp.f32 %v565_v38  ;;  %v359_v42 = vsel %vm358_vm8, %v3069_v14, %v355_v24  ;;  %vm573_vm12 = vmor %vm571_vm11, %vm572_vm10  ;;  %v592_v61 = vand.u32 2147483648, %v565_v38 }
 0x44f   :  { %v568_v41 = vsub.f32 1.0, %v567_v37  ;;  %v465_v28 = vmul.f32 %v3579_v44, %v464_v39  ;;  %v364_v47 = vsel %vm361_vm9, %v363_v40, %v359_v42  ;;  %v590_v62 = vand.u32 2147483647, %v565_v38  ;;  %v3017_v39 = vld [vmem:[%s4735_s7] ss:$0 sm:$0xff] }
 0x450   :  { %v365_v49 = vmul.f32 %v3581_v46, %v364_v47  ;;  %vm586_vm15 = vweird.f32 %v565_v38  ;;  %v593_v1 = vor.u32 1.1754944e-38, %v592_v61 }
 0x451   :  { %v569_v43 = vmul.f32 %v3071_v34, %v568_v41  ;;  %2876 = vmatmul.msk.f32.vlgmr.msra.gmra.mxu1 %vm196_vm5, %v465_v28  ;;  %vm591_vm6 = vcmp.eq.f32.partialorder %v590_v62, 8.507059e+37 }
 0x452   :  { %2871 = vmatmul.msk.f32.gmra.mxu2 %vm196_vm5, %v365_v49 }
 0x453   :  { %v570_v50 = vadd.f32 %v3071_v34, %v569_v43 }
 0x454   :  { %v3073_v52 = vpop.eup %3072 }
 0x455   :  { %v574_v54 = vsel %vm573_vm12, %v3071_v34, %v570_v50  ;;  %v582_v55 = vmul.f32 %v3073_v52, %v565_v38  ;;  %v450_v44 = vpop.xlane.xlu0 %449  ;;  %vm587_vm14 = vweird.f32 %v3073_v52  ;;  %v281_v34 = vsel %vm151_vm3, %v3565_v15, 0.0 }
 0x456   :  { %v579_v57 = vsel %vm576_vm13, %v578_v53, %v574_v54  ;;  %3074 = vrcp.f32 %v450_v44  ;;  %vm588_vm2 = vmor %vm586_vm15, %vm587_vm14  ;;  %v477_v13 = vand.u32 2147483648, %v450_v44  ;;  %v475_v14 = vand.u32 2147483647, %v450_v44  ;;  %v758_v54 = vld [vmem:[%s4738_s10] sm:$0xff] }
 0x457   :  { %v583_v58 = vsub.f32 1.0, %v582_v55  ;;  %v580_v60 = vmul.f32 %v3587_v51, %v579_v57  ;;  %vm471_vm9 = vweird.f32 %v450_v44  ;;  %3076 = vrcp.f32 %v3292_v48 }
 0x458   :  { %v478_v18 = vor.u32 1.1754944e-38, %v477_v13  ;;  %vm476_vm11 = vcmp.eq.f32.partialorder %v475_v14, 8.507059e+37  ;;  %v725_v13 = vld [vmem:[%s4736_s8 + $0x10] sm:$0xff]  ;;  %v723_v14 = vld [vmem:[%s4736_s8] sm:$0xff] }
 0x459   :  { %v584_v46 = vmul.f32 %v3073_v52, %v583_v58 }
 0x45a   :  { %2882 = vmatmul.msk.f32.vlgmr.msra.gmra.mxu2 %vm196_vm5, %v580_v60 }
 0x45b   :  { %v585_v63 = vadd.f32 %v3073_v52, %v584_v46 }
 0x45c   :  { %v3075_v0 = vpop.eup %3074 }
 0x45d   :  { %v467_v2 = vmul.f32 %v3075_v0, %v450_v44  ;;  %v589_v3 = vsel %vm588_vm2, %v3073_v52, %v585_v63  ;;  %vm472_vm8 = vweird.f32 %v3075_v0  ;;  %v3077_v49 = vpop.eup %3076  ;;  %v761_v52 = vld [vmem:[%s4738_s10 + $0x18] sm:$0xff]  ;;  %v106_v44 = vld [vmem:[#allocation5] sm:$0xff] }
 0x45e   :  { %v594_v6 = vsel %vm591_vm6, %v593_v1, %v589_v3  ;;  %vm473_vm10 = vmor %vm471_vm9, %vm472_vm8  ;;  %v673_v50 = vmul.f32 32.0, %v3077_v49  ;;  %782 = vmatpush.msrb.mxu3 %v761_v52  ;;  %vm677_vm12 = vweird.f32 %v3077_v49 }
 0x45f   :  { %v468_v8 = vsub.f32 1.0, %v467_v2  ;;  %v595_v11 = vmul.f32 %v3591_v56, %v594_v6  ;;  %v630_v56 = vld [vmem:[%s4776_s5 + $0x18] sm:$0xff] }
 0x460   :  { %651 = vmatpush.msra.mxu0 %v630_v56  ;;  %v674_v53 = vsub.f32 1.0, %v673_v50 }
 0x461   :  { %v469_v51 = vmul.f32 %v3075_v0, %v468_v8  ;;  %v107_v8 = vld [vmem:[#allocation5 + $0x8] sm:$0xff] }
 0x462   :  { %2883 = vmatmul.msk.f32.gmra.mxu2 %vm196_vm5, %v595_v11  ;;  %652 = vmatpush.msra.mxu0 %v629_v9  ;;  %v675_v55 = vmul.f32 %v3077_v49, %v674_v53  ;;  %v726_v11 = vld [vmem:[%s4736_s8 + $0x18] sm:$0xff] }
 0x463   :  { %v470_v16 = vadd.f32 %v3075_v0, %v469_v51  ;;  %747 = vmatpush.msrb.mxu1 %v726_v11  ;;  %v724_v51 = vld [vmem:[%s4736_s8 + $0x8] sm:$0xff] }
 0x464   :  { %653 = vmatpush.msra.mxu0 %v628_v23  ;;  %v676_v57 = vadd.f32 %v3077_v49, %v675_v55 }
 0x465   :  { %v474_v19 = vsel %vm473_vm10, %v3075_v0, %v470_v16  ;;  %748 = vmatpush.msrb.mxu1 %v725_v13 }
 0x466   :  { %v479_v21 = vsel %vm476_vm11, %v478_v18, %v474_v19  ;;  %v3661_v58 = vsel %vm677_vm12, %v3077_v49, %v676_v57  ;;  %v3021_v49 = vld [vmem:[%s4737_s9] ss:$0 sm:$0xff] }
 0x467   :  { %v480_v22 = vmul.f32 %v3595_v59, %v479_v21  ;;  %v627_v59 = vld [vmem:[%s4776_s5] sm:$0xff]  ;;  %749 = vmatpush.msrb.mxu1 %v724_v51 }
 0x468   :  { %654 = vmatpush.msra.mxu0 %v627_v59 }
 0x469   :  { %2877 = vmatmul.msk.f32.gmra.mxu1 %vm196_vm5, %v480_v22 }
 0x46a   :  { %750 = vmatpush.msrb.mxu1 %v723_v14 }
 0x4cc   :  { %v389_v10 = vpop.f32.mrf.mxu2 }
 0x4cd   :  { %v395_v29 = vsel %vm3539_vm1, %v389_v10, %v280_v27 }
 0x4ce   :  { %v504_v30 = vpop.f32.mrf.mxu1 }
 0x4cf   :  { %v510_v31 = vsel %vm3490_vm4, %v504_v30, %v395_v29  ;;  %v3018_v29 = vld [vmem:[%s4746_s18] ss:$0 sm:$0xff] }
 0x4d5   :  { %v392_v26 = vpop.f32.mrf.mxu2 }
 0x4d6   :  { %v396_v35 = vsel %vm3539_vm1, %v392_v26, %v281_v34  ;;  %v3019_v34 = vld [vmem:[%s4747_s19] ss:$0 sm:$0xff] }
 0x4dd   :  { %v619_v32 = vpop.f32.mrf.mxu2 }
 0x4de   :  { %v625_v33 = vsel %vm3553_vm7, %v619_v32, %v510_v31 }
 0x4df   :  { %2884 = vmatmul.msk.f32.vlgmr.msra.gmra.mxu0 %vm120_vm0, %v625_v33 }
 0x4e5   :  { %v622_v36 = vpop.f32.mrf.mxu2 }
 0x4e6   :  { %v507_v24 = vpop.f32.mrf.mxu1 }
 0x4e7   :  { %v511_v37 = vsel %vm3490_vm4, %v507_v24, %v396_v35 }
 0x4e8   :  { %v626_v38 = vsel %vm3553_vm7, %v622_v36, %v511_v37 }
 0x4e9   :  { %2885 = vmatmul.msk.f32.gmra.mxu0 %vm120_vm0, %v626_v38 }
 0x55c   :  { %v656_v40 = vpop.f32.mrf.mxu0 }
 0x55d   :  { %v657_v41 = vadd.f32 %v3017_v39, %v656_v40 }
 0x55f   :  { %v662_v15 = vadd.f32 %v657_v41, %v3433_v4  ;;  %v760_v4 = vld [vmem:[%s4738_s10 + $0x10] sm:$0xff] }
 0x560   :  { %783 = vmatpush.msrb.mxu3 %v760_v4 }
 0x561   :  { %v666_v42 = vsel %vm120_vm0, %v662_v15, 0.0 }
 0x562   :  { %667 = vadd.xlane.f32.xlu1 %v666_v42 }
 0x566   :  { %v659_v28 = vpop.f32.mrf.mxu0 }
 0x567   :  { %v660_v45 = vadd.f32 %v3017_v39, %v659_v28  ;;  %v3020_v28 = vld [vmem:[%s4739_s11] ss:$0 sm:$0xff] }
 0x569   :  { %v663_v47 = vadd.f32 %v660_v45, %v3435_v5  ;;  %v759_v5 = vld [vmem:[%s4738_s10 + $0x8] sm:$0xff] }
 0x56a   :  { %784 = vmatpush.msrb.mxu3 %v759_v5 }
 0x56b   :  { %v669_v43 = vsel %vm120_vm0, %v663_v47, 0.0 }
 0x56c   :  { %670 = vadd.xlane.f32.xlu2 %v669_v43  ;;  %785 = vmatpush.msrb.mxu3 %v758_v54 }
 0x56d   :  { %2888 = vmatmul.msk.f32.vlgmr.msrb.gmra.mxu3 %vm120_vm0, %v106_v44 }
 0x575   :  { %2889 = vmatmul.msk.f32.gmra.mxu3 %vm120_vm0, %v107_v8 }
 0x5d5   :  { %v668_v60 = vpop.xlane.xlu1 %667 }
 0x5d6   :  { %v679_v61 = vmul.f32 %v3661_v58, %v668_v60 }
 0x5d8   :  { %v681_v46 = vsub.f32 %v662_v15, %v679_v61 }
 0x5da   :  { %v683_v62 = vmul.f32 %v681_v46, %v681_v46 }
 0x5dc   :  { %v685_v63 = vsel %vm120_vm0, %v683_v62, 0.0  ;;  %v110_v62 = vld [vmem:[%s4777_s3] sm:$0xff] }
 0x5dd   :  { %686 = vadd.xlane.f32.xlu0 %v685_v63 }
 0x5df   :  { %v671_v0 = vpop.xlane.xlu2 %670 }
 0x5e0   :  { %v680_v1 = vmul.f32 %v3661_v58, %v671_v0 }
 0x5e2   :  { %v682_v2 = vsub.f32 %v663_v47, %v680_v1 }
 0x5e4   :  { %v684_v3 = vmul.f32 %v682_v2, %v682_v2 }
 0x5e6   :  { %v688_v6 = vsel %vm120_vm0, %v684_v3, 0.0 }
 0x5e7   :  { %689 = vadd.xlane.f32.xlu1 %v688_v6  ;;  %v111_v6 = vld [vmem:[%s4777_s3 + $0x8] sm:$0xff] }
 0x5f0   :  { %v787_v42 = vpop.f32.mrf.mxu3 }
 0x5f1   :  { %v3701_v43 = vadd.f32 %v3020_v28, %v787_v42 }
 0x5f8   :  { %v790_v45 = vpop.f32.mrf.mxu3 }
 0x5f9   :  { %v3699_v47 = vadd.f32 %v3020_v28, %v790_v45 }
 0x5fb   :  { %2890 = vmatpush.xpose.msk.msrb.mxu2 %vm120_vm0, %v3699_v47  ;;  %2896 = vmatpush.xpose.msk.msra.mxu1 %vm120_vm0, %v3699_v47  ;;  %v3001_v48 = vpack.i.bf16 %v3701_v43, %v3699_v47 }
 0x5ff   :  { %2891 = vmatpush.xpose.msk.msrb.mxu2 %vm120_vm0, %v3701_v43  ;;  %2897 = vmatpush.xpose.msk.msra.mxu1 %vm120_vm0, %v3701_v43 }
 0x603   :  { %2902 = vmatpush.xpose.msk.msra.mxu2 %vm120_vm0, %v3699_v47 }
 0x607   :  { %2903 = vmatpush.xpose.msk.msra.mxu2 %vm120_vm0, %v3701_v43 }
 0x650   :  { %v687_v16 = vpop.xlane.xlu0 %686 }
 0x651   :  { %v691_v18 = vmul.f32 %v687_v16, %v3661_v58 }
 0x653   :  { %v693_v19 = vadd.f32 1e-05, %v691_v18 }
 0x655   :  { %3078 = vrsqrt.f32 %v693_v19  ;;  %vm701_vm14 = vweird.f32 %v693_v19 }
 0x65a   :  { %v690_v21 = vpop.xlane.xlu1 %689 }
 0x65b   :  { %v692_v22 = vmul.f32 %v690_v21, %v3661_v58  ;;  %v3079_v56 = vpop.eup %3078 }
 0x65c   :  { %v696_v9 = vmul.f32 %v3079_v56, %v693_v19  ;;  %vm702_vm13 = vweird.f32 %v3079_v56 }
 0x65d   :  { %v694_v23 = vadd.f32 1e-05, %v692_v22  ;;  %vm703_vm15 = vmor %vm701_vm14, %vm702_vm13 }
 0x65e   :  { %v697_v59 = vmul.f32 %v3079_v56, %v696_v9 }
 0x65f   :  { %3080 = vrsqrt.f32 %v694_v23  ;;  %vm711_vm6 = vweird.f32 %v694_v23 }
 0x660   :  { %v698_v25 = vmul.f32 0.5, %v697_v59 }
 0x662   :  { %v699_v10 = vsub.f32 1.5, %v698_v25 }
 0x664   :  { %v700_v27 = vmul.f32 %v3079_v56, %v699_v10 }
 0x665   :  { %v3081_v26 = vpop.eup %3080 }
 0x666   :  { %v706_v30 = vmul.f32 %v3081_v26, %v694_v23  ;;  %v704_v31 = vsel %vm703_vm15, %v3079_v56, %v700_v27  ;;  %vm712_vm2 = vweird.f32 %v3081_v26 }
 0x667   :  { %v715_v32 = vmul.f32 %v704_v31, %v681_v46  ;;  %vm713_vm8 = vmor %vm711_vm6, %vm712_vm2 }
 0x668   :  { %v707_v33 = vmul.f32 %v3081_v26, %v706_v30 }
 0x669   :  { %v718_v35 = vmul.f32 %v3018_v29, %v715_v32 }
 0x66a   :  { %v708_v24 = vmul.f32 0.5, %v707_v33 }
 0x66b   :  { %v3688_v37 = vadd.f32 %v3019_v34, %v718_v35 }
 0x66c   :  { %v709_v36 = vsub.f32 1.5, %v708_v24 }
 0x66d   :  { %2886 = vmatmul.msk.f32.vlgmr.msrb.gmra.mxu1 %vm120_vm0, %v3688_v37 }
 0x66e   :  { %v710_v38 = vmul.f32 %v3081_v26, %v709_v36  ;;  %2908 = vmatpush.xpose.msk.msrb.mxu1 %vm120_vm0, %v3699_v47 }
 0x670   :  { %v714_v39 = vsel %vm713_vm8, %v3081_v26, %v710_v38 }
 0x671   :  { %v716_v40 = vmul.f32 %v714_v39, %v682_v2 }
 0x672   :  { %2909 = vmatpush.xpose.msk.msrb.mxu1 %vm120_vm0, %v3701_v43 }
 0x673   :  { %v719_v41 = vmul.f32 %v3018_v29, %v716_v40 }
 0x675   :  { %v3692_v15 = vadd.f32 %v3019_v34, %v719_v41 }
 0x677   :  { %2887 = vmatmul.msk.f32.gmra.mxu1 %vm120_vm0, %v3692_v15 }
 0x6ea   :  { %v752_v50 = vpop.f32.mrf.mxu1 }
 0x6eb   :  { %v753_v52 = vadd.f32 %v3021_v49, %v752_v50 }
 0x6ed   :  { %v793_v4 = vsel %vm151_vm3, %v753_v52, 0.0  ;;  %v915_v53 = vsel %vm3539_vm1, %v753_v52, 0.0  ;;  %v1025_v57 = vsel %vm3490_vm4, %v753_v52, 0.0  ;;  %v1135_v60 = vsel %vm3553_vm7, %v753_v52, 0.0 }
 0x6ee   :  { %2892 = vmatmul.msk.f32.vlgmr.msrb.gmra.mxu2 %vm120_vm0, %v793_v4  ;;  %2898 = vmatmul.msk.f32.vlgmr.msra.gmra.mxu1 %vm120_vm0, %v915_v53 }
 0x6f4   :  { %v755_v5 = vpop.f32.mrf.mxu1 }
 0x6f5   :  { %v756_v54 = vadd.f32 %v3021_v49, %v755_v5 }
 0x6f7   :  { %v794_v55 = vsel %vm151_vm3, %v756_v54, 0.0  ;;  %v916_v44 = vsel %vm3539_vm1, %v756_v54, 0.0  ;;  %v1026_v61 = vsel %vm3490_vm4, %v756_v54, 0.0  ;;  %v1136_v46 = vsel %vm3553_vm7, %v756_v54, 0.0 }
 0x6f8   :  { %2893 = vmatmul.msk.f32.gmra.mxu2 %vm120_vm0, %v794_v55  ;;  %2899 = vmatmul.msk.f32.gmra.mxu1 %vm120_vm0, %v916_v44 }
 0x700   :  { %2904 = vmatmul.msk.f32.vlgmr.msra.gmra.mxu2 %vm120_vm0, %v1025_v57  ;;  %2910 = vmatmul.msk.f32.vlgmr.msrb.gmra.mxu1 %vm120_vm0, %v1135_v60 }
 0x708   :  { %2905 = vmatmul.msk.f32.gmra.mxu2 %vm120_vm0, %v1026_v61  ;;  %2911 = vmatmul.msk.f32.gmra.mxu1 %vm120_vm0, %v1136_v46 }
 0x76b   :  { %v940_v63 = vpop.f32.mrf.mxu1 }
 0x76c   :  { %v941_v0 = vadd.f32 %v940_v63, %v110_v62 }
 0x76e   :  { %v946_v1 = vsel %vm196_vm5, %v941_v0, -inf }
 0x76f   :  { %947 = vmax.xlane.f32.xlu2 %v946_v1 }
 0x771   :  { %v824_v2 = vpop.f32.mrf.mxu2 }
 0x772   :  { %v825_v3 = vadd.f32 %v824_v2, %v110_v62 }
 0x774   :  { %v830_v8 = vsel %vm196_vm5, %v825_v3, -inf }
 0x775   :  { %v943_v11 = vpop.f32.mrf.mxu1  ;;  %831 = vmax.xlane.f32.xlu0 %v830_v8 }
 0x776   :  { %v944_v13 = vadd.f32 %v943_v11, %v111_v6 }
 0x778   :  { %v949_v51 = vsel %vm196_vm5, %v944_v13, -inf }
 0x779   :  { %950 = vmax.xlane.f32.xlu1 %v949_v51 }
 0x77b   :  { %v827_v14 = vpop.f32.mrf.mxu2 }
 0x77c   :  { %v828_v16 = vadd.f32 %v827_v14, %v111_v6 }
 0x77d   :  { %v1160_v18 = vpop.f32.mrf.mxu1 }
 0x77e   :  { %v1161_v19 = vadd.f32 %v1160_v18, %v110_v62  ;;  %v833_v21 = vsel %vm196_vm5, %v828_v16, -inf }
 0x77f   :  { %834 = vmax.xlane.f32.xlu2 %v833_v21 }
 0x780   :  { %v1166_v22 = vsel %vm196_vm5, %v1161_v19, -inf }
 0x781   :  { %1167 = vmax.xlane.f32.xlu0 %v1166_v22 }
 0x783   :  { %v1050_v56 = vpop.f32.mrf.mxu2 }
 0x784   :  { %v1051_v9 = vadd.f32 %v1050_v56, %v110_v62 }
 0x785   :  { %v1163_v23 = vpop.f32.mrf.mxu1 }
 0x786   :  { %v1164_v59 = vadd.f32 %v1163_v23, %v111_v6  ;;  %v1056_v25 = vsel %vm196_vm5, %v1051_v9, -inf }
 0x787   :  { %1057 = vmax.xlane.f32.xlu1 %v1056_v25 }
 0x788   :  { %v1169_v10 = vsel %vm196_vm5, %v1164_v59, -inf }
 0x789   :  { %1170 = vmax.xlane.f32.xlu2 %v1169_v10 }
 0x78b   :  { %v1053_v26 = vpop.f32.mrf.mxu2 }
 0x78c   :  { %v1054_v27 = vadd.f32 %v1053_v26, %v111_v6 }
 0x78e   :  { %v1059_v29 = vsel %vm196_vm5, %v1054_v27, -inf }
 0x78f   :  { %1060 = vmax.xlane.f32.xlu0 %v1059_v29 }
 0x7e2   :  { %v948_v30 = vpop.xlane.xlu2 %947 }
 0x7e3   :  { %v952_v31 = vsub.f32 %v941_v0, %v948_v30 }
 0x7e5   :  { %v954_v32 = vmul.f32 1.442695, %v952_v31 }
 0x7e7   :  { %3082 = vpow2.f32 %v954_v32 }
 0x7e8   :  { %v832_v33 = vpop.xlane.xlu0 %831 }
 0x7e9   :  { %v836_v34 = vsub.f32 %v825_v3, %v832_v33 }
 0x7eb   :  { %v838_v35 = vmul.f32 1.442695, %v836_v34 }
 0x7ec   :  { %v951_v24 = vpop.xlane.xlu1 %950 }
 0x7ed   :  { %v953_v36 = vsub.f32 %v944_v13, %v951_v24  ;;  %v3762_v38 = vpop.eup %3082  ;;  %3084 = vpow2.f32 %v838_v35 }
 0x7ee   :  { %v958_v40 = vsel %vm196_vm5, %v3762_v38, 0.0 }
 0x7ef   :  { %v956_v39 = vmul.f32 1.442695, %v953_v36  ;;  %959 = vadd.xlane.f32.xlu1 %v958_v40 }
 0x7f1   :  { %3086 = vpow2.f32 %v956_v39 }
 0x7f2   :  { %v835_v41 = vpop.xlane.xlu2 %834 }
 0x7f3   :  { %v837_v42 = vsub.f32 %v828_v16, %v835_v41  ;;  %v3766_v28 = vpop.eup %3084 }
 0x7f4   :  { %v1168_v45 = vpop.xlane.xlu0 %1167  ;;  %v842_v52 = vsel %vm196_vm5, %v3766_v28, 0.0 }
 0x7f5   :  { %v840_v49 = vmul.f32 1.442695, %v837_v42  ;;  %v1172_v50 = vsub.f32 %v1161_v19, %v1168_v45  ;;  %843 = vadd.xlane.f32.xlu2 %v842_v52 }
 0x7f7   :  { %v3770_v4 = vpop.eup %3086  ;;  %3088 = vpow2.f32 %v840_v49  ;;  %v1174_v53 = vmul.f32 1.442695, %v1172_v50 }
 0x7f8   :  { %v961_v5 = vsel %vm196_vm5, %v3770_v4, 0.0 }
 0x7f9   :  { %3090 = vpow2.f32 %v1174_v53  ;;  %962 = vadd.xlane.f32.xlu0 %v961_v5 }
 0x7fa   :  { %v1058_v54 = vpop.xlane.xlu1 %1057 }
 0x7fb   :  { %v1062_v55 = vsub.f32 %v1051_v9, %v1058_v54 }
 0x7fc   :  { %v1171_v44 = vpop.xlane.xlu2 %1170 }
 0x7fd   :  { %v3774_v57 = vpop.eup %3088  ;;  %v1064_v60 = vmul.f32 1.442695, %v1062_v55  ;;  %v1173_v61 = vsub.f32 %v1164_v59, %v1171_v44 }
 0x7fe   :  { %v845_v46 = vsel %vm196_vm5, %v3774_v57, 0.0 }
 0x7ff   :  { %v3778_v62 = vpop.eup %3090  ;;  %3092 = vpow2.f32 %v1064_v60  ;;  %v1176_v63 = vmul.f32 1.442695, %v1173_v61  ;;  %846 = vadd.xlane.f32.xlu1 %v845_v46 }
 0x800   :  { %v1178_v0 = vsel %vm196_vm5, %v3778_v62, 0.0 }
 0x801   :  { %3094 = vpow2.f32 %v1176_v63  ;;  %1179 = vadd.xlane.f32.xlu2 %v1178_v0 }
 0x802   :  { %v1061_v1 = vpop.xlane.xlu0 %1060 }
 0x803   :  { %v1063_v2 = vsub.f32 %v1054_v27, %v1061_v1 }
 0x805   :  { %v3782_v3 = vpop.eup %3092  ;;  %v1066_v6 = vmul.f32 1.442695, %v1063_v2 }
 0x806   :  { %v1068_v8 = vsel %vm196_vm5, %v3782_v3, 0.0 }
 0x807   :  { %v3786_v11 = vpop.eup %3094  ;;  %3096 = vpow2.f32 %v1066_v6  ;;  %1069 = vadd.xlane.f32.xlu1 %v1068_v8 }
 0x808   :  { %v1181_v13 = vsel %vm196_vm5, %v3786_v11, 0.0 }
 0x809   :  { %1182 = vadd.xlane.f32.xlu2 %v1181_v13 }
 0x80d   :  { %v3790_v51 = vpop.eup %3096  ;;  %3002 = vrot.lane.b32.xlu0 %v3001_v48, %s3290_s2 }
 0x80e   :  { %v1071_v14 = vsel %vm196_vm5, %v3790_v51, 0.0 }
 0x80f   :  { %1072 = vadd.xlane.f32.xlu1 %v1071_v14 }
 0x862   :  { %v960_v16 = vpop.xlane.xlu1 %959 }
 0x863   :  { %3098 = vrcp.f32 %v960_v16  ;;  %v975_v31 = vand.u32 2147483648, %v960_v16  ;;  %vm969_vm11 = vweird.f32 %v960_v16  ;;  %v973_v33 = vand.u32 2147483647, %v960_v16 }
 0x865   :  { %v976_v52 = vor.u32 1.1754944e-38, %v975_v31  ;;  %vm974_vm15 = vcmp.eq.f32.partialorder %v973_v33, 8.507059e+37 }
 0x868   :  { %v844_v18 = vpop.xlane.xlu2 %843 }
 0x869   :  { %v3099_v19 = vpop.eup %3098  ;;  %3100 = vrcp.f32 %v844_v18  ;;  %v859_v34 = vand.u32 2147483648, %v844_v18  ;;  %vm853_vm13 = vweird.f32 %v844_v18  ;;  %v857_v40 = vand.u32 2147483647, %v844_v18 }
 0x86a   :  { %v965_v21 = vmul.f32 %v3099_v19, %v960_v16  ;;  %vm970_vm9 = vweird.f32 %v3099_v19 }
 0x86b   :  { %vm3819_vm12 = vmor %vm969_vm11, %vm970_vm9  ;;  %v860_v54 = vor.u32 1.1754944e-38, %v859_v34  ;;  %vm858_vm2 = vcmp.eq.f32.partialorder %v857_v40, 8.507059e+37 }
 0x86c   :  { %v3798_v22 = vpop.xlane.xlu0 %962  ;;  %v966_v9 = vsub.f32 1.0, %v965_v21 }
 0x86d   :  { %3102 = vrcp.f32 %v3798_v22  ;;  %vm984_vm6 = vweird.f32 %v3798_v22  ;;  %v990_v60 = vand.u32 2147483648, %v3798_v22  ;;  %v988_v8 = vand.u32 2147483647, %v3798_v22 }
 0x86e   :  { %v967_v48 = vmul.f32 %v3099_v19, %v966_v9 }
 0x86f   :  { %v3101_v56 = vpop.eup %3100 }
 0x870   :  { %v849_v23 = vmul.f32 %v3101_v56, %v844_v18  ;;  %v968_v27 = vadd.f32 %v3099_v19, %v967_v48  ;;  %vm854_vm10 = vweird.f32 %v3101_v56 }
 0x871   :  { %vm3826_vm14 = vmor %vm853_vm13, %vm854_vm10 }
 0x872   :  { %v3801_v59 = vpop.xlane.xlu1 %846  ;;  %v850_v43 = vsub.f32 1.0, %v849_v23  ;;  %v972_v41 = vsel %vm3819_vm12, %v3099_v19, %v968_v27 }
 0x873   :  { %v3803_v47 = vpop.eup %3102  ;;  %3104 = vrcp.f32 %v3801_v59  ;;  %v977_v44 = vsel %vm974_vm15, %v976_v52, %v972_v41  ;;  %vm868_vm10 = vweird.f32 %v3801_v59  ;;  %v874_v13 = vand.u32 2147483648, %v3801_v59 }
 0x874   :  { %v980_v25 = vmul.f32 %v3803_v47, %v3798_v22  ;;  %v3808_v10 = vpop.xlane.xlu2 %1179  ;;  %v851_v26 = vmul.f32 %v3101_v56, %v850_v43  ;;  %vm985_vm8 = vweird.f32 %v3803_v47  ;;  %v872_v9 = vand.u32 2147483647, %v3801_v59 }
 0x875   :  { %3106 = vrcp.f32 %v3808_v10  ;;  %vm3864_vm11 = vmor %vm984_vm6, %vm985_vm8  ;;  %vm1189_vm15 = vweird.f32 %v3808_v10  ;;  %v1193_v34 = vand.u32 2147483647, %v3808_v10 }
 0x876   :  { %v981_v29 = vsub.f32 1.0, %v980_v25  ;;  %v852_v32 = vadd.f32 %v3101_v56, %v851_v26  ;;  %v991_v25 = vor.u32 1.1754944e-38, %v990_v60  ;;  %v875_v26 = vor.u32 1.1754944e-38, %v874_v13 }
 0x877   :  { %vm873_vm13 = vcmp.eq.f32.partialorder %v872_v9, 8.507059e+37 }
 0x878   :  { %v982_v45 = vmul.f32 %v3803_v47, %v981_v29  ;;  %v856_v53 = vsel %vm3826_vm14, %v3101_v56, %v852_v32  ;;  %v978_v56 = vmul.f32 %v3762_v38, %v977_v44  ;;  %vm989_vm14 = vcmp.eq.f32.partialorder %v988_v8, 8.507059e+37 }
 0x879   :  { %v3811_v30 = vpop.eup %3104  ;;  %v861_v46 = vsel %vm858_vm2, %v860_v54, %v856_v53 }
 0x87a   :  { %v864_v35 = vmul.f32 %v3811_v30, %v3801_v59  ;;  %v3815_v24 = vpop.xlane.xlu1 %1069  ;;  %v983_v0 = vadd.f32 %v3803_v47, %v982_v45  ;;  %vm869_vm9 = vweird.f32 %v3811_v30  ;;  %v862_v21 = vmul.f32 %v3766_v28, %v861_v46 }
 0x87b   :  { %v3817_v36 = vpop.eup %3106  ;;  %3108 = vrcp.f32 %v3815_v24  ;;  %vm3872_vm12 = vmor %vm868_vm10, %vm869_vm9  ;;  %v1085_v39 = vand.u32 2147483648, %v3815_v24  ;;  %vm1079_vm9 = vweird.f32 %v3815_v24  ;;  %v1083_v42 = vand.u32 2147483647, %v3815_v24 }
 0x87c   :  { %v865_v49 = vsub.f32 1.0, %v864_v35  ;;  %v3831_v50 = vpop.xlane.xlu2 %1182  ;;  %v1185_v5 = vmul.f32 %v3817_v36, %v3808_v10  ;;  %v987_v38 = vsel %vm3864_vm11, %v3803_v47, %v983_v0  ;;  %vm1190_vm2 = vweird.f32 %v3817_v36 }
 0x87d   :  { %3110 = vrcp.f32 %v3831_v50  ;;  %v992_v29 = vsel %vm989_vm14, %v991_v25, %v987_v38  ;;  %v1195_v35 = vand.u32 2147483648, %v3808_v10  ;;  %vm3899_vm8 = vmor %vm1189_vm15, %vm1190_vm2  ;;  %vm1194_vm11 = vcmp.eq.f32.partialorder %v1193_v34, 8.507059e+37 }
 0x87e   :  { %v866_v55 = vmul.f32 %v3811_v30, %v865_v49  ;;  %v1186_v2 = vsub.f32 1.0, %v1185_v5  ;;  %v993_v49 = vmul.f32 %v3770_v4, %v992_v29  ;;  %vm1204_vm15 = vweird.f32 %v3831_v50 }
 0x87f   :  { %v3003_v61 = vpop.permute.xlu0 %3002  ;;  %v1196_v54 = vor.u32 1.1754944e-38, %v1195_v35  ;;  %v1210_v60 = vand.u32 2147483648, %v3831_v50  ;;  %v1208_v46 = vand.u32 2147483647, %v3831_v50 }
 0x880   :  { %v3004_v63 = vunpack.i.l.bf16 %v3003_v61  ;;  %v867_v6 = vadd.f32 %v3811_v30, %v866_v55  ;;  %v3005_v16 = vunpack.i.h.bf16 %v3003_v61  ;;  %v1187_v22 = vmul.f32 %v3817_v36, %v1186_v2 }
 0x881   :  { %v3843_v1 = vpop.eup %3108  ;;  %v1211_v8 = vor.u32 1.1754944e-38, %v1210_v60 }
 0x882   :  { %v1075_v14 = vmul.f32 %v3843_v1, %v3815_v24  ;;  %904 = vmatpush.msrb.mxu0 %v3004_v63  ;;  %1014 = vmatpush.msra.mxu3 %v3004_v63  ;;  %v3852_v18 = vpop.xlane.xlu1 %1072  ;;  %v871_v59 = vsel %vm3872_vm12, %v3811_v30, %v867_v6  ;;  %v1188_v32 = vadd.f32 %v3817_v36, %v1187_v22  ;;  %vm1080_vm6 = vweird.f32 %v3843_v1 }
 0x883   :  { %v3854_v19 = vpop.eup %3110  ;;  %3112 = vrcp.f32 %v3852_v18  ;;  %v876_v47 = vsel %vm873_vm13, %v875_v26, %v871_v59  ;;  %vm1081_vm10 = vmor %vm1079_vm9, %vm1080_vm6  ;;  %v1086_v24 = vor.u32 1.1754944e-38, %v1085_v39  ;;  %vm1084_vm12 = vcmp.eq.f32.partialorder %v1083_v42, 8.507059e+37 }
 0x884   :  { %v1076_v43 = vsub.f32 1.0, %v1075_v14  ;;  %905 = vmatpush.msrb.mxu0 %v3005_v16  ;;  %1015 = vmatpush.msra.mxu3 %v3005_v16  ;;  %v1200_v48 = vmul.f32 %v3854_v19, %v3831_v50  ;;  %v877_v45 = vmul.f32 %v3774_v57, %v876_v47  ;;  %v1192_v53 = vsel %vm3899_vm8, %v3817_v36, %v1188_v32 }
 0x885   :  { %2894 = vmatmul.msk.f32.vlgmr.msrb.gmra.mxu0 %vm196_vm5, %v862_v21  ;;  %2900 = vmatmul.msk.f32.vlgmr.msra.gmra.mxu3 %vm196_vm5, %v978_v56  ;;  %v1197_v4 = vsel %vm1194_vm11, %v1196_v54, %v1192_v53  ;;  %vm1205_vm13 = vweird.f32 %v3854_v19  ;;  %v1100_v61 = vand.u32 2147483648, %v3852_v18  ;;  %vm1094_vm2 = vweird.f32 %v3852_v18 }
 0x886   :  { %v1077_v27 = vmul.f32 %v3843_v1, %v1076_v43  ;;  %1124 = vmatpush.msra.mxu0 %v3004_v63  ;;  %1234 = vmatpush.msrb.mxu3 %v3004_v63  ;;  %v1201_v33 = vsub.f32 1.0, %v1200_v48  ;;  %v1198_v0 = vmul.f32 %v3778_v62, %v1197_v4  ;;  %vm1206_vm6 = vmor %vm1204_vm15, %vm1205_vm13  ;;  %v1335_v4 = vld [vmem:[%s4742_s14 + $0x8] sm:$0xff] }
 0x887   :  { %v1101_v13 = vor.u32 1.1754944e-38, %v1100_v61  ;;  %v1378_v61 = vld [vmem:[%s4744_s16 + $0x38] sm:$0xff] }
 0x888   :  { %1125 = vmatpush.msra.mxu0 %v3005_v16  ;;  %1235 = vmatpush.msrb.mxu3 %v3005_v16  ;;  %v1078_v30 = vadd.f32 %v3843_v1, %v1077_v27  ;;  %v1202_v5 = vmul.f32 %v3854_v19, %v1201_v33  ;;  %v1248_v16 = vld [vmem:[%s4740_s12 + $0x18] sm:$0xff] }
 0x889   :  { %v3113_v31 = vpop.eup %3112  ;;  %1269 = vmatpush.msrb.mxu2 %v1248_v16  ;;  %1396 = vmatpush.msra.mxu1 %v1378_v61  ;;  %v1468_v61 = vld [vmem:[%s4767_s28 + $0x38] sm:$0xff] }
 0x88a   :  { %v1090_v40 = vmul.f32 %v3113_v31, %v3852_v18  ;;  %v1082_v10 = vsel %vm1081_vm10, %v3843_v1, %v1078_v30  ;;  %vm1095_vm14 = vweird.f32 %v3113_v31  ;;  %v1203_v36 = vadd.f32 %v3854_v19, %v1202_v5  ;;  %1489 = vmatpush.msra.mxu3 %v1468_v61 }
 0x88b   :  { %v1087_v57 = vsel %vm1084_vm12, %v1086_v24, %v1082_v10  ;;  %v1098_v1 = vand.u32 2147483647, %v3852_v18  ;;  %vm1096_vm8 = vmor %vm1094_vm2, %vm1095_vm14  ;;  %vm1209_vm10 = vcmp.eq.f32.partialorder %v1208_v46, 8.507059e+37  ;;  %v1247_v18 = vld [vmem:[%s4740_s12 + $0x10] sm:$0xff] }
 0x88c   :  { %v1091_v52 = vsub.f32 1.0, %v1090_v40  ;;  %v1088_v63 = vmul.f32 %v3782_v3, %v1087_v57  ;;  %v1207_v6 = vsel %vm1206_vm6, %v3854_v19, %v1203_v36  ;;  %v1246_v19 = vld [vmem:[%s4740_s12 + $0x8] sm:$0xff]  ;;  %1270 = vmatpush.msrb.mxu2 %v1247_v18  ;;  %v1334_v57 = vld [vmem:[%s4742_s14] sm:$0xff]  ;;  %v1377_v46 = vld [vmem:[%s4744_s16 + $0x30] sm:$0xff]  ;;  %vm1381_vm6 = vcmask 523264  }
 0x88d   :  { %2895 = vmatmul.msk.f32.gmra.mxu0 %vm196_vm5, %v877_v45  ;;  %2901 = vmatmul.msk.f32.gmra.mxu3 %vm196_vm5, %v993_v49  ;;  %vm1099_vm9 = vcmp.eq.f32.partialorder %v1098_v1, 8.507059e+37  ;;  %v1212_v14 = vsel %vm1209_vm10, %v1211_v8, %v1207_v6 }
 0x88e   :  { %v1092_v55 = vmul.f32 %v3113_v31, %v1091_v52  ;;  %v1213_v62 = vmul.f32 %v3786_v11, %v1212_v14  ;;  %1271 = vmatpush.msrb.mxu2 %v1246_v19  ;;  %v1245_v11 = vld [vmem:[%s4740_s12] sm:$0xff]  ;;  %1397 = vmatpush.msra.mxu1 %v1377_v46  ;;  %v1467_v46 = vld [vmem:[%s4767_s28 + $0x30] sm:$0xff] }
 0x88f   :  { %1490 = vmatpush.msra.mxu3 %v1467_v46 }
 0x890   :  { %v1093_v44 = vadd.f32 %v3113_v31, %v1092_v55  ;;  %1272 = vmatpush.msrb.mxu2 %v1245_v11  ;;  %v1336_v55 = vld [vmem:[%s4742_s14 + $0x10] sm:$0xff]  ;;  %v3023_v11 = vld [vmem:[%s4746_s18 + $0x1] ss:$0 sm:$0xff] }
 0x892   :  { %v1097_v2 = vsel %vm1096_vm8, %v3113_v31, %v1093_v44  ;;  %v3022_v31 = vld [vmem:[%s4741_s13] ss:$0 sm:$0xff] }
 0x893   :  { %v1102_v50 = vsel %vm1099_vm9, %v1101_v13, %v1097_v2  ;;  %v1375_v2 = vld [vmem:[%s4744_s16 + $0x20] sm:$0xff]  ;;  %v1374_v13 = vld [vmem:[%s4744_s16 + $0x18] sm:$0xff] }
 0x894   :  { %v1103_v3 = vmul.f32 %v3790_v51, %v1102_v50 }
 0x895   :  { %2906 = vmatmul.msk.f32.vlgmr.msra.gmra.mxu0 %vm196_vm5, %v1088_v63  ;;  %2912 = vmatmul.msk.f32.vlgmr.msrb.gmra.mxu3 %vm196_vm5, %v1198_v0  ;;  %v1376_v63 = vld [vmem:[%s4744_s16 + $0x28] sm:$0xff] }
 0x896   :  { %1398 = vmatpush.msra.mxu1 %v1376_v63  ;;  %v1466_v63 = vld [vmem:[%s4767_s28 + $0x28] sm:$0xff] }
 0x897   :  { %1491 = vmatpush.msra.mxu3 %v1466_v63 }
 0x898   :  { %1399 = vmatpush.msra.mxu1 %v1375_v2 }
 0x89a   :  { %1400 = vmatpush.msra.mxu1 %v1374_v13 }
 0x89d   :  { %2907 = vmatmul.msk.f32.gmra.mxu0 %vm196_vm5, %v1103_v3  ;;  %2913 = vmatmul.msk.f32.gmra.mxu3 %vm196_vm5, %v1213_v62 }
 0x902   :  { %v907_v51 = vpop.f32.mrf.mxu0 }
 0x903   :  { %v913_v43 = vsel %vm151_vm3, %v907_v51, 0.0 }
 0x908   :  { %v1017_v21 = vpop.f32.mrf.mxu3 }
 0x909   :  { %v1023_v28 = vsel %vm3539_vm1, %v1017_v21, %v913_v43 }
 0x90a   :  { %v910_v56 = vpop.f32.mrf.mxu0 }
 0x90b   :  { %v914_v25 = vsel %vm151_vm3, %v910_v56, 0.0 }
 0x910   :  { %v1020_v9 = vpop.f32.mrf.mxu3 }
 0x911   :  { %v1024_v26 = vsel %vm3539_vm1, %v1020_v9, %v914_v25  ;;  %v3024_v9 = vld [vmem:[%s4747_s19 + $0x1] ss:$0 sm:$0xff] }
 0x912   :  { %v1127_v23 = vpop.f32.mrf.mxu0 }
 0x913   :  { %v1133_v38 = vsel %vm3490_vm4, %v1127_v23, %v1023_v28 }
 0x918   :  { %v1237_v22 = vpop.f32.mrf.mxu3 }
 0x919   :  { %v1243_v48 = vsel %vm3553_vm7, %v1237_v22, %v1133_v38 }
 0x91a   :  { %2914 = vmatmul.msk.f32.vlgmr.msrb.gmra.mxu2 %vm120_vm0, %v1243_v48  ;;  %v1130_v59 = vpop.f32.mrf.mxu0 }
 0x91b   :  { %v1134_v27 = vsel %vm3490_vm4, %v1130_v59, %v1024_v26 }
 0x920   :  { %v1240_v47 = vpop.f32.mrf.mxu3 }
 0x921   :  { %v1244_v29 = vsel %vm3553_vm7, %v1240_v47, %v1134_v27  ;;  %v1373_v27 = vld [vmem:[%s4744_s16 + $0x10] sm:$0xff]  ;;  %v1372_v47 = vld [vmem:[%s4744_s16 + $0x8] sm:$0xff] }
 0x922   :  { %2915 = vmatmul.msk.f32.gmra.mxu2 %vm120_vm0, %v1244_v29  ;;  %1401 = vmatpush.msra.mxu1 %v1373_v27  ;;  %v1371_v29 = vld [vmem:[%s4744_s16] sm:$0xff] }
 0x924   :  { %1402 = vmatpush.msra.mxu1 %v1372_v47 }
 0x926   :  { %1403 = vmatpush.msra.mxu1 %v1371_v29  ;;  %v3029_v29 = vld [vmem:[%s4768_s26 + $0x1] ss:$0 sm:$0xff] }
 0x99d   :  { %v1274_v32 = vpop.f32.mrf.mxu2 }
 0x99e   :  { %v1275_v30 = vadd.f32 %v3022_v31, %v1274_v32 }
 0x9a0   :  { %v1280_v33 = vadd.f32 %v1275_v30, %v3688_v37 }
 0x9a2   :  { %v1284_v34 = vsel %vm120_vm0, %v1280_v33, 0.0 }
 0x9a3   :  { %1285 = vadd.xlane.f32.xlu2 %v1284_v34 }
 0x9a5   :  { %v1277_v35 = vpop.f32.mrf.mxu2 }
 0x9a6   :  { %v1278_v39 = vadd.f32 %v3022_v31, %v1277_v35  ;;  %v3025_v31 = vld [vmem:[%s4743_s15] ss:$0 sm:$0xff] }
 0x9a8   :  { %v1281_v40 = vadd.f32 %v1278_v39, %v3692_v15  ;;  %v1337_v15 = vld [vmem:[%s4742_s14 + $0x18] sm:$0xff] }
 0x9a9   :  { %1358 = vmatpush.msrb.mxu0 %v1337_v15 }
 0x9aa   :  { %v1287_v41 = vsel %vm120_vm0, %v1281_v40, 0.0 }
 0x9ab   :  { %1288 = vadd.xlane.f32.xlu0 %v1287_v41  ;;  %1359 = vmatpush.msrb.mxu0 %v1336_v55 }
 0x9ad   :  { %1360 = vmatpush.msrb.mxu0 %v1335_v4 }
 0x9af   :  { %1361 = vmatpush.msrb.mxu0 %v1334_v57 }
 0xa16   :  { %v1286_v42 = vpop.xlane.xlu2 %1285 }
 0xa17   :  { %v1290_v45 = vmul.f32 %v1286_v42, %v3661_v58 }
 0xa19   :  { %v1292_v49 = vsub.f32 %v1280_v33, %v1290_v45 }
 0xa1b   :  { %v1294_v52 = vmul.f32 %v1292_v49, %v1292_v49 }
 0xa1d   :  { %v1296_v53 = vsel %vm120_vm0, %v1294_v52, 0.0 }
 0xa1e   :  { %v1289_v10 = vpop.xlane.xlu0 %1288  ;;  %1297 = vadd.xlane.f32.xlu1 %v1296_v53 }
 0xa1f   :  { %v1291_v37 = vmul.f32 %v1289_v10, %v3661_v58 }
 0xa21   :  { %v1293_v5 = vsub.f32 %v1281_v40, %v1291_v37  ;;  %v3026_v40 = vld [vmem:[%s4745_s17] ss:$0 sm:$0xff] }
 0xa23   :  { %v1295_v54 = vmul.f32 %v1293_v5, %v1293_v5 }
 0xa25   :  { %v1299_v24 = vsel %vm120_vm0, %v1295_v54, 0.0 }
 0xa26   :  { %1300 = vadd.xlane.f32.xlu2 %v1299_v24 }
 0xa91   :  { %v1298_v44 = vpop.xlane.xlu1 %1297 }
 0xa92   :  { %v1302_v36 = vmul.f32 %v1298_v44, %v3661_v58 }
 0xa94   :  { %v1304_v60 = vadd.f32 1e-05, %v1302_v36 }
 0xa96   :  { %3114 = vrsqrt.f32 %v1304_v60  ;;  %vm1312_vm12 = vweird.f32 %v1304_v60 }
 0xa99   :  { %v1301_v0 = vpop.xlane.xlu2 %1300 }
 0xa9a   :  { %v1303_v1 = vmul.f32 %v1301_v0, %v3661_v58  ;;  %v1465_v0 = vld [vmem:[%s4767_s28 + $0x20] sm:$0xff] }
 0xa9b   :  { %1492 = vmatpush.msra.mxu3 %v1465_v0 }
 0xa9c   :  { %v3115_v6 = vpop.eup %3114  ;;  %v1305_v8 = vadd.f32 1e-05, %v1303_v1 }
 0xa9d   :  { %v1307_v50 = vmul.f32 %v3115_v6, %v1304_v60  ;;  %vm1313_vm11 = vweird.f32 %v3115_v6 }
 0xa9e   :  { %3116 = vrsqrt.f32 %v1305_v8  ;;  %vm1314_vm13 = vmor %vm1312_vm12, %vm1313_vm11  ;;  %vm1322_vm15 = vweird.f32 %v1305_v8 }
 0xa9f   :  { %v1308_v14 = vmul.f32 %v3115_v6, %v1307_v50 }
 0xaa1   :  { %v1309_v3 = vmul.f32 0.5, %v1308_v14 }
 0xaa3   :  { %v1310_v62 = vsub.f32 1.5, %v1309_v3 }
 0xaa4   :  { %v3117_v16 = vpop.eup %3116 }
 0xaa5   :  { %v1311_v18 = vmul.f32 %v3115_v6, %v1310_v62  ;;  %v1317_v19 = vmul.f32 %v3117_v16, %v1305_v8  ;;  %vm1323_vm14 = vweird.f32 %v3117_v16 }
 0xaa6   :  { %vm1324_vm2 = vmor %vm1322_vm15, %vm1323_vm14 }
 0xaa7   :  { %v1315_v51 = vsel %vm1314_vm13, %v3115_v6, %v1311_v18  ;;  %v1318_v21 = vmul.f32 %v3117_v16, %v1317_v19 }
 0xaa8   :  { %v1326_v56 = vmul.f32 %v1315_v51, %v1292_v49 }
 0xaa9   :  { %v1319_v23 = vmul.f32 0.5, %v1318_v21  ;;  %v3027_v21 = vld [vmem:[%s4746_s18 + $0x2] ss:$0 sm:$0xff] }
 0xaaa   :  { %v1329_v43 = vmul.f32 %v3023_v11, %v1326_v56 }
 0xaab   :  { %v1320_v28 = vsub.f32 1.5, %v1319_v23 }
 0xaac   :  { %v1332_v38 = vadd.f32 %v3024_v9, %v1329_v43  ;;  %v3028_v43 = vld [vmem:[%s4747_s19 + $0x2] ss:$0 sm:$0xff] }
 0xaad   :  { %v1321_v22 = vmul.f32 %v3117_v16, %v1320_v28 }
 0xaae   :  { %2916 = vmatmul.msk.f32.vlgmr.msrb.gmra.mxu0 %vm120_vm0, %v1332_v38 }
 0xaaf   :  { %v1325_v48 = vsel %vm1324_vm2, %v3117_v16, %v1321_v22 }
 0xab0   :  { %v1327_v59 = vmul.f32 %v1325_v48, %v1293_v5 }
 0xab2   :  { %v1330_v25 = vmul.f32 %v3023_v11, %v1327_v59 }
 0xab4   :  { %v1333_v26 = vadd.f32 %v3024_v9, %v1330_v25 }
 0xab6   :  { %2917 = vmatmul.msk.f32.gmra.mxu0 %vm120_vm0, %v1333_v26 }
 0xb2b   :  { %v1363_v32 = vpop.f32.mrf.mxu0 }
 0xb2c   :  { %v1364_v30 = vadd.f32 %v3025_v31, %v1363_v32 }
 0xb2e   :  { %v1369_v33 = vmax.f32 %v1364_v30, 0.0 }
 0xb30   :  { %2918 = vmatmul.msk.f32.vlgmr.msra.gmra.mxu1 %vm1381_vm6, %v1369_v33 }
 0xb33   :  { %v1366_v34 = vpop.f32.mrf.mxu0 }
 0xb34   :  { %v1367_v35 = vadd.f32 %v3025_v31, %v1366_v34 }
 0xb36   :  { %v1370_v39 = vmax.f32 %v1367_v35, 0.0 }
 0xb38   :  { %2919 = vmatmul.msk.f32.gmra.mxu1 %vm1381_vm6, %v1370_v39 }
 0xbad   :  { %v1405_v41 = vpop.f32.mrf.mxu1 }
 0xbae   :  { %v1406_v42 = vadd.f32 %v3026_v40, %v1405_v41 }
 0xbb0   :  { %v1411_v45 = vadd.f32 %v1406_v42, %v1332_v38 }
 0xbb2   :  { %v1415_v49 = vsel %vm120_vm0, %v1411_v45, 0.0 }
 0xbb3   :  { %1416 = vadd.xlane.f32.xlu1 %v1415_v49 }
 0xbb5   :  { %v1408_v52 = vpop.f32.mrf.mxu1 }
 0xbb6   :  { %v1409_v53 = vadd.f32 %v3026_v40, %v1408_v52 }
 0xbb8   :  { %v1412_v10 = vadd.f32 %v1409_v53, %v1333_v26 }
 0xbba   :  { %v1418_v37 = vsel %vm120_vm0, %v1412_v10, 0.0 }
 0xbbb   :  { %1419 = vadd.xlane.f32.xlu2 %v1418_v37 }
 0xc26   :  { %v1417_v5 = vpop.xlane.xlu1 %1416 }
 0xc27   :  { %v1421_v54 = vmul.f32 %v1417_v5, %v3661_v58  ;;  %v3202_v5 = vld [vmem:[%s4771_s4] sm:$0xff] }
 0xc29   :  { %v1423_v24 = vsub.f32 %v1411_v45, %v1421_v54 }
 0xc2b   :  { %v1425_v15 = vmul.f32 %v1423_v24, %v1423_v24 }
 0xc2d   :  { %v1427_v55 = vsel %vm120_vm0, %v1425_v15, 0.0 }
 0xc2e   :  { %1428 = vadd.xlane.f32.xlu1 %v1427_v55  ;;  %v1420_v4 = vpop.xlane.xlu2 %1419 }
 0xc2f   :  { %v1422_v57 = vmul.f32 %v1420_v4, %v3661_v58 }
 0xc31   :  { %v1424_v44 = vsub.f32 %v1412_v10, %v1422_v57  ;;  %v3203_v57 = vld [vmem:[%s4771_s4 + $0x8] sm:$0xff] }
 0xc33   :  { %v1426_v36 = vmul.f32 %v1424_v44, %v1424_v44 }
 0xc35   :  { %v1430_v60 = vsel %vm120_vm0, %v1426_v36, 0.0 }
 0xc36   :  { %1431 = vadd.xlane.f32.xlu2 %v1430_v60 }
 0xca1   :  { %v1429_v1 = vpop.xlane.xlu1 %1428 }
 0xca2   :  { %v1433_v2 = vmul.f32 %v1429_v1, %v3661_v58 }
 0xca4   :  { %v1435_v6 = vadd.f32 1e-05, %v1433_v2 }
 0xca6   :  { %3118 = vrsqrt.f32 %v1435_v6  ;;  %vm1443_vm9 = vweird.f32 %v1435_v6 }
 0xca9   :  { %v1432_v8 = vpop.xlane.xlu2 %1431 }
 0xcaa   :  { %v1434_v13 = vmul.f32 %v1432_v8, %v3661_v58 }
 0xcac   :  { %v3119_v50 = vpop.eup %3118  ;;  %v1436_v14 = vadd.f32 1e-05, %v1434_v13 }
 0xcad   :  { %v1438_v3 = vmul.f32 %v3119_v50, %v1435_v6  ;;  %vm1444_vm8 = vweird.f32 %v3119_v50 }
 0xcae   :  { %3120 = vrsqrt.f32 %v1436_v14  ;;  %vm1445_vm10 = vmor %vm1443_vm9, %vm1444_vm8  ;;  %vm1453_vm12 = vweird.f32 %v1436_v14 }
 0xcaf   :  { %v1439_v62 = vmul.f32 %v3119_v50, %v1438_v3 }
 0xcb1   :  { %v1440_v16 = vmul.f32 0.5, %v1439_v62 }
 0xcb3   :  { %v1441_v18 = vsub.f32 1.5, %v1440_v16 }
 0xcb4   :  { %v3121_v19 = vpop.eup %3120 }
 0xcb5   :  { %v1442_v11 = vmul.f32 %v3119_v50, %v1441_v18  ;;  %v1448_v51 = vmul.f32 %v3121_v19, %v1436_v14  ;;  %vm1454_vm11 = vweird.f32 %v3121_v19 }
 0xcb6   :  { %vm1455_vm13 = vmor %vm1453_vm12, %vm1454_vm11 }
 0xcb7   :  { %v1446_v56 = vsel %vm1445_vm10, %v3119_v50, %v1442_v11  ;;  %v1449_v9 = vmul.f32 %v3121_v19, %v1448_v51 }
 0xcb8   :  { %v1457_v23 = vmul.f32 %v1446_v56, %v1423_v24 }
 0xcb9   :  { %v1450_v28 = vmul.f32 0.5, %v1449_v9 }
 0xcba   :  { %v1460_v38 = vmul.f32 %v3027_v21, %v1457_v23 }
 0xcbb   :  { %v1451_v22 = vsub.f32 1.5, %v1450_v28 }
 0xcbc   :  { %v4052_v48 = vadd.f32 %v3028_v43, %v1460_v38 }
 0xcbd   :  { %v1452_v59 = vmul.f32 %v3121_v19, %v1451_v22 }
 0xcbe   :  { %2920 = vmatmul.msk.f32.vlgmr.msra.gmra.mxu3 %vm120_vm0, %v4052_v48 }
 0xcbf   :  { %v1456_v25 = vsel %vm1455_vm13, %v3121_v19, %v1452_v59 }
 0xcc0   :  { %v1458_v26 = vmul.f32 %v1456_v25, %v1424_v44 }
 0xcc2   :  { %v1461_v27 = vmul.f32 %v3027_v21, %v1458_v26 }
 0xcc4   :  { %v4056_v47 = vadd.f32 %v3028_v43, %v1461_v27 }
 0xcc6   :  { %2921 = vmatmul.msk.f32.gmra.mxu3 %vm120_vm0, %v4056_v47 }
 0xd41   :  { %v1494_v31 = vpop.f32.mrf.mxu3 }
 0xd42   :  { %v4063_v32 = vadd.f32 %v3029_v29, %v1494_v31 }
 0xd44   :  { %1504 = vrot.lane.b32.xlu2 %v4063_v32, %s3290_s2  ;;  %v1500_v40 = vsel %vm151_vm3, %v4063_v32, 0.0  ;;  %v1626_v41 = vsel %vm3539_vm1, %v4063_v32, 0.0  ;;  %v1736_v49 = vsel %vm3490_vm4, %v4063_v32, 0.0  ;;  %v1846_v52 = vsel %vm3553_vm7, %v4063_v32, 0.0 }
 0xd49   :  { %v1497_v30 = vpop.f32.mrf.mxu3 }
 0xd4a   :  { %v4067_v33 = vadd.f32 %v3029_v29, %v1497_v30 }
 0xd4c   :  { %1506 = vrot.lane.b32.xlu1 %v4067_v33, %s3290_s2  ;;  %v3006_v34 = vpack.i.bf16 %v4063_v32, %v4067_v33  ;;  %v1501_v42 = vsel %vm151_vm3, %v4067_v33, 0.0  ;;  %v1627_v45 = vsel %vm3539_vm1, %v4067_v33, 0.0  ;;  %v1737_v53 = vsel %vm3490_vm4, %v4067_v33, 0.0 }
 0xd4d   :  { %v1847_v10 = vsel %vm3553_vm7, %v4067_v33, 0.0 }
 0xd9e   :  { %v1505_v39 = vpop.permute.xlu2 %1504 }
 0xdbe   :  { %v1507_v35 = vpop.permute.xlu1 %1506 }
 0xdbf   :  { %2922 = vmatpush.xpose.msk.msra.mxu2 %vm120_vm0, %v1507_v35  ;;  %2928 = vmatpush.xpose.msk.msrb.mxu1 %vm120_vm0, %v1507_v35 }
 0xdc3   :  { %2923 = vmatpush.xpose.msk.msra.mxu2 %vm120_vm0, %v1505_v39  ;;  %2929 = vmatpush.xpose.msk.msrb.mxu1 %vm120_vm0, %v1505_v39 }
 0xdc6   :  { %2924 = vmatmul.msk.f32.vlgmr.msra.gmra.mxu2 %vm120_vm0, %v1500_v40  ;;  %2930 = vmatmul.msk.f32.vlgmr.msrb.gmra.mxu1 %vm120_vm0, %v1626_v41 }
 0xdc7   :  { %2934 = vmatpush.xpose.msk.msrb.mxu2 %vm120_vm0, %v1507_v35  ;;  %2940 = vmatpush.xpose.msk.msra.mxu1 %vm120_vm0, %v1507_v35 }
 0xdcb   :  { %2935 = vmatpush.xpose.msk.msrb.mxu2 %vm120_vm0, %v1505_v39  ;;  %2941 = vmatpush.xpose.msk.msra.mxu1 %vm120_vm0, %v1505_v39 }
 0xdce   :  { %2925 = vmatmul.msk.f32.gmra.mxu2 %vm120_vm0, %v1501_v42  ;;  %2931 = vmatmul.msk.f32.gmra.mxu1 %vm120_vm0, %v1627_v45 }
 0xdd6   :  { %2936 = vmatmul.msk.f32.vlgmr.msrb.gmra.mxu2 %vm120_vm0, %v1736_v49  ;;  %2942 = vmatmul.msk.f32.vlgmr.msra.gmra.mxu1 %vm120_vm0, %v1846_v52 }
 0xdde   :  { %2937 = vmatmul.msk.f32.gmra.mxu2 %vm120_vm0, %v1737_v53  ;;  %2943 = vmatmul.msk.f32.gmra.mxu1 %vm120_vm0, %v1847_v10 }
 0xe43   :  { %v1651_v37 = vpop.f32.mrf.mxu1 }
 0xe44   :  { %v1652_v54 = vadd.f32 %v3202_v5, %v1651_v37 }
 0xe46   :  { %v1657_v24 = vsel %vm196_vm5, %v1652_v54, -inf }
 0xe47   :  { %1658 = vmax.xlane.f32.xlu0 %v1657_v24 }
 0xe49   :  { %v1535_v15 = vpop.f32.mrf.mxu2 }
 0xe4a   :  { %v1536_v55 = vadd.f32 %v3202_v5, %v1535_v15 }
 0xe4b   :  { %v1654_v4 = vpop.f32.mrf.mxu1 }
 0xe4c   :  { %v1655_v44 = vadd.f32 %v3203_v57, %v1654_v4  ;;  %v1541_v60 = vsel %vm196_vm5, %v1536_v55, -inf }
 0xe4e   :  { %v1660_v36 = vsel %vm196_vm5, %v1655_v44, -inf }
 0xe4f   :  { %1661 = vmax.xlane.f32.xlu1 %v1660_v36  ;;  %1542 = vmax.xlane.f32.xlu0 %v1541_v60 }
 0xe51   :  { %v1538_v61 = vpop.f32.mrf.mxu2 }
 0xe52   :  { %v1539_v46 = vadd.f32 %v3203_v57, %v1538_v61 }
 0xe53   :  { %v1871_v63 = vpop.f32.mrf.mxu1 }
 0xe54   :  { %v1872_v0 = vadd.f32 %v3202_v5, %v1871_v63  ;;  %v1544_v1 = vsel %vm196_vm5, %v1539_v46, -inf }
 0xe55   :  { %1545 = vmax.xlane.f32.xlu2 %v1544_v1 }
 0xe56   :  { %v1877_v2 = vsel %vm196_vm5, %v1872_v0, -inf }
 0xe57   :  { %1878 = vmax.xlane.f32.xlu0 %v1877_v2 }
 0xe59   :  { %v1761_v6 = vpop.f32.mrf.mxu2 }
 0xe5a   :  { %v1762_v8 = vadd.f32 %v3202_v5, %v1761_v6 }
 0xe5b   :  { %v1874_v50 = vpop.f32.mrf.mxu1 }
 0xe5c   :  { %v1767_v13 = vsel %vm196_vm5, %v1762_v8, -inf  ;;  %v1875_v14 = vadd.f32 %v3203_v57, %v1874_v50 }
 0xe5e   :  { %v1880_v3 = vsel %vm196_vm5, %v1875_v14, -inf }
 0xe5f   :  { %1768 = vmax.xlane.f32.xlu0 %v1767_v13 }
 0xe61   :  { %v1764_v62 = vpop.f32.mrf.mxu2 }
 0xe62   :  { %v1765_v16 = vadd.f32 %v3203_v57, %v1764_v62 }
 0xe64   :  { %v1770_v18 = vsel %vm196_vm5, %v1765_v16, -inf }
 0xe67   :  { %1881 = vmax.xlane.f32.xlu0 %v1880_v3 }
 0xe6f   :  { %1771 = vmax.xlane.f32.xlu0 %v1770_v18 }
 0xeba   :  { %v1659_v19 = vpop.xlane.xlu0 %1658 }
 0xebb   :  { %v1663_v11 = vsub.f32 %v1652_v54, %v1659_v19 }
 0xebd   :  { %v1665_v51 = vmul.f32 1.442695, %v1663_v11 }
 0xebf   :  { %3122 = vpow2.f32 %v1665_v51 }
 0xec2   :  { %v1662_v21 = vpop.xlane.xlu1 %1661  ;;  %v1543_v56 = vpop.xlane.xlu0 %1542 }
 0xec3   :  { %v1664_v9 = vsub.f32 %v1655_v44, %v1662_v21  ;;  %v1547_v23 = vsub.f32 %v1536_v55, %v1543_v56 }
 0xec5   :  { %v4127_v43 = vpop.eup %3122  ;;  %v1667_v28 = vmul.f32 1.442695, %v1664_v9  ;;  %v1549_v38 = vmul.f32 1.442695, %v1547_v23 }
 0xec6   :  { %v1669_v22 = vsel %vm196_vm5, %v4127_v43, 0.0 }
 0xec7   :  { %3124 = vpow2.f32 %v1667_v28  ;;  %1670 = vadd.xlane.f32.xlu0 %v1669_v22 }
 0xec8   :  { %3126 = vpow2.f32 %v1549_v38  ;;  %v1546_v59 = vpop.xlane.xlu2 %1545 }
 0xec9   :  { %v1548_v25 = vsub.f32 %v1539_v46, %v1546_v59 }
 0xeca   :  { %v1879_v26 = vpop.xlane.xlu0 %1878 }
 0xecb   :  { %v1551_v27 = vmul.f32 1.442695, %v1548_v25  ;;  %v1883_v29 = vsub.f32 %v1872_v0, %v1879_v26 }
 0xecd   :  { %v4131_v31 = vpop.eup %3124  ;;  %3128 = vpow2.f32 %v1551_v27  ;;  %v1885_v30 = vmul.f32 1.442695, %v1883_v29 }
 0xece   :  { %v4133_v35 = vpop.eup %3126  ;;  %v1672_v39 = vsel %vm196_vm5, %v4131_v31, 0.0 }
 0xecf   :  { %3130 = vpow2.f32 %v1885_v30  ;;  %1673 = vadd.xlane.f32.xlu1 %v1672_v39  ;;  %v1553_v40 = vsel %vm196_vm5, %v4133_v35, 0.0 }
 0xed0   :  { %1554 = vadd.xlane.f32.xlu2 %v1553_v40 }
 0xed2   :  { %v1769_v41 = vpop.xlane.xlu0 %1768 }
 0xed3   :  { %v4139_v42 = vpop.eup %3128  ;;  %v1773_v45 = vsub.f32 %v1762_v8, %v1769_v41 }
 0xed4   :  { %v1556_v49 = vsel %vm196_vm5, %v4139_v42, 0.0 }
 0xed5   :  { %v4143_v52 = vpop.eup %3130  ;;  %v1775_v53 = vmul.f32 1.442695, %v1773_v45  ;;  %1557 = vadd.xlane.f32.xlu0 %v1556_v49 }
 0xed6   :  { %v1889_v10 = vsel %vm196_vm5, %v4143_v52, 0.0 }
 0xed7   :  { %3132 = vpow2.f32 %v1775_v53 }
 0xed8   :  { %1890 = vadd.xlane.f32.xlu2 %v1889_v10 }
 0xeda   :  { %v1882_v37 = vpop.xlane.xlu0 %1881 }
 0xedb   :  { %v1884_v5 = vsub.f32 %v1875_v14, %v1882_v37 }
 0xedd   :  { %v4147_v54 = vpop.eup %3132  ;;  %v1887_v24 = vmul.f32 1.442695, %v1884_v5 }
 0xede   :  { %v1779_v15 = vsel %vm196_vm5, %v4147_v54, 0.0 }
 0xedf   :  { %3134 = vpow2.f32 %v1887_v24  ;;  %1780 = vadd.xlane.f32.xlu0 %v1779_v15 }
 0xee2   :  { %v1772_v55 = vpop.xlane.xlu0 %1771 }
 0xee3   :  { %v1774_v4 = vsub.f32 %v1765_v16, %v1772_v55 }
 0xee5   :  { %v4151_v57 = vpop.eup %3134  ;;  %v1777_v44 = vmul.f32 1.442695, %v1774_v4 }
 0xee6   :  { %v1892_v36 = vsel %vm196_vm5, %v4151_v57, 0.0 }
 0xee7   :  { %3136 = vpow2.f32 %v1777_v44  ;;  %1893 = vadd.xlane.f32.xlu2 %v1892_v36 }
 0xee8   :  { %3007 = vrot.lane.b32.xlu1 %v3006_v34, %s3291_s27 }
 0xeed   :  { %v4159_v60 = vpop.eup %3136 }
 0xeee   :  { %v1782_v61 = vsel %vm196_vm5, %v4159_v60, 0.0 }
 0xeef   :  { %1783 = vadd.xlane.f32.xlu0 %v1782_v61 }
 0xf3a   :  { %v1671_v46 = vpop.xlane.xlu0 %1670 }
 0xf3b   :  { %3138 = vrcp.f32 %v1671_v46  ;;  %v1686_v51 = vand.u32 2147483648, %v1671_v46  ;;  %vm1680_vm2 = vweird.f32 %v1671_v46  ;;  %v1684_v28 = vand.u32 2147483647, %v1671_v46 }
 0xf3d   :  { %v1687_v27 = vor.u32 1.1754944e-38, %v1686_v51  ;;  %vm1685_vm11 = vcmp.eq.f32.partialorder %v1684_v28, 8.507059e+37 }
 0xf41   :  { %v3139_v0 = vpop.eup %3138 }
 0xf42   :  { %v4163_v1 = vpop.xlane.xlu1 %1673  ;;  %v1676_v2 = vmul.f32 %v3139_v0, %v1671_v46  ;;  %vm1681_vm14 = vweird.f32 %v3139_v0 }
 0xf43   :  { %v1555_v63 = vpop.xlane.xlu2 %1554  ;;  %vm1682_vm8 = vmor %vm1680_vm2, %vm1681_vm14  ;;  %vm1695_vm12 = vweird.f32 %v4163_v1  ;;  %v1701_v44 = vand.u32 2147483648, %v4163_v1  ;;  %v1699_v46 = vand.u32 2147483647, %v4163_v1 }
 0xf44   :  { %3140 = vrcp.f32 %v1555_v63  ;;  %v1677_v33 = vsub.f32 1.0, %v1676_v2  ;;  %v1570_v38 = vand.u32 2147483648, %v1555_v63  ;;  %vm1564_vm9 = vweird.f32 %v1555_v63 }
 0xf45   :  { %3142 = vrcp.f32 %v4163_v1  ;;  %v1568_v22 = vand.u32 2147483647, %v1555_v63 }
 0xf46   :  { %v1678_v3 = vmul.f32 %v3139_v0, %v1677_v33  ;;  %v1571_v41 = vor.u32 1.1754944e-38, %v1570_v38 }
 0xf47   :  { %vm1569_vm13 = vcmp.eq.f32.partialorder %v1568_v22, 8.507059e+37 }
 0xf48   :  { %v4166_v6 = vpop.xlane.xlu0 %1557  ;;  %v1679_v11 = vadd.f32 %v3139_v0, %v1678_v3 }
 0xf49   :  { %3144 = vrcp.f32 %v4166_v6  ;;  %v1585_v36 = vand.u32 2147483648, %v4166_v6  ;;  %vm1579_vm2 = vweird.f32 %v4166_v6  ;;  %v1583_v2 = vand.u32 2147483647, %v4166_v6 }
 0xf4a   :  { %v3141_v32 = vpop.eup %3140  ;;  %v1683_v59 = vsel %vm1682_vm8, %v3139_v0, %v1679_v11 }
 0xf4b   :  { %v1560_v34 = vmul.f32 %v3141_v32, %v1555_v63  ;;  %v4169_v8 = vpop.xlane.xlu2 %1890  ;;  %v4171_v13 = vpop.eup %3142  ;;  %vm1565_vm15 = vweird.f32 %v3141_v32  ;;  %v1688_v45 = vsel %vm1685_vm11, %v1687_v27, %v1683_v59  ;;  %v1586_v3 = vor.u32 1.1754944e-38, %v1585_v36 }
 0xf4c   :  { %3146 = vrcp.f32 %v4169_v8  ;;  %v1691_v62 = vmul.f32 %v4171_v13, %v4163_v1  ;;  %vm4185_vm10 = vmor %vm1564_vm9, %vm1565_vm15  ;;  %vm1696_vm14 = vweird.f32 %v4171_v13  ;;  %v1689_v0 = vmul.f32 %v4127_v43, %v1688_v45 }
 0xf4d   :  { %v1561_v50 = vsub.f32 1.0, %v1560_v34  ;;  %vm4218_vm8 = vmor %vm1695_vm12, %vm1696_vm14  ;;  %vm1584_vm11 = vcmp.eq.f32.partialorder %v1583_v2, 8.507059e+37  ;;  %vm1700_vm12 = vcmp.eq.f32.partialorder %v1699_v46, 8.507059e+37  ;;  %v1906_v11 = vand.u32 2147483648, %v4169_v8  ;;  %v1958_v46 = vld [vmem:[%s4776_s5 + $0x30] sm:$0xff] }
 0xf4e   :  { %v1692_v56 = vsub.f32 1.0, %v1691_v62  ;;  %vm1900_vm14 = vweird.f32 %v4169_v8 }
 0xf4f   :  { %v4174_v14 = vpop.eup %3144  ;;  %v1562_v16 = vmul.f32 %v3141_v32, %v1561_v50  ;;  %v1702_v50 = vor.u32 1.1754944e-38, %v1701_v44  ;;  %v1907_v25 = vor.u32 1.1754944e-38, %v1906_v11 }
 0xf50   :  { %v1575_v18 = vmul.f32 %v4174_v14, %v4166_v6  ;;  %v1693_v29 = vmul.f32 %v4171_v13, %v1692_v56  ;;  %vm1580_vm15 = vweird.f32 %v4174_v14 }
 0xf51   :  { %v1563_v9 = vadd.f32 %v3141_v32, %v1562_v16  ;;  %vm4225_vm9 = vmor %vm1579_vm2, %vm1580_vm15 }
 0xf52   :  { %v4180_v19 = vpop.xlane.xlu0 %1780  ;;  %v4183_v21 = vpop.eup %3146  ;;  %v1576_v23 = vsub.f32 1.0, %v1575_v18  ;;  %v1694_v4 = vadd.f32 %v4171_v13, %v1693_v29 }
 0xf53   :  { %3148 = vrcp.f32 %v4180_v19  ;;  %v1896_v26 = vmul.f32 %v4183_v21, %v4169_v8  ;;  %v1567_v30 = vsel %vm4185_vm10, %v3141_v32, %v1563_v9  ;;  %vm1901_vm10 = vweird.f32 %v4183_v21 }
 0xf54   :  { %v1577_v39 = vmul.f32 %v4174_v14, %v1576_v23  ;;  %v1572_v37 = vsel %vm1569_vm13, %v1571_v41, %v1567_v30  ;;  %v1698_v6 = vsel %vm4218_vm8, %v4171_v13, %v1694_v4  ;;  %v1904_v9 = vand.u32 2147483647, %v4169_v8  ;;  %vm4252_vm15 = vmor %vm1900_vm14, %vm1901_vm10 }
 0xf55   :  { %v1897_v5 = vsub.f32 1.0, %v1896_v26  ;;  %v1573_v63 = vmul.f32 %v4133_v35, %v1572_v37  ;;  %v1703_v18 = vsel %vm1700_vm12, %v1702_v50, %v1698_v6  ;;  %v1796_v23 = vand.u32 2147483648, %v4180_v19 }
 0xf56   :  { %v1578_v55 = vadd.f32 %v4174_v14, %v1577_v39  ;;  %vm1790_vm2 = vweird.f32 %v4180_v19  ;;  %v1794_v38 = vand.u32 2147483647, %v4180_v19  ;;  %v1704_v59 = vmul.f32 %v4131_v31, %v1703_v18  ;;  %v3030_v18 = vld [vmem:[%s4735_s7 + $0x1] ss:$0 sm:$0xff] }
 0xf57   :  { %v1898_v33 = vmul.f32 %v4183_v21, %v1897_v5 }
 0xf58   :  { %v1582_v1 = vsel %vm4225_vm9, %v4174_v14, %v1578_v55  ;;  %vm1905_vm9 = vcmp.eq.f32.partialorder %v1904_v9, 8.507059e+37  ;;  %vm1795_vm10 = vcmp.eq.f32.partialorder %v1794_v38, 8.507059e+37 }
 0xf59   :  { %v4195_v40 = vpop.eup %3148  ;;  %v1899_v14 = vadd.f32 %v4183_v21, %v1898_v33  ;;  %v1587_v13 = vsel %vm1584_vm11, %v1586_v3, %v1582_v1 }
 0xf5a   :  { %v1786_v49 = vmul.f32 %v4195_v40, %v4180_v19  ;;  %v3008_v53 = vpop.permute.xlu1 %3007  ;;  %v4200_v10 = vpop.xlane.xlu2 %1893  ;;  %vm1791_vm13 = vweird.f32 %v4195_v40  ;;  %v1588_v22 = vmul.f32 %v4139_v42, %v1587_v13  ;;  %v1797_v19 = vor.u32 1.1754944e-38, %v1796_v23 }
 0xf5b   :  { %v3009_v24 = vunpack.i.l.bf16 %v3008_v53  ;;  %3150 = vrcp.f32 %v4200_v10  ;;  %v3010_v61 = vunpack.i.h.bf16 %v3008_v53  ;;  %v1903_v8 = vsel %vm4252_vm15, %v4183_v21, %v1899_v14  ;;  %vm1792_vm8 = vmor %vm1790_vm2, %vm1791_vm13 }
 0xf5c   :  { %v1787_v15 = vsub.f32 1.0, %v1786_v49  ;;  %v1908_v42 = vsel %vm1905_vm9, %v1907_v25, %v1903_v8  ;;  %vm1915_vm11 = vweird.f32 %v4200_v10  ;;  %v1919_v49 = vand.u32 2147483647, %v4200_v10  ;;  %v2082_v8 = vld [vmem:[%s4738_s10 + $0x30] sm:$0xff] }
 0xf5d   :  { %1615 = vmatpush.msra.mxu0 %v3009_v24  ;;  %1725 = vmatpush.msrb.mxu3 %v3009_v24  ;;  %v1909_v45 = vmul.f32 %v4143_v52, %v1908_v42  ;;  %v3204_v25 = vld [vmem:[#allocation5] sm:$0xff] }
 0xf5e   :  { %v1788_v43 = vmul.f32 %v4195_v40, %v1787_v15  ;;  %vm1920_vm9 = vcmp.eq.f32.partialorder %v1919_v49, 8.507059e+37  ;;  %v2047_v49 = vld [vmem:[%s4736_s8 + $0x30] sm:$0xff] }
 0xf5f   :  { %1616 = vmatpush.msra.mxu0 %v3010_v61  ;;  %1726 = vmatpush.msrb.mxu3 %v3010_v61 }
 0xf60   :  { %2926 = vmatmul.msk.f32.vlgmr.msra.gmra.mxu0 %vm196_vm5, %v1573_v63  ;;  %2932 = vmatmul.msk.f32.vlgmr.msrb.gmra.mxu3 %vm196_vm5, %v1689_v0  ;;  %v1789_v51 = vadd.f32 %v4195_v40, %v1788_v43  ;;  %v1957_v63 = vld [vmem:[%s4776_s5 + $0x28] sm:$0xff] }
 0xf61   :  { %v4238_v34 = vpop.eup %3150  ;;  %1835 = vmatpush.msrb.mxu0 %v3009_v24  ;;  %1945 = vmatpush.msra.mxu3 %v3009_v24 }
 0xf62   :  { %v1911_v62 = vmul.f32 %v4238_v34, %v4200_v10  ;;  %v1784_v16 = vpop.xlane.xlu0 %1783  ;;  %v1793_v26 = vsel %vm1792_vm8, %v4195_v40, %v1789_v51  ;;  %vm1916_vm12 = vweird.f32 %v4238_v34  ;;  %v1921_v40 = vand.u32 2147483648, %v4200_v10 }
 0xf63   :  { %1836 = vmatpush.msrb.mxu0 %v3010_v61  ;;  %1946 = vmatpush.msra.mxu3 %v3010_v61  ;;  %3152 = vrcp.f32 %v1784_v16  ;;  %v1798_v30 = vsel %vm1795_vm10, %v1797_v19, %v1793_v26  ;;  %v1811_v41 = vand.u32 2147483648, %v1784_v16  ;;  %v1809_v5 = vand.u32 2147483647, %v1784_v16  ;;  %vm1917_vm14 = vmor %vm1915_vm11, %vm1916_vm12  ;;  %v1959_v61 = vld [vmem:[%s4776_s5 + $0x38] sm:$0xff] }
 0xf64   :  { %v1912_v56 = vsub.f32 1.0, %v1911_v62  ;;  %v1799_v37 = vmul.f32 %v4147_v54, %v1798_v30  ;;  %vm1805_vm15 = vweird.f32 %v1784_v16  ;;  %v1922_v55 = vor.u32 1.1754944e-38, %v1921_v40  ;;  %1980 = vmatpush.msra.mxu2 %v1959_v61 }
 0xf65   :  { %v1812_v4 = vor.u32 1.1754944e-38, %v1811_v41  ;;  %vm1810_vm8 = vcmp.eq.f32.partialorder %v1809_v5, 8.507059e+37 }
 0xf66   :  { %v1913_v27 = vmul.f32 %v4238_v34, %v1912_v56  ;;  %1981 = vmatpush.msra.mxu2 %v1958_v46 }
 0xf68   :  { %2927 = vmatmul.msk.f32.gmra.mxu0 %vm196_vm5, %v1588_v22  ;;  %2933 = vmatmul.msk.f32.gmra.mxu3 %vm196_vm5, %v1704_v59  ;;  %v1914_v39 = vadd.f32 %v4238_v34, %v1913_v27  ;;  %v2083_v59 = vld [vmem:[%s4738_s10 + $0x38] sm:$0xff] }
 0xf69   :  { %v3153_v29 = vpop.eup %3152  ;;  %1982 = vmatpush.msra.mxu2 %v1957_v63  ;;  %2098 = vmatpush.msrb.mxu1 %v2083_v59  ;;  %v3205_v27 = vld [vmem:[#allocation5 + $0x8] sm:$0xff] }
 0xf6a   :  { %v1801_v31 = vmul.f32 %v3153_v29, %v1784_v16  ;;  %vm1806_vm13 = vweird.f32 %v3153_v29  ;;  %v1918_v15 = vsel %vm1917_vm14, %v4238_v34, %v1914_v39 }
 0xf6b   :  { %vm1807_vm2 = vmor %vm1805_vm15, %vm1806_vm13  ;;  %v1923_v44 = vsel %vm1920_vm9, %v1922_v55, %v1918_v15  ;;  %2099 = vmatpush.msrb.mxu1 %v2082_v8 }
 0xf6c   :  { %v1802_v21 = vsub.f32 1.0, %v1801_v31  ;;  %v1924_v36 = vmul.f32 %v4151_v57, %v1923_v44  ;;  %v1956_v57 = vld [vmem:[%s4776_s5 + $0x20] sm:$0xff] }
 0xf6d   :  { %1983 = vmatpush.msra.mxu2 %v1956_v57 }
 0xf6e   :  { %v1803_v53 = vmul.f32 %v3153_v29, %v1802_v21 }
 0xf70   :  { %2938 = vmatmul.msk.f32.vlgmr.msrb.gmra.mxu0 %vm196_vm5, %v1799_v37  ;;  %2944 = vmatmul.msk.f32.vlgmr.msra.gmra.mxu3 %vm196_vm5, %v1909_v45  ;;  %v1804_v24 = vadd.f32 %v3153_v29, %v1803_v53  ;;  %v2048_v45 = vld [vmem:[%s4736_s8 + $0x38] sm:$0xff]  ;;  %v2046_v53 = vld [vmem:[%s4736_s8 + $0x28] sm:$0xff]  ;;  %v2045_v37 = vld [vmem:[%s4736_s8 + $0x20] sm:$0xff] }
 0xf71   :  { %2069 = vmatpush.msra.mxu0 %v2048_v45 }
 0xf72   :  { %v1808_v52 = vsel %vm1807_vm2, %v3153_v29, %v1804_v24 }
 0xf73   :  { %v1813_v10 = vsel %vm1810_vm8, %v1812_v4, %v1808_v52  ;;  %2070 = vmatpush.msra.mxu0 %v2047_v49 }
 0xf74   :  { %v1814_v54 = vmul.f32 %v4159_v60, %v1813_v10  ;;  %v3033_v10 = vld [vmem:[%s4739_s11 + $0x1] ss:$0 sm:$0xff] }
 0xf75   :  { %2071 = vmatpush.msra.mxu0 %v2046_v53 }
 0xf77   :  { %2072 = vmatpush.msra.mxu0 %v2045_v37 }
 0xf78   :  { %2939 = vmatmul.msk.f32.gmra.mxu0 %vm196_vm5, %v1814_v54  ;;  %2945 = vmatmul.msk.f32.gmra.mxu3 %vm196_vm5, %v1924_v36 }
 0xfdd   :  { %v1618_v60 = vpop.f32.mrf.mxu0 }
 0xfde   :  { %v1624_v35 = vsel %vm151_vm3, %v1618_v60, 0.0 }
 0xfe3   :  { %v1728_v0 = vpop.f32.mrf.mxu3 }
 0xfe4   :  { %v1734_v43 = vsel %vm3539_vm1, %v1728_v0, %v1624_v35  ;;  %v3031_v35 = vld [vmem:[%s4746_s18 + $0x3] ss:$0 sm:$0xff] }
 0xfe5   :  { %v1621_v2 = vpop.f32.mrf.mxu0 }
 0xfe6   :  { %v1625_v3 = vsel %vm151_vm3, %v1621_v2, 0.0 }
 0xfeb   :  { %v1731_v32 = vpop.f32.mrf.mxu3 }
 0xfec   :  { %v1735_v62 = vsel %vm3539_vm1, %v1731_v32, %v1625_v3 }
 0xfed   :  { %v1838_v33 = vpop.f32.mrf.mxu0 }
 0xfee   :  { %v1844_v1 = vsel %vm3490_vm4, %v1838_v33, %v1734_v43 }
 0xff3   :  { %v1948_v6 = vpop.f32.mrf.mxu3 }
 0xff4   :  { %v1954_v34 = vsel %vm3553_vm7, %v1948_v6, %v1844_v1 }
 0xff5   :  { %2946 = vmatmul.msk.f32.vlgmr.msra.gmra.mxu2 %vm120_vm0, %v1954_v34  ;;  %v1841_v50 = vpop.f32.mrf.mxu0  ;;  %v3032_v34 = vld [vmem:[%s4747_s19 + $0x3] ss:$0 sm:$0xff] }
 0xff6   :  { %v1845_v16 = vsel %vm3490_vm4, %v1841_v50, %v1735_v62 }
 0xffb   :  { %v1951_v14 = vpop.f32.mrf.mxu3 }
 0xffc   :  { %v1955_v13 = vsel %vm3553_vm7, %v1951_v14, %v1845_v16 }
 0xffd   :  { %2947 = vmatmul.msk.f32.gmra.mxu2 %vm120_vm0, %v1955_v13 }
0x1078   :  { %v1985_v11 = vpop.f32.mrf.mxu2 }
0x1079   :  { %v1986_v51 = vadd.f32 %v3030_v18, %v1985_v11 }
0x107b   :  { %v1991_v56 = vadd.f32 %v1986_v51, %v4052_v48  ;;  %v2081_v48 = vld [vmem:[%s4738_s10 + $0x28] sm:$0xff] }
0x107c   :  { %2100 = vmatpush.msrb.mxu1 %v2081_v48 }
0x107d   :  { %v1995_v9 = vsel %vm120_vm0, %v1991_v56, 0.0 }
0x107e   :  { %1996 = vadd.xlane.f32.xlu2 %v1995_v9 }
0x1080   :  { %v1988_v23 = vpop.f32.mrf.mxu2 }
0x1081   :  { %v1989_v28 = vadd.f32 %v3030_v18, %v1988_v23 }
0x1083   :  { %v1992_v38 = vadd.f32 %v1989_v28, %v4056_v47  ;;  %v2080_v47 = vld [vmem:[%s4738_s10 + $0x20] sm:$0xff] }
0x1084   :  { %2101 = vmatpush.msrb.mxu1 %v2080_v47 }
0x1085   :  { %v1998_v22 = vsel %vm120_vm0, %v1992_v38, 0.0  ;;  %2950 = vmatmul.msk.f32.vlgmr.msrb.gmra.mxu1 %vm120_vm0, %v3204_v25 }
0x1086   :  { %1999 = vadd.xlane.f32.xlu0 %v1998_v22 }
0x108d   :  { %2951 = vmatmul.msk.f32.gmra.mxu1 %vm120_vm0, %v3205_v27 }
0x10f1   :  { %v1997_v26 = vpop.xlane.xlu2 %1996 }
0x10f2   :  { %v2001_v29 = vmul.f32 %v1997_v26, %v3661_v58 }
0x10f4   :  { %v2003_v19 = vsub.f32 %v1991_v56, %v2001_v29  ;;  %v3034_v56 = vld [vmem:[%s4737_s9 + $0x1] ss:$0 sm:$0xff] }
0x10f6   :  { %v2005_v42 = vmul.f32 %v2003_v19, %v2003_v19 }
0x10f8   :  { %v2007_v31 = vsel %vm120_vm0, %v2005_v42, 0.0 }
0x10f9   :  { %2008 = vadd.xlane.f32.xlu2 %v2007_v31  ;;  %v2000_v30 = vpop.xlane.xlu0 %1999 }
0x10fa   :  { %v2002_v21 = vmul.f32 %v2000_v30, %v3661_v58 }
0x10fc   :  { %v2004_v39 = vsub.f32 %v1992_v38, %v2002_v21 }
0x10fe   :  { %v2006_v40 = vmul.f32 %v2004_v39, %v2004_v39 }
0x1100   :  { %v2010_v41 = vsel %vm120_vm0, %v2006_v40, 0.0  ;;  %v3207_v40 = vld [vmem:[%s4777_s3 + $0x8] sm:$0xff] }
0x1101   :  { %2011 = vadd.xlane.f32.xlu1 %v2010_v41 }
0x1102   :  { %v2103_v55 = vpop.f32.mrf.mxu1 }
0x1103   :  { %v4355_v60 = vadd.f32 %v3033_v10, %v2103_v55 }
0x110a   :  { %v2106_v61 = vpop.f32.mrf.mxu1 }
0x110b   :  { %v4353_v63 = vadd.f32 %v3033_v10, %v2106_v61 }
0x110d   :  { %2952 = vmatpush.xpose.msk.msrb.mxu3 %vm120_vm0, %v4353_v63  ;;  %2958 = vmatpush.xpose.msk.msrb.mxu0 %vm120_vm0, %v4353_v63 }
0x1111   :  { %2953 = vmatpush.xpose.msk.msrb.mxu3 %vm120_vm0, %v4355_v60  ;;  %2959 = vmatpush.xpose.msk.msrb.mxu0 %vm120_vm0, %v4355_v60 }
0x1115   :  { %2964 = vmatpush.xpose.msk.msra.mxu3 %vm120_vm0, %v4353_v63 }
0x1119   :  { %2965 = vmatpush.xpose.msk.msra.mxu3 %vm120_vm0, %v4355_v60 }
0x116c   :  { %v2009_v5 = vpop.xlane.xlu2 %2008 }
0x116d   :  { %v2013_v24 = vmul.f32 %v2009_v5, %v3661_v58 }
0x116f   :  { %v2015_v15 = vadd.f32 1e-05, %v2013_v24 }
0x1171   :  { %3154 = vrsqrt.f32 %v2015_v15  ;;  %vm2023_vm11 = vweird.f32 %v2015_v15 }
0x1174   :  { %v2012_v4 = vpop.xlane.xlu1 %2011 }
0x1175   :  { %v2014_v52 = vmul.f32 %v2012_v4, %v3661_v58 }
0x1177   :  { %v3155_v44 = vpop.eup %3154  ;;  %v2016_v54 = vadd.f32 1e-05, %v2014_v52 }
0x1178   :  { %v2018_v36 = vmul.f32 %v3155_v44, %v2015_v15  ;;  %vm2024_vm10 = vweird.f32 %v3155_v44 }
0x1179   :  { %3156 = vrsqrt.f32 %v2016_v54  ;;  %vm2025_vm12 = vmor %vm2023_vm11, %vm2024_vm10  ;;  %vm2033_vm14 = vweird.f32 %v2016_v54 }
0x117a   :  { %v2019_v46 = vmul.f32 %v3155_v44, %v2018_v36 }
0x117c   :  { %v2020_v57 = vmul.f32 0.5, %v2019_v46 }
0x117e   :  { %v2021_v0 = vsub.f32 1.5, %v2020_v57 }
0x117f   :  { %v3157_v2 = vpop.eup %3156 }
0x1180   :  { %v2022_v32 = vmul.f32 %v3155_v44, %v2021_v0  ;;  %v2028_v33 = vmul.f32 %v3157_v2, %v2016_v54  ;;  %vm2034_vm13 = vweird.f32 %v3157_v2 }
0x1181   :  { %vm2035_vm15 = vmor %vm2033_vm14, %vm2034_vm13 }
0x1182   :  { %v2026_v43 = vsel %vm2025_vm12, %v3155_v44, %v2022_v32  ;;  %v2029_v1 = vmul.f32 %v3157_v2, %v2028_v33 }
0x1183   :  { %v2037_v6 = vmul.f32 %v2026_v43, %v2003_v19  ;;  %v3206_v19 = vld [vmem:[%s4777_s3] sm:$0xff] }
0x1184   :  { %v2030_v50 = vmul.f32 0.5, %v2029_v1 }
0x1185   :  { %v2040_v3 = vmul.f32 %v3031_v35, %v2037_v6 }
0x1186   :  { %v2031_v62 = vsub.f32 1.5, %v2030_v50 }
0x1187   :  { %v4375_v16 = vadd.f32 %v3032_v34, %v2040_v3 }
0x1188   :  { %v2032_v14 = vmul.f32 %v3157_v2, %v2031_v62 }
0x1189   :  { %2948 = vmatmul.msk.f32.vlgmr.msra.gmra.mxu0 %vm120_vm0, %v4375_v16 }
0x118a   :  { %v2036_v13 = vsel %vm2035_vm15, %v3157_v2, %v2032_v14  ;;  %2970 = vmatpush.xpose.msk.msra.mxu0 %vm120_vm0, %v4353_v63 }
0x118b   :  { %v2038_v18 = vmul.f32 %v2036_v13, %v2004_v39 }
0x118d   :  { %v2041_v11 = vmul.f32 %v3031_v35, %v2038_v18 }
0x118e   :  { %2971 = vmatpush.xpose.msk.msra.mxu0 %vm120_vm0, %v4355_v60 }
0x118f   :  { %v4383_v51 = vadd.f32 %v3032_v34, %v2041_v11 }
0x1191   :  { %2949 = vmatmul.msk.f32.gmra.mxu0 %vm120_vm0, %v4383_v51 }
0x1206   :  { %v2074_v9 = vpop.f32.mrf.mxu0 }
0x1207   :  { %v2075_v23 = vadd.f32 %v3034_v56, %v2074_v9 }
0x1209   :  { %v2109_v28 = vsel %vm151_vm3, %v2075_v23, 0.0  ;;  %v2231_v38 = vsel %vm3539_vm1, %v2075_v23, 0.0  ;;  %v2341_v47 = vsel %vm3490_vm4, %v2075_v23, 0.0  ;;  %v2451_v25 = vsel %vm3553_vm7, %v2075_v23, 0.0 }
0x120a   :  { %2954 = vmatmul.msk.f32.vlgmr.msrb.gmra.mxu3 %vm120_vm0, %v2109_v28  ;;  %2960 = vmatmul.msk.f32.vlgmr.msrb.gmra.mxu0 %vm120_vm0, %v2231_v38 }
0x120e   :  { %v2077_v22 = vpop.f32.mrf.mxu0 }
0x120f   :  { %v2078_v59 = vadd.f32 %v3034_v56, %v2077_v22 }
0x1211   :  { %v2110_v8 = vsel %vm151_vm3, %v2078_v59, 0.0  ;;  %v2232_v48 = vsel %vm3539_vm1, %v2078_v59, 0.0  ;;  %v2342_v26 = vsel %vm3490_vm4, %v2078_v59, 0.0  ;;  %v2452_v27 = vsel %vm3553_vm7, %v2078_v59, 0.0 }
0x1212   :  { %2955 = vmatmul.msk.f32.gmra.mxu3 %vm120_vm0, %v2110_v8  ;;  %2961 = vmatmul.msk.f32.gmra.mxu0 %vm120_vm0, %v2232_v48 }
0x121a   :  { %2966 = vmatmul.msk.f32.vlgmr.msra.gmra.mxu3 %vm120_vm0, %v2341_v47  ;;  %2972 = vmatmul.msk.f32.vlgmr.msra.gmra.mxu0 %vm120_vm0, %v2451_v25 }
0x1222   :  { %2967 = vmatmul.msk.f32.gmra.mxu3 %vm120_vm0, %v2342_v26  ;;  %2973 = vmatmul.msk.f32.gmra.mxu0 %vm120_vm0, %v2452_v27 }
0x1287   :  { %v2256_v29 = vpop.f32.mrf.mxu0 }
0x1288   :  { %v2257_v42 = vadd.f32 %v3206_v19, %v2256_v29 }
0x128a   :  { %v2262_v31 = vsel %vm196_vm5, %v2257_v42, -inf }
0x128b   :  { %2263 = vmax.xlane.f32.xlu2 %v2262_v31 }
0x128d   :  { %v2140_v30 = vpop.f32.mrf.mxu3 }
0x128e   :  { %v2141_v21 = vadd.f32 %v3206_v19, %v2140_v30 }
0x128f   :  { %v2259_v39 = vpop.f32.mrf.mxu0 }
0x1290   :  { %v2260_v41 = vadd.f32 %v3207_v40, %v2259_v39  ;;  %v2146_v45 = vsel %vm196_vm5, %v2141_v21, -inf }
0x1291   :  { %2147 = vmax.xlane.f32.xlu0 %v2146_v45 }
0x1292   :  { %v2265_v49 = vsel %vm196_vm5, %v2260_v41, -inf }
0x1293   :  { %2266 = vmax.xlane.f32.xlu2 %v2265_v49 }
0x1295   :  { %v2143_v53 = vpop.f32.mrf.mxu3 }
0x1296   :  { %v2144_v37 = vadd.f32 %v3207_v40, %v2143_v53  ;;  %v3011_v53 = vpack.i.bf16 %v4355_v60, %v4353_v63 }
0x1297   :  { %v2476_v5 = vpop.f32.mrf.mxu0 }
0x1298   :  { %v2477_v24 = vadd.f32 %v3206_v19, %v2476_v5  ;;  %v2149_v15 = vsel %vm196_vm5, %v2144_v37, -inf }
0x1299   :  { %2150 = vmax.xlane.f32.xlu0 %v2149_v15 }
0x129a   :  { %v2482_v55 = vsel %vm196_vm5, %v2477_v24, -inf }
0x129b   :  { %2483 = vmax.xlane.f32.xlu2 %v2482_v55 }
0x129d   :  { %v2366_v4 = vpop.f32.mrf.mxu3 }
0x129e   :  { %v2367_v52 = vadd.f32 %v3206_v19, %v2366_v4 }
0x129f   :  { %v2479_v10 = vpop.f32.mrf.mxu0 }
0x12a0   :  { %v2480_v44 = vadd.f32 %v3207_v40, %v2479_v10  ;;  %v2372_v54 = vsel %vm196_vm5, %v2367_v52, -inf }
0x12a1   :  { %2373 = vmax.xlane.f32.xlu0 %v2372_v54 }
0x12a2   :  { %v2485_v36 = vsel %vm196_vm5, %v2480_v44, -inf }
0x12a3   :  { %2486 = vmax.xlane.f32.xlu2 %v2485_v36 }
0x12a5   :  { %v2369_v61 = vpop.f32.mrf.mxu3 }
0x12a6   :  { %v2370_v46 = vadd.f32 %v3207_v40, %v2369_v61 }
0x12a8   :  { %v2375_v57 = vsel %vm196_vm5, %v2370_v46, -inf }
0x12a9   :  { %2376 = vmax.xlane.f32.xlu0 %v2375_v57 }
0x12fe   :  { %v2264_v0 = vpop.xlane.xlu2 %2263 }
0x12ff   :  { %v2268_v2 = vsub.f32 %v2257_v42, %v2264_v0 }
0x1301   :  { %v2270_v32 = vmul.f32 1.442695, %v2268_v2 }
0x1303   :  { %3158 = vpow2.f32 %v2270_v32 }
0x1304   :  { %v2148_v33 = vpop.xlane.xlu0 %2147 }
0x1305   :  { %v2152_v35 = vsub.f32 %v2141_v21, %v2148_v33 }
0x1306   :  { %v2267_v43 = vpop.xlane.xlu2 %2266 }
0x1307   :  { %v2154_v1 = vmul.f32 1.442695, %v2152_v35  ;;  %v2269_v6 = vsub.f32 %v2260_v41, %v2267_v43 }
0x1309   :  { %v4428_v34 = vpop.eup %3158  ;;  %3160 = vpow2.f32 %v2154_v1  ;;  %v2272_v3 = vmul.f32 1.442695, %v2269_v6 }
0x130a   :  { %v2274_v50 = vsel %vm196_vm5, %v4428_v34, 0.0 }
0x130b   :  { %2275 = vadd.xlane.f32.xlu2 %v2274_v50  ;;  %3162 = vpow2.f32 %v2272_v3 }
0x130c   :  { %v2151_v62 = vpop.xlane.xlu0 %2150 }
0x130d   :  { %v2153_v14 = vsub.f32 %v2144_v37, %v2151_v62 }
0x130e   :  { %v2484_v13 = vpop.xlane.xlu2 %2483 }
0x130f   :  { %v4432_v18 = vpop.eup %3160  ;;  %v2156_v11 = vmul.f32 1.442695, %v2153_v14  ;;  %v2488_v56 = vsub.f32 %v2477_v24, %v2484_v13 }
0x1310   :  { %v2158_v9 = vsel %vm196_vm5, %v4432_v18, 0.0 }
0x1311   :  { %3164 = vpow2.f32 %v2156_v11  ;;  %2159 = vadd.xlane.f32.xlu0 %v2158_v9  ;;  %v2490_v23 = vmul.f32 1.442695, %v2488_v56  ;;  %v4436_v38 = vpop.eup %3162 }
0x1312   :  { %v2277_v25 = vsel %vm196_vm5, %v4436_v38, 0.0 }
0x1313   :  { %3166 = vpow2.f32 %v2490_v23 }
0x1314   :  { %v2374_v28 = vpop.xlane.xlu0 %2373 }
0x1315   :  { %v2378_v22 = vsub.f32 %v2367_v52, %v2374_v28 }
0x1316   :  { %v2487_v59 = vpop.xlane.xlu2 %2486 }
0x1317   :  { %v4438_v8 = vpop.eup %3164  ;;  %v2380_v48 = vmul.f32 1.442695, %v2378_v22  ;;  %v2489_v47 = vsub.f32 %v2480_v44, %v2487_v59 }
0x1318   :  { %v2161_v26 = vsel %vm196_vm5, %v4438_v8, 0.0 }
0x1319   :  { %3168 = vpow2.f32 %v2380_v48  ;;  %2278 = vadd.xlane.f32.xlu0 %v2277_v25  ;;  %2162 = vadd.xlane.f32.xlu1 %v2161_v26  ;;  %v2492_v27 = vmul.f32 1.442695, %v2489_v47  ;;  %v4444_v19 = vpop.eup %3166 }
0x131a   :  { %v2494_v21 = vsel %vm196_vm5, %v4444_v19, 0.0 }
0x131b   :  { %3170 = vpow2.f32 %v2492_v27 }
0x131c   :  { %v2377_v29 = vpop.xlane.xlu0 %2376 }
0x131d   :  { %v2379_v42 = vsub.f32 %v2370_v46, %v2377_v29 }
0x131f   :  { %v4446_v31 = vpop.eup %3168  ;;  %v2382_v30 = vmul.f32 1.442695, %v2379_v42 }
0x1320   :  { %v2384_v39 = vsel %vm196_vm5, %v4446_v31, 0.0 }
0x1321   :  { %3172 = vpow2.f32 %v2382_v30  ;;  %2495 = vadd.xlane.f32.xlu0 %v2494_v21  ;;  %2385 = vadd.xlane.f32.xlu2 %v2384_v39  ;;  %v4452_v40 = vpop.eup %3170 }
0x1322   :  { %v2497_v45 = vsel %vm196_vm5, %v4452_v40, 0.0 }
0x1327   :  { %v4454_v41 = vpop.eup %3172 }
0x1328   :  { %v2387_v49 = vsel %vm196_vm5, %v4454_v41, 0.0 }
0x1329   :  { %2498 = vadd.xlane.f32.xlu0 %v2497_v45  ;;  %2388 = vadd.xlane.f32.xlu2 %v2387_v49 }
0x1332   :  { %3012 = vrot.lane.b32.xlu1 %v3011_v53, %s3290_s2 }
0x137e   :  { %v2276_v37 = vpop.xlane.xlu2 %2275 }
0x137f   :  { %3174 = vrcp.f32 %v2276_v37  ;;  %vm2285_vm9 = vweird.f32 %v2276_v37  ;;  %v2291_v3 = vand.u32 2147483648, %v2276_v37  ;;  %v2289_v11 = vand.u32 2147483647, %v2276_v37 }
0x1381   :  { %v2292_v47 = vor.u32 1.1754944e-38, %v2291_v3  ;;  %vm2290_vm13 = vcmp.eq.f32.partialorder %v2289_v11, 8.507059e+37 }
0x1384   :  { %v2160_v5 = vpop.xlane.xlu0 %2159 }
0x1385   :  { %3176 = vrcp.f32 %v2160_v5  ;;  %v3175_v15 = vpop.eup %3174  ;;  %vm2169_vm11 = vweird.f32 %v2160_v5  ;;  %v2175_v62 = vand.u32 2147483648, %v2160_v5  ;;  %v2173_v9 = vand.u32 2147483647, %v2160_v5 }
0x1386   :  { %v2281_v52 = vmul.f32 %v3175_v15, %v2276_v37  ;;  %vm2286_vm2 = vweird.f32 %v3175_v15 }
0x1387   :  { %vm4487_vm10 = vmor %vm2285_vm9, %vm2286_vm2  ;;  %v2176_v25 = vor.u32 1.1754944e-38, %v2175_v62  ;;  %vm2174_vm14 = vcmp.eq.f32.partialorder %v2173_v9, 8.507059e+37 }
0x1388   :  { %v2282_v63 = vsub.f32 1.0, %v2281_v52 }
0x138a   :  { %v2283_v46 = vmul.f32 %v3175_v15, %v2282_v63 }
0x138b   :  { %v3177_v4 = vpop.eup %3176 }
0x138c   :  { %v4463_v24 = vpop.xlane.xlu0 %2278  ;;  %v4465_v55 = vpop.xlane.xlu1 %2162  ;;  %v2165_v10 = vmul.f32 %v3177_v4, %v2160_v5  ;;  %v2284_v32 = vadd.f32 %v3175_v15, %v2283_v46  ;;  %vm2170_vm8 = vweird.f32 %v3177_v4 }
0x138d   :  { %3178 = vrcp.f32 %v4465_v55  ;;  %vm4495_vm12 = vmor %vm2169_vm11, %vm2170_vm8  ;;  %vm2184_vm8 = vweird.f32 %v4465_v55  ;;  %v2190_v5 = vand.u32 2147483648, %v4465_v55  ;;  %vm2300_vm9 = vweird.f32 %v4463_v24 }
0x138e   :  { %3180 = vrcp.f32 %v4463_v24  ;;  %v2166_v60 = vsub.f32 1.0, %v2165_v10  ;;  %v2288_v23 = vsel %vm4487_vm10, %v3175_v15, %v2284_v32  ;;  %v2306_v15 = vand.u32 2147483648, %v4463_v24 }
0x138f   :  { %v2293_v29 = vsel %vm2290_vm13, %v2292_v47, %v2288_v23  ;;  %v2191_v32 = vor.u32 1.1754944e-38, %v2190_v5 }
0x1390   :  { %v2167_v57 = vmul.f32 %v3177_v4, %v2166_v60  ;;  %v2294_v63 = vmul.f32 %v4428_v34, %v2293_v29  ;;  %v2188_v60 = vand.u32 2147483647, %v4465_v55 }
0x1392   :  { %v2168_v33 = vadd.f32 %v3177_v4, %v2167_v57  ;;  %v2304_v57 = vand.u32 2147483647, %v4463_v24 }
0x1393   :  { %v4473_v36 = vpop.eup %3178 }
0x1394   :  { %v4469_v44 = vpop.xlane.xlu2 %2385  ;;  %v4471_v54 = vpop.xlane.xlu0 %2495  ;;  %v2180_v0 = vmul.f32 %v4473_v36, %v4465_v55  ;;  %v2172_v28 = vsel %vm4495_vm12, %v3177_v4, %v2168_v33  ;;  %vm2185_vm15 = vweird.f32 %v4473_v36  ;;  %v2307_v33 = vor.u32 1.1754944e-38, %v2306_v15 }
0x1395   :  { %v4475_v61 = vpop.eup %3180  ;;  %3182 = vrcp.f32 %v4469_v44  ;;  %v2177_v42 = vsel %vm2174_vm14, %v2176_v25, %v2172_v28  ;;  %vm4525_vm10 = vmor %vm2184_vm8, %vm2185_vm15  ;;  %vm2189_vm12 = vcmp.eq.f32.partialorder %v2188_v60, 8.507059e+37  ;;  %vm2305_vm13 = vcmp.eq.f32.partialorder %v2304_v57, 8.507059e+37 }
0x1396   :  { %v2296_v2 = vmul.f32 %v4475_v61, %v4463_v24  ;;  %3184 = vrcp.f32 %v4471_v54  ;;  %v2181_v35 = vsub.f32 1.0, %v2180_v0  ;;  %vm2301_vm2 = vweird.f32 %v4475_v61 }
0x1397   :  { %v2178_v10 = vmul.f32 %v4432_v18, %v2177_v42  ;;  %vm4534_vm11 = vmor %vm2300_vm9, %vm2301_vm2  ;;  %vm2395_vm2 = vweird.f32 %v4469_v44  ;;  %v2399_v62 = vand.u32 2147483647, %v4469_v44  ;;  %v2401_v11 = vand.u32 2147483648, %v4469_v44 }
0x1398   :  { %v2297_v43 = vsub.f32 1.0, %v2296_v2  ;;  %v2182_v22 = vmul.f32 %v4473_v36, %v2181_v35  ;;  %v2511_v56 = vand.u32 2147483648, %v4471_v54  ;;  %vm2505_vm9 = vweird.f32 %v4471_v54 }
0x1399   :  { %v2509_v23 = vand.u32 2147483647, %v4471_v54 }
0x139a   :  { %v2298_v59 = vmul.f32 %v4475_v61, %v2297_v43  ;;  %v2183_v39 = vadd.f32 %v4473_v36, %v2182_v22  ;;  %v2512_v25 = vor.u32 1.1754944e-38, %v2511_v56 }
0x139b   :  { %v4485_v6 = vpop.eup %3182 }
0x139c   :  { %v4483_v1 = vpop.xlane.xlu2 %2388  ;;  %v4491_v14 = vpop.xlane.xlu0 %2498  ;;  %v2391_v48 = vmul.f32 %v4485_v6, %v4469_v44  ;;  %v2299_v45 = vadd.f32 %v4475_v61, %v2298_v59  ;;  %v2187_v18 = vsel %vm4525_vm10, %v4473_v36, %v2183_v39  ;;  %vm2396_vm14 = vweird.f32 %v4485_v6 }
0x139d   :  { %v4493_v13 = vpop.eup %3184  ;;  %3186 = vrcp.f32 %v4483_v1  ;;  %vm4561_vm8 = vmor %vm2395_vm2, %vm2396_vm14  ;;  %vm2520_vm2 = vweird.f32 %v4491_v14 }
0x139e   :  { %3188 = vrcp.f32 %v4491_v14  ;;  %v2501_v26 = vmul.f32 %v4493_v13, %v4471_v54  ;;  %v2392_v30 = vsub.f32 1.0, %v2391_v48  ;;  %v2303_v34 = vsel %vm4534_vm11, %v4475_v61, %v2299_v45 }
0x139f   :  { %v2192_v61 = vsel %vm2189_vm12, %v2191_v32, %v2187_v18  ;;  %v2308_v35 = vsel %vm2305_vm13, %v2307_v33, %v2303_v34  ;;  %vm2506_vm15 = vweird.f32 %v4493_v13  ;;  %v2402_v54 = vor.u32 1.1754944e-38, %v2401_v11 }
0x13a0   :  { %v2502_v53 = vsub.f32 1.0, %v2501_v26  ;;  %v2393_v0 = vmul.f32 %v4485_v6, %v2392_v30  ;;  %v2193_v28 = vmul.f32 %v4438_v8, %v2192_v61  ;;  %v2309_v22 = vmul.f32 %v4436_v38, %v2308_v35  ;;  %vm2507_vm10 = vmor %vm2505_vm9, %vm2506_vm15 }
0x13a1   :  { %vm2400_vm11 = vcmp.eq.f32.partialorder %v2399_v62, 8.507059e+37  ;;  %vm2510_vm12 = vcmp.eq.f32.partialorder %v2509_v23, 8.507059e+37  ;;  %vm2410_vm15 = vweird.f32 %v4483_v1  ;;  %v2416_v26 = vand.u32 2147483648, %v4483_v1 }
0x13a2   :  { %v2503_v55 = vmul.f32 %v4493_v13, %v2502_v53  ;;  %v2394_v36 = vadd.f32 %v4485_v6, %v2393_v0  ;;  %v2414_v30 = vand.u32 2147483647, %v4483_v1 }
0x13a3   :  { %v4515_v49 = vpop.eup %3186  ;;  %v2417_v53 = vor.u32 1.1754944e-38, %v2416_v26 }
0x13a4   :  { %v3013_v27 = vpop.permute.xlu1 %3012  ;;  %v4518_v37 = vpop.eup %3188  ;;  %v2406_v2 = vmul.f32 %v4515_v49, %v4483_v1  ;;  %v2504_v43 = vadd.f32 %v4493_v13, %v2503_v55  ;;  %v2398_v59 = vsel %vm4561_vm8, %v4485_v6, %v2394_v36  ;;  %vm2411_vm13 = vweird.f32 %v4515_v49  ;;  %v3035_v36 = vld [vmem:[%s4741_s13 + $0x1] ss:$0 sm:$0xff] }
0x13a5   :  { %v3014_v21 = vunpack.i.l.bf16 %v3013_v27  ;;  %v3015_v4 = vunpack.i.h.bf16 %v3013_v27  ;;  %v2516_v24 = vmul.f32 %v4518_v37, %v4491_v14  ;;  %v2403_v38 = vsel %vm2400_vm11, %v2402_v54, %v2398_v59  ;;  %vm2412_vm8 = vmor %vm2410_vm15, %vm2411_vm13 }
0x13a6   :  { %v2407_v50 = vsub.f32 1.0, %v2406_v2  ;;  %v2508_v44 = vsel %vm2507_vm10, %v4493_v13, %v2504_v43  ;;  %vm2521_vm14 = vweird.f32 %v4518_v37  ;;  %v2526_v27 = vand.u32 2147483648, %v4491_v14 }
0x13a7   :  { %2220 = vmatpush.msrb.mxu2 %v3014_v21  ;;  %2330 = vmatpush.msra.mxu1 %v3014_v21  ;;  %v2517_v3 = vsub.f32 1.0, %v2516_v24  ;;  %v2513_v8 = vsel %vm2510_vm12, %v2512_v25, %v2508_v44  ;;  %v2404_v29 = vmul.f32 %v4446_v31, %v2403_v38  ;;  %vm2522_vm9 = vmor %vm2520_vm2, %vm2521_vm14  ;;  %vm2415_vm10 = vcmp.eq.f32.partialorder %v2414_v30, 8.507059e+37  ;;  %v2652_v44 = vld [vmem:[%s4742_s14 + $0x30] sm:$0xff] }
0x13a8   :  { %v2408_v48 = vmul.f32 %v4515_v49, %v2407_v50  ;;  %v2514_v42 = vmul.f32 %v4444_v19, %v2513_v8  ;;  %v2527_v5 = vor.u32 1.1754944e-38, %v2526_v27  ;;  %v2694_v8 = vld [vmem:[%s4744_s16 + $0x78] sm:$0xff] }
0x13a9   :  { %2221 = vmatpush.msrb.mxu2 %v3015_v4  ;;  %2331 = vmatpush.msra.mxu1 %v3015_v4  ;;  %v2518_v47 = vmul.f32 %v4518_v37, %v2517_v3 }
0x13aa   :  { %2956 = vmatmul.msk.f32.vlgmr.msrb.gmra.mxu2 %vm196_vm5, %v2178_v10  ;;  %2962 = vmatmul.msk.f32.vlgmr.msra.gmra.mxu1 %vm196_vm5, %v2294_v63  ;;  %v2409_v6 = vadd.f32 %v4515_v49, %v2408_v48  ;;  %v2651_v48 = vld [vmem:[%s4742_s14 + $0x28] sm:$0xff] }
0x13ab   :  { %2440 = vmatpush.msra.mxu2 %v3014_v21  ;;  %2550 = vmatpush.msrb.mxu1 %v3014_v21  ;;  %v2519_v13 = vadd.f32 %v4518_v37, %v2518_v47  ;;  %v2524_v21 = vand.u32 2147483647, %v4491_v14  ;;  %v2564_v14 = vld [vmem:[%s4740_s12 + $0x38] sm:$0xff]  ;;  %v2650_v47 = vld [vmem:[%s4742_s14 + $0x20] sm:$0xff] }
0x13ac   :  { %v2413_v39 = vsel %vm2412_vm8, %v4515_v49, %v2409_v6  ;;  %v2563_v49 = vld [vmem:[%s4740_s12 + $0x30] sm:$0xff]  ;;  %2585 = vmatpush.msrb.mxu3 %v2564_v14  ;;  %2711 = vmatpush.msrb.mxu0 %v2694_v8 }
0x13ad   :  { %2441 = vmatpush.msra.mxu2 %v3015_v4  ;;  %2551 = vmatpush.msrb.mxu1 %v3015_v4  ;;  %v2523_v45 = vsel %vm2522_vm9, %v4518_v37, %v2519_v13  ;;  %vm2525_vm11 = vcmp.eq.f32.partialorder %v2524_v21, 8.507059e+37  ;;  %v2418_v31 = vsel %vm2415_vm10, %v2417_v53, %v2413_v39  ;;  %v2693_v6 = vld [vmem:[%s4744_s16 + $0x70] sm:$0xff]  ;;  %v2692_v13 = vld [vmem:[%s4744_s16 + $0x68] sm:$0xff]  ;;  %v2690_v21 = vld [vmem:[%s4744_s16 + $0x58] sm:$0xff] }
0x13ae   :  { %v2528_v19 = vsel %vm2525_vm11, %v2527_v5, %v2523_v45  ;;  %v2419_v15 = vmul.f32 %v4454_v41, %v2418_v31  ;;  %2586 = vmatpush.msrb.mxu3 %v2563_v49  ;;  %v2562_v41 = vld [vmem:[%s4740_s12 + $0x28] sm:$0xff]  ;;  %2712 = vmatpush.msrb.mxu0 %v2693_v6 }
0x13af   :  { %v2529_v1 = vmul.f32 %v4452_v40, %v2528_v19  ;;  %v2561_v40 = vld [vmem:[%s4740_s12 + $0x20] sm:$0xff] }
0x13b0   :  { %2587 = vmatpush.msrb.mxu3 %v2562_v41  ;;  %2713 = vmatpush.msrb.mxu0 %v2692_v13 }
0x13b2   :  { %2957 = vmatmul.msk.f32.gmra.mxu2 %vm196_vm5, %v2193_v28  ;;  %2963 = vmatmul.msk.f32.gmra.mxu1 %vm196_vm5, %v2309_v22 }
0x13b3   :  { %2588 = vmatpush.msrb.mxu3 %v2561_v40  ;;  %v3037_v40 = vld [vmem:[%s4747_s19 + $0x4] ss:$0 sm:$0xff] }
0x13ba   :  { %2968 = vmatmul.msk.f32.vlgmr.msra.gmra.mxu2 %vm196_vm5, %v2404_v29  ;;  %2974 = vmatmul.msk.f32.vlgmr.msrb.gmra.mxu1 %vm196_vm5, %v2514_v42  ;;  %v2691_v29 = vld [vmem:[%s4744_s16 + $0x60] sm:$0xff] }
0x13bb   :  { %2714 = vmatpush.msrb.mxu0 %v2691_v29 }
0x13bd   :  { %2715 = vmatpush.msrb.mxu0 %v2690_v21 }
0x13c2   :  { %2969 = vmatmul.msk.f32.gmra.mxu2 %vm196_vm5, %v2419_v15  ;;  %2975 = vmatmul.msk.f32.gmra.mxu1 %vm196_vm5, %v2529_v1  ;;  %v3036_v1 = vld [vmem:[%s4746_s18 + $0x4] ss:$0 sm:$0xff] }
0x1427   :  { %v2333_v37 = vpop.f32.mrf.mxu1 }
0x142d   :  { %v2223_v4 = vpop.f32.mrf.mxu2 }
0x142e   :  { %v2229_v63 = vsel %vm151_vm3, %v2223_v4, 0.0 }
0x142f   :  { %v2336_v52 = vpop.f32.mrf.mxu1  ;;  %v2339_v46 = vsel %vm3539_vm1, %v2333_v37, %v2229_v63 }
0x1435   :  { %v2226_v10 = vpop.f32.mrf.mxu2 }
0x1436   :  { %v2230_v34 = vsel %vm151_vm3, %v2226_v10, 0.0 }
0x1437   :  { %v2553_v60 = vpop.f32.mrf.mxu1  ;;  %v2340_v55 = vsel %vm3539_vm1, %v2336_v52, %v2230_v34  ;;  %v2688_v34 = vld [vmem:[%s4744_s16 + $0x48] sm:$0xff] }
0x143d   :  { %v2443_v57 = vpop.f32.mrf.mxu2 }
0x143e   :  { %v2449_v0 = vsel %vm3490_vm4, %v2443_v57, %v2339_v46 }
0x143f   :  { %v2559_v18 = vsel %vm3553_vm7, %v2553_v60, %v2449_v0  ;;  %v2556_v24 = vpop.f32.mrf.mxu1 }
0x1440   :  { %2976 = vmatmul.msk.f32.vlgmr.msrb.gmra.mxu3 %vm120_vm0, %v2559_v18  ;;  %v2689_v18 = vld [vmem:[%s4744_s16 + $0x50] sm:$0xff] }
0x1441   :  { %2716 = vmatpush.msrb.mxu0 %v2689_v18 }
0x1443   :  { %2717 = vmatpush.msrb.mxu0 %v2688_v34 }
0x1445   :  { %v2446_v2 = vpop.f32.mrf.mxu2 }
0x1446   :  { %v2450_v32 = vsel %vm3490_vm4, %v2446_v2, %v2340_v55  ;;  %v2687_v55 = vld [vmem:[%s4744_s16 + $0x40] sm:$0xff] }
0x1447   :  { %v2560_v33 = vsel %vm3553_vm7, %v2556_v24, %v2450_v32  ;;  %2718 = vmatpush.msrb.mxu0 %v2687_v55  ;;  %v3038_v2 = vld [vmem:[%s4743_s15 + $0x1] ss:$0 sm:$0xff] }
0x1448   :  { %2977 = vmatmul.msk.f32.gmra.mxu3 %vm120_vm0, %v2560_v33 }
0x14c3   :  { %v2590_v61 = vpop.f32.mrf.mxu3 }
0x14c4   :  { %v2591_v17 = vadd.f32 %v3035_v36, %v2590_v61 }
0x14c6   :  { %v2596_v35 = vadd.f32 %v2591_v17, %v4375_v16 }
0x14c8   :  { %v2600_v7 = vsel %vm120_vm0, %v2596_v35, 0.0 }
0x14c9   :  { %2601 = vadd.xlane.f32.xlu2 %v2600_v7 }
0x14cb   :  { %v2593_v43 = vpop.f32.mrf.mxu3 }
0x14cc   :  { %v2594_v50 = vadd.f32 %v3035_v36, %v2593_v43 }
0x14ce   :  { %v2597_v20 = vadd.f32 %v2594_v50, %v4383_v51  ;;  %v2653_v51 = vld [vmem:[%s4742_s14 + $0x38] sm:$0xff] }
0x14cf   :  { %2674 = vmatpush.msrb.mxu2 %v2653_v51 }
0x14d0   :  { %v2603_v12 = vsel %vm120_vm0, %v2597_v20, 0.0 }
0x14d1   :  { %2604 = vadd.xlane.f32.xlu0 %v2603_v12  ;;  %2675 = vmatpush.msrb.mxu2 %v2652_v44 }
0x14d3   :  { %2676 = vmatpush.msrb.mxu2 %v2651_v48 }
0x14d5   :  { %2677 = vmatpush.msrb.mxu2 %v2650_v47 }
0x153c   :  { %v2602_v3 = vpop.xlane.xlu2 %2601 }
0x153d   :  { %v2606_v62 = vmul.f32 %v2602_v3, %v3661_v58 }
0x153f   :  { %v2608_v11 = vsub.f32 %v2596_v35, %v2606_v62  ;;  %v3039_v35 = vld [vmem:[%s4745_s17 + $0x1] ss:$0 sm:$0xff] }
0x1541   :  { %v2610_v56 = vmul.f32 %v2608_v11, %v2608_v11 }
0x1543   :  { %v2612_v9 = vsel %vm120_vm0, %v2610_v56, 0.0 }
0x1544   :  { %2613 = vadd.xlane.f32.xlu2 %v2612_v9  ;;  %v2605_v23 = vpop.xlane.xlu0 %2604 }
0x1545   :  { %v2607_v16 = vmul.f32 %v2605_v23, %v3661_v58 }
0x1547   :  { %v2609_v28 = vsub.f32 %v2597_v20, %v2607_v16 }
0x1549   :  { %v2611_v22 = vmul.f32 %v2609_v28, %v2609_v28 }
0x154b   :  { %v2615_v59 = vsel %vm120_vm0, %v2611_v22, 0.0 }
0x154c   :  { %2616 = vadd.xlane.f32.xlu1 %v2615_v59 }
0x15b7   :  { %v2614_v54 = vpop.xlane.xlu2 %2613 }
0x15b8   :  { %v2618_v25 = vmul.f32 %v2614_v54, %v3661_v58 }
0x15ba   :  { %v2620_v38 = vadd.f32 1e-05, %v2618_v25 }
0x15bc   :  { %3190 = vrsqrt.f32 %v2620_v38  ;;  %vm2628_vm4 = vweird.f32 %v2620_v38 }
0x15bf   :  { %v2617_v26 = vpop.xlane.xlu1 %2616 }
0x15c0   :  { %v2619_v27 = vmul.f32 %v2617_v26, %v3661_v58 }
0x15c2   :  { %v3191_v42 = vpop.eup %3190  ;;  %v2621_v30 = vadd.f32 1e-05, %v2619_v27 }
0x15c3   :  { %v2623_v39 = vmul.f32 %v3191_v42, %v2620_v38  ;;  %vm2629_vm3 = vweird.f32 %v3191_v42 }
0x15c4   :  { %3192 = vrsqrt.f32 %v2621_v30  ;;  %vm2630_vm5 = vmor %vm2628_vm4, %vm2629_vm3  ;;  %vm2638_vm7 = vweird.f32 %v2621_v30 }
0x15c5   :  { %v2624_v45 = vmul.f32 %v3191_v42, %v2623_v39 }
0x15c7   :  { %v2625_v53 = vmul.f32 0.5, %v2624_v45  ;;  %v3040_v45 = vld [vmem:[%s4746_s18 + $0x5] ss:$0 sm:$0xff] }
0x15c9   :  { %v2626_v5 = vsub.f32 1.5, %v2625_v53 }
0x15ca   :  { %v3193_v31 = vpop.eup %3192 }
0x15cb   :  { %v2627_v19 = vmul.f32 %v3191_v42, %v2626_v5  ;;  %v2633_v15 = vmul.f32 %v3193_v31, %v2621_v30  ;;  %vm2639_vm1 = vweird.f32 %v3193_v31 }
0x15cc   :  { %vm2640_vm12 = vmor %vm2638_vm7, %vm2639_vm1 }
0x15cd   :  { %v2631_v14 = vsel %vm2630_vm5, %v3191_v42, %v2627_v19  ;;  %v2634_v49 = vmul.f32 %v3193_v31, %v2633_v15  ;;  %v3041_v19 = vld [vmem:[%s4747_s19 + $0x5] ss:$0 sm:$0xff] }
0x15ce   :  { %v2642_v41 = vmul.f32 %v2631_v14, %v2608_v11 }
0x15cf   :  { %v2635_v37 = vmul.f32 0.5, %v2634_v49 }
0x15d0   :  { %v2645_v4 = vmul.f32 %v3036_v1, %v2642_v41 }
0x15d1   :  { %v2636_v52 = vsub.f32 1.5, %v2635_v37 }
0x15d2   :  { %v2648_v10 = vadd.f32 %v3037_v40, %v2645_v4 }
0x15d3   :  { %v2637_v63 = vmul.f32 %v3193_v31, %v2636_v52 }
0x15d4   :  { %2978 = vmatmul.msk.f32.vlgmr.msrb.gmra.mxu2 %vm120_vm0, %v2648_v10 }
0x15d5   :  { %v2641_v60 = vsel %vm2640_vm12, %v3193_v31, %v2637_v63 }
0x15d6   :  { %v2643_v46 = vmul.f32 %v2641_v60, %v2609_v28 }
0x15d8   :  { %v2646_v57 = vmul.f32 %v3036_v1, %v2643_v46 }
0x15da   :  { %v2649_v0 = vadd.f32 %v3037_v40, %v2646_v57 }
0x15dc   :  { %2979 = vmatmul.msk.f32.gmra.mxu2 %vm120_vm0, %v2649_v0 }
0x1657   :  { %v2679_v24 = vpop.f32.mrf.mxu2 }
0x1658   :  { %v2680_v32 = vadd.f32 %v3038_v2, %v2679_v24 }
0x165a   :  { %v2685_v33 = vmax.f32 %v2680_v32, 0.0 }
0x165c   :  { %2980 = vmatmul.msk.f32.vlgmr.msrb.gmra.mxu0 %vm1381_vm6, %v2685_v33 }
0x165f   :  { %v2682_v36 = vpop.f32.mrf.mxu2 }
0x1660   :  { %v2683_v61 = vadd.f32 %v3038_v2, %v2682_v36 }
0x1662   :  { %v2686_v17 = vmax.f32 %v2683_v61, 0.0 }
0x1664   :  { %2981 = vmatmul.msk.f32.gmra.mxu0 %vm1381_vm6, %v2686_v17 }
0x16d9   :  { %v2720_v7 = vpop.f32.mrf.mxu0 }
0x16da   :  { %v2721_v43 = vadd.f32 %v3039_v35, %v2720_v7 }
0x16dc   :  { %v2726_v50 = vadd.f32 %v2721_v43, %v2648_v10 }
0x16de   :  { %v2730_v20 = vsel %vm120_vm0, %v2726_v50, 0.0 }
0x16df   :  { %2731 = vadd.xlane.f32.xlu0 %v2730_v20 }
0x16e1   :  { %v2723_v12 = vpop.f32.mrf.mxu0 }
0x16e2   :  { %v2724_v3 = vadd.f32 %v3039_v35, %v2723_v12 }
0x16e4   :  { %v2727_v62 = vadd.f32 %v2724_v3, %v2649_v0 }
0x16e6   :  { %v2733_v11 = vsel %vm120_vm0, %v2727_v62, 0.0 }
0x16e7   :  { %2734 = vadd.xlane.f32.xlu2 %v2733_v11 }
0x1752   :  { %v2732_v56 = vpop.xlane.xlu0 %2731 }
0x1753   :  { %v2736_v9 = vmul.f32 %v2732_v56, %v3661_v58 }
0x1755   :  { %v2738_v23 = vsub.f32 %v2726_v50, %v2736_v9  ;;  %v3042_v9 = vld [vmem:[%s4748_s20] ss:$0 sm:$0xff]  ;;  %s3293_s20 = smov [#allocation7]  }
0x1756   :  { %s2842_s2 = sshll.u32 %s3293_s20, 4  ;;  %s2843_s2 = int_to_ptr.vmem [resolvable:$true] %s2842_s2 }
0x1757   :  { %v2740_v16 = vmul.f32 %v2738_v23, %v2738_v23 }
0x1759   :  { %v2742_v28 = vsel %vm120_vm0, %v2740_v16, 0.0 }
0x175a   :  { %v2735_v22 = vpop.xlane.xlu2 %2734  ;;  %2743 = vadd.xlane.f32.xlu0 %v2742_v28  ;;  %v3043_v28 = vld [vmem:[%s4749_s21] ss:$0 sm:$0xff]  ;;  %s4806_s21 = smov 8  }
0x175b   :  { %v2737_v59 = vmul.f32 %v2735_v22, %v3661_v58 }
0x175d   :  { %v2739_v51 = vsub.f32 %v2727_v62, %v2737_v59 }
0x175f   :  { %v2741_v44 = vmul.f32 %v2739_v51, %v2739_v51 }
0x1761   :  { %v2745_v48 = vsel %vm120_vm0, %v2741_v44, 0.0 }
0x1762   :  { %2746 = vadd.xlane.f32.xlu2 %v2745_v48 }
0x17cd   :  { %v2744_v47 = vpop.xlane.xlu0 %2743 }
0x17ce   :  { %v2748_v54 = vmul.f32 %v2744_v47, %v3661_v58 }
0x17d0   :  { %v2750_v25 = vadd.f32 1e-05, %v2748_v54 }
0x17d2   :  { %3194 = vrsqrt.f32 %v2750_v25  ;;  %vm2758_vm13 = vweird.f32 %v2750_v25 }
0x17d5   :  { %v2747_v38 = vpop.xlane.xlu2 %2746 }
0x17d6   :  { %v2749_v8 = vmul.f32 %v2747_v38, %v3661_v58 }
0x17d8   :  { %v3195_v6 = vpop.eup %3194  ;;  %v2751_v13 = vadd.f32 1e-05, %v2749_v8 }
0x17d9   :  { %v2753_v26 = vmul.f32 %v3195_v6, %v2750_v25  ;;  %vm2759_vm6 = vweird.f32 %v3195_v6 }
0x17da   :  { %3196 = vrsqrt.f32 %v2751_v13  ;;  %vm2760_vm14 = vmor %vm2758_vm13, %vm2759_vm6  ;;  %vm2768_vm2 = vweird.f32 %v2751_v13 }
0x17db   :  { %v2754_v27 = vmul.f32 %v3195_v6, %v2753_v26 }
0x17dd   :  { %v2755_v29 = vmul.f32 0.5, %v2754_v27 }
0x17df   :  { %v2756_v42 = vsub.f32 1.5, %v2755_v29 }
0x17e0   :  { %v3197_v30 = vpop.eup %3196 }
0x17e1   :  { %v2757_v21 = vmul.f32 %v3195_v6, %v2756_v42  ;;  %v2763_v39 = vmul.f32 %v3197_v30, %v2751_v13  ;;  %vm2769_vm15 = vweird.f32 %v3197_v30 }
0x17e2   :  { %vm2770_vm8 = vmor %vm2768_vm2, %vm2769_vm15 }
0x17e3   :  { %v2764_v53 = vmul.f32 %v3197_v30, %v2763_v39  ;;  %v2761_v5 = vsel %vm2760_vm14, %v3195_v6, %v2757_v21 }
0x17e4   :  { %v2772_v31 = vmul.f32 %v2761_v5, %v2738_v23 }
0x17e5   :  { %v2765_v15 = vmul.f32 0.5, %v2764_v53 }
0x17e6   :  { %v2775_v1 = vmul.f32 %v3040_v45, %v2772_v31 }
0x17e7   :  { %v2766_v14 = vsub.f32 1.5, %v2765_v15 }
0x17e8   :  { %v2778_v49 = vadd.f32 %v3041_v19, %v2775_v1 }
0x17e9   :  { %v2767_v41 = vmul.f32 %v3197_v30, %v2766_v14 }
0x17ea   :  { %v2780_v40 = vsel %vm120_vm0, %v2778_v49, 0.0 }
0x17eb   :  { %2781 = vadd.xlane.f32.xlu0 %v2780_v40  ;;  %v2771_v37 = vsel %vm2770_vm8, %v3197_v30, %v2767_v41 }
0x17ec   :  { %v2773_v4 = vmul.f32 %v2771_v37, %v2739_v51 }
0x17ee   :  { %v2776_v52 = vmul.f32 %v3040_v45, %v2773_v4 }
0x17f0   :  { %v2779_v10 = vadd.f32 %v3041_v19, %v2776_v52 }
0x17f2   :  { %v2783_v63 = vsel %vm120_vm0, %v2779_v10, 0.0 }
0x17f3   :  { %2784 = vadd.xlane.f32.xlu2 %v2783_v63 }
0x185e   :  { %v2782_v60 = vpop.xlane.xlu0 %2781 }
0x185f   :  { %v2786_v46 = vmul.f32 %v2782_v60, %v3661_v58 }
0x1861   :  { %v2788_v57 = vsub.f32 %v2778_v49, %v2786_v46 }
0x1863   :  { %v2790_v0 = vmul.f32 %v2788_v57, %v2788_v57 }
0x1865   :  { %v2792_v18 = vsel %vm120_vm0, %v2790_v0, 0.0 }
0x1866   :  { %v2785_v34 = vpop.xlane.xlu2 %2784  ;;  %2793 = vadd.xlane.f32.xlu0 %v2792_v18 }
0x1867   :  { %v2787_v55 = vmul.f32 %v2785_v34, %v3661_v58 }
0x1869   :  { %v2789_v2 = vsub.f32 %v2779_v10, %v2787_v55 }
0x186b   :  { %v2791_v24 = vmul.f32 %v2789_v2, %v2789_v2 }
0x186d   :  { %v2795_v32 = vsel %vm120_vm0, %v2791_v24, 0.0 }
0x186e   :  { %2796 = vadd.xlane.f32.xlu2 %v2795_v32 }
0x18d9   :  { %v2794_v33 = vpop.xlane.xlu0 %2793 }
0x18da   :  { %v2798_v36 = vmul.f32 %v2794_v33, %v3661_v58 }
0x18dc   :  { %v2800_v61 = vadd.f32 1e-05, %v2798_v36 }
0x18de   :  { %3198 = vrsqrt.f32 %v2800_v61  ;;  %vm2808_vm10 = vweird.f32 %v2800_v61 }
0x18e1   :  { %v2797_v17 = vpop.xlane.xlu2 %2796 }
0x18e2   :  { %v2799_v35 = vmul.f32 %v2797_v17, %v3661_v58 }
0x18e4   :  { %v3199_v7 = vpop.eup %3198  ;;  %v2801_v43 = vadd.f32 1e-05, %v2799_v35 }
0x18e5   :  { %v2803_v50 = vmul.f32 %v3199_v7, %v2800_v61  ;;  %vm2809_vm9 = vweird.f32 %v3199_v7 }
0x18e6   :  { %3200 = vrsqrt.f32 %v2801_v43  ;;  %vm2810_vm11 = vmor %vm2808_vm10, %vm2809_vm9  ;;  %vm2818_vm4 = vweird.f32 %v2801_v43 }
0x18e7   :  { %v2804_v20 = vmul.f32 %v3199_v7, %v2803_v50 }
0x18e9   :  { %v2805_v12 = vmul.f32 0.5, %v2804_v20 }
0x18eb   :  { %v2806_v3 = vsub.f32 1.5, %v2805_v12 }
0x18ec   :  { %v3201_v62 = vpop.eup %3200 }
0x18ed   :  { %v2807_v11 = vmul.f32 %v3199_v7, %v2806_v3  ;;  %v2813_v56 = vmul.f32 %v3201_v62, %v2801_v43  ;;  %vm2819_vm3 = vweird.f32 %v3201_v62 }
0x18ee   :  { %vm2820_vm5 = vmor %vm2818_vm4, %vm2819_vm3 }
0x18ef   :  { %v2811_v23 = vsel %vm2810_vm11, %v3199_v7, %v2807_v11  ;;  %v2814_v16 = vmul.f32 %v3201_v62, %v2813_v56 }
0x18f0   :  { %v2822_v58 = vmul.f32 %v2811_v23, %v2788_v57 }
0x18f1   :  { %v2815_v22 = vmul.f32 0.5, %v2814_v16 }
0x18f2   :  { %v2828_v59 = vmul.f32 %v3042_v9, %v2822_v58 }
0x18f3   :  { %v2816_v51 = vsub.f32 1.5, %v2815_v22 }
0x18f4   :  { %v2834_v44 = vadd.f32 %v3043_v28, %v2828_v59 }
0x18f5   :  { %v2817_v48 = vmul.f32 %v3201_v62, %v2816_v51 }
0x18f6   :  { %2836 = vst.msk [vmem:[#allocation7] sm:$0xff] %vm120_vm0, %v2834_v44 }
0x18f7   :  { %v2821_v47 = vsel %vm2820_vm5, %v3201_v62, %v2817_v48 }
0x18f8   :  { %v2823_v54 = vmul.f32 %v2821_v47, %v2789_v2 }
0x18fa   :  { %v2829_v25 = vmul.f32 %v3042_v9, %v2823_v54 }
0x18fc   :  { %v2835_v38 = vadd.f32 %v3043_v28, %v2829_v25 }
0x18fe   :  { %2837 = vst.msk [vmem:[#allocation7 + $0x8] sm:$0xff] %vm120_vm0, %v2835_v38 }
0x18ff   :  { %2850 = dma.vmem_to_hbm [thread:$0]  %s2843_s2, 256, %s2845_s1, [#allocation4], %s4807_s24, %s4807_s24, %s4806_s21  }
0x1900   :  { %3284 = dma.done.wait [#allocation4], 256  }
0x1901   :  { %3285 = vsyncadd [#allocation4], 4294967040 }
0x1902   :  { %2855 = vsyncpa [#allocation3], 1 }
0x1903   :  { %2856 = vsyncpa [#allocation6], 1 }
0x1904   :  { %2857 = vsyncpa [#allocation4], 1 }

</bundles_post_ra>
